<compile_context>
chip_gen: v6e
topology: v6e:2x2x1
jax: 0.10.0
libtpu: 0.0.40
codegen_flags: <defaults>
</compile_context>

<pallas_src>
import functools

import jax
import jax.numpy as jnp
from jax import lax
from jax.experimental import pallas as pl
from jax.experimental.pallas import tpu as pltpu


_PIPE_VMEM_BUDGET = 16 * 1024 * 1024   # target bytes for double-buffered slabs
_VMEM_LIMIT = 40 * 1024 * 1024         # scoped VMEM request (fits v5e/v6e/v7x)


def _cdiv(a, b):
    return -(-a // b)


def _round_up(x, m):
    return _cdiv(x, m) * m


def _default_fuse_sets():
    # Block-diagonal re/im fusion halves the serial recurrence step count on
    # single-TensorCore chips (v5e / v6e).  On multi-TC chips (v4 / v5p / v7x)
    # keep the two weight sets on a "parallel" grid axis instead.
    try:
        kind = jax.devices()[0].device_kind.lower()
    except Exception:
        return False
    return any(t in kind for t in
               ("v5e", "v5 lite", "v5lite", "v6e", "v6 lite", "v6lite"))


# ----------------------------------------------------------------------------
# Kernel 1: batched dense matmul + bias (hoisted x@Wih and the output Linear).
# Grid = (n_sets [parallel], n_row_chunks [parallel]).
# ----------------------------------------------------------------------------
def matmul_bias_kernel(x_ref, w_ref, b_ref, o_ref):
    # x_ref: (TM, K)  w_ref: (K, N)  b_ref: (1, N)  o_ref: (TM, N)
    o_ref[...] = (jnp.dot(x_ref[...], w_ref[...],
                          preferred_element_type=jnp.float32)
                  + b_ref[...]).astype(o_ref.dtype)


def batched_matmul_bias(x, w, b):
    """x: (M, K) [shared] or (S, M, K) [per set]; w: (S, K, N); b: (S, 1, N).

    Returns (S, M, N) float32.
    """
    S, K, N = w.shape
    x_has_set = (x.ndim == 3)
    M = x.shape[-2]

    # VMEM-budget-aware row-chunk size, then minimise padding.
    w_bytes = 2 * (K * N + N) * 4                      # weights + bias, 2 buffers
    per_row = 2 * (K + N) * 4                          # x row + out row, 2 buffers
    tm_cap = max(8, min(1024, (_PIPE_VMEM_BUDGET - w_bytes) // per_row))
    n_chunks = _cdiv(M, tm_cap)
    TM = _round_up(_cdiv(M, n_chunks), 8)
    M_pad = n_chunks * TM
    if M_pad != M:
        pad = [(0, 0)] * x.ndim
        pad[-2] = (0, M_pad - M)
        x = jnp.pad(x, pad)

    if x_has_set:
        x_spec = pl.BlockSpec((None, TM, K), lambda s, i: (s, i, 0))
    else:
        x_spec = pl.BlockSpec((TM, K), lambda s, i: (i, 0))

    out = pl.pallas_call(
        matmul_bias_kernel,
        out_shape=jax.ShapeDtypeStruct((S, M_pad, N), jnp.float32),
        grid_spec=pltpu.PrefetchScalarGridSpec(
            num_scalar_prefetch=0,
            grid=(S, n_chunks),
            in_specs=[
                x_spec,
                pl.BlockSpec((None, K, N), lambda s, i: (s, 0, 0)),
                pl.BlockSpec((None, 1, N), lambda s, i: (s, 0, 0)),
            ],
            out_specs=pl.BlockSpec((None, TM, N), lambda s, i: (s, i, 0)),
        ),
        compiler_params=pltpu.CompilerParams(
            dimension_semantics=("parallel", "parallel"),
            vmem_limit_bytes=_VMEM_LIMIT),
    )(x, w, b)
    return out[:, :M]


# ----------------------------------------------------------------------------
# Kernel 2: GRU recurrence.  gi (input contribution, biases pre-fused, gates
# concatenated along lanes) is precomputed; only h @ Whh (single fused (Hh,3Hh)
# matmul per step) stays on the serial path.
# Grid = (n_sets [parallel], n_time_chunks [arbitrary]).
# ----------------------------------------------------------------------------
def gru_recurrence_kernel(gi_ref, whh_ref, bn_ref, o_ref, h_scr, *, hh, unroll):
    @pl.when(pl.program_id(1) == 0)
    def _():
        h_scr[...] = jnp.zeros_like(h_scr)

    tq = gi_ref.shape[0]
    bf = h_scr.shape[0]
    whh = whh_ref[...]                                    # (Hh, 3*Hh)
    bn_b = jnp.broadcast_to(bn_ref[...], (bf, hh))        # hoisted broadcast

    def step(t, h):
        gi_t = gi_ref[t]                                  # (Bf, 3*Hh)
        gh = jnp.dot(h, whh, preferred_element_type=jnp.float32)
        r = jax.nn.sigmoid(gi_t[:, :hh] + gh[:, :hh])
        z = jax.nn.sigmoid(gi_t[:, hh:2 * hh] + gh[:, hh:2 * hh])
        n = jnp.tanh(gi_t[:, 2 * hh:] + r * (gh[:, 2 * hh:] + bn_b))
        h_new = (1.0 - z) * n + z * h
        o_ref[t] = h_new.astype(o_ref.dtype)
        return h_new

    h_scr[...] = lax.fori_loop(0, tq, step, h_scr[...], unroll=unroll)


def gru_recurrence(gi, whh, bn):
    """gi: (S, T, Bf, 3*Hh); whh: (S, Hh, 3*Hh); bn: (S, 1, Hh) -> (S, T, Bf, Hh)."""
    S, T, Bf, G = gi.shape
    Hh = G // 3

    # VMEM-budget-aware time-chunk size, then minimise time padding.
    per_step_bytes = 2 * Bf * (G + Hh) * 4                # gi + out blocks, 2 buffers
    tq_cap = max(8, min(256, _PIPE_VMEM_BUDGET // max(per_step_bytes, 1)))
    n_chunks = _cdiv(T, tq_cap)
    TQ = _round_up(_cdiv(T, n_chunks), 8)
    T_pad = n_chunks * TQ
    if T_pad != T:
        gi = jnp.pad(gi, ((0, 0), (0, T_pad - T), (0, 0), (0, 0)))

    kernel = functools.partial(gru_recurrence_kernel, hh=Hh, unroll=min(TQ, 8))
    out = pl.pallas_call(
        kernel,
        out_shape=jax.ShapeDtypeStruct((S, T_pad, Bf, Hh), jnp.float32),
        grid_spec=pltpu.PrefetchScalarGridSpec(
            num_scalar_prefetch=0,
            grid=(S, n_chunks),
            in_specs=[
                pl.BlockSpec((None, TQ, Bf, G), lambda s, c: (s, c, 0, 0)),
                pl.BlockSpec((None, Hh, G), lambda s, c: (s, 0, 0)),
                pl.BlockSpec((None, 1, Hh), lambda s, c: (s, 0, 0)),
            ],
            out_specs=pl.BlockSpec((None, TQ, Bf, Hh), lambda s, c: (s, c, 0, 0)),
            scratch_shapes=[pltpu.VMEM((Bf, Hh), jnp.float32)],
        ),
        compiler_params=pltpu.CompilerParams(
            dimension_semantics=("parallel", "arbitrary"),
            vmem_limit_bytes=_VMEM_LIMIT),
    )(gi, whh, bn)
    return out[:, :T]


def gru_layer(x_tbi, lp):
    """x_tbi: (T, Bf, nIn) -> (S, T, Bf, Hh) hidden states (S=2 or fused S=1)."""
    T, Bf, nIn = x_tbi.shape
    S_w, _, G = lp["wih"].shape
    gi = batched_matmul_bias(x_tbi.reshape(T * Bf, nIn),
                             lp["wih"], lp["bih"])          # (S, T*Bf, 3*Hh)
    gi = gi.reshape(S_w, T, Bf, G)                          # free reshape
    return gru_recurrence(gi, lp["whh"], lp["bn"])


# ----------------------------------------------------------------------------
# Parameter construction (PyTorch-style uniform init) and conversion to the
# kernel layout (gate-concat along lanes, biases pre-fused, sets stacked or
# block-diagonally fused).
# ----------------------------------------------------------------------------
def init_gru_params(key, n_in, n_hidden):
    k = 1.0 / jnp.sqrt(jnp.float32(n_hidden))
    ks = jax.random.split(key, 4)
    return dict(
        wih=jax.random.uniform(ks[0], (3 * n_hidden, n_in), jnp.float32, -k, k),
        whh=jax.random.uniform(ks[1], (3 * n_hidden, n_hidden), jnp.float32, -k, k),
        bih=jax.random.uniform(ks[2], (3 * n_hidden,), jnp.float32, -k, k),
        bhh=jax.random.uniform(ks[3], (3 * n_hidden,), jnp.float32, -k, k),
    )


def init_linear_params(key, n_in, n_out):
    k = 1.0 / jnp.sqrt(jnp.float32(n_in))
    ks = jax.random.split(key, 2)
    return dict(
        w=jax.random.uniform(ks[0], (n_out, n_in), jnp.float32, -k, k),
        b=jax.random.uniform(ks[1], (n_out,), jnp.float32, -k, k),
    )


def init_raw_params(key, n_in, n_hidden, n_out):
    ks = jax.random.split(key, 6)
    return dict(
        re_L1=init_gru_params(ks[0], n_in, n_hidden),
        im_L1=init_gru_params(ks[1], n_in, n_hidden),
        re_L2=dict(gru=init_gru_params(ks[2], n_hidden, n_hidden),
                   lin=init_linear_params(ks[3], n_hidden, n_out)),
        im_L2=dict(gru=init_gru_params(ks[4], n_hidden, n_hidden),
                   lin=init_linear_params(ks[5], n_hidden, n_out)),
    )


def _gate_split(p, H):
    w = [p["wih"][g * H:(g + 1) * H].T for g in range(3)]   # (nIn, H) r,z,n
    u = [p["whh"][g * H:(g + 1) * H].T for g in range(3)]   # (H, H)
    bi = [p["bih"][g * H:(g + 1) * H] for g in range(3)]
    bh = [p["bhh"][g * H:(g + 1) * H] for g in range(3)]
    return w, u, bi, bh


def _prep_gru_pair(p_re, p_im, H, fuse_sets):
    w_re, u_re, bi_re, bh_re = _gate_split(p_re, H)
    w_im, u_im, bi_im, bh_im = _gate_split(p_im, H)

    if fuse_sets:
        # Single block-diagonal recurrence over both weight sets (Hh = 2H).
        wih = jnp.concatenate(
            [jnp.concatenate([w_re[g], w_im[g]], axis=1) for g in range(3)],
            axis=1)[None]                                    # (1, nIn, 6H)

        def bdiag(a, b):
            z = jnp.zeros((H, H), jnp.float32)
            return jnp.block([[a, z], [z, b]])

        whh = jnp.concatenate([bdiag(u_re[g], u_im[g]) for g in range(3)],
                              axis=1)[None]                  # (1, 2H, 6H)
        bih = jnp.concatenate(
            [bi_re[0] + bh_re[0], bi_im[0] + bh_im[0],
             bi_re[1] + bh_re[1], bi_im[1] + bh_im[1],
             bi_re[2], bi_im[2]])[None, None, :]             # (1, 1, 6H)
        bn = jnp.concatenate([bh_re[2], bh_im[2]])[None, None, :]   # (1, 1, 2H)
    else:
        # Two weight sets kept on a parallel grid axis (Hh = H).
        wih = jnp.stack([jnp.concatenate(w_re, 1), jnp.concatenate(w_im, 1)])
        whh = jnp.stack([jnp.concatenate(u_re, 1), jnp.concatenate(u_im, 1)])
        bih = jnp.stack([
            jnp.concatenate([bi_re[0] + bh_re[0],
                             bi_re[1] + bh_re[1], bi_re[2]])[None, :],
            jnp.concatenate([bi_im[0] + bh_im[0],
                             bi_im[1] + bh_im[1], bi_im[2]])[None, :]])
        bn = jnp.stack([bh_re[2][None, :], bh_im[2][None, :]])
    return dict(wih=wih, bih=bih, whh=whh, bn=bn)


def _prep_linear_pair(p_re, p_im):
    return dict(
        wemb=jnp.stack([p_re["w"].T, p_im["w"].T]),              # (2, H, nOut)
        bemb=jnp.stack([p_re["b"].reshape(1, -1),
                        p_im["b"].reshape(1, -1)]),              # (2, 1, nOut)
    )


def prepare_params(raw, n_hidden, fuse_sets):
    return dict(
        L1=_prep_gru_pair(raw["re_L1"], raw["im_L1"], n_hidden, fuse_sets),
        L2={**_prep_gru_pair(raw["re_L2"]["gru"], raw["im_L2"]["gru"],
                             n_hidden, fuse_sets),
            **_prep_linear_pair(raw["re_L2"]["lin"], raw["im_L2"]["lin"])},
    )


# ----------------------------------------------------------------------------
# Full ComplexBidirectionalLSTM forward (Pallas)
# ----------------------------------------------------------------------------
def _split_sets(hs):
    """(2,T,Bf,H) -> (re-set, im-set); (1,T,Bf,2H) -> column halves."""
    if hs.shape[0] == 2:
        return hs[0], hs[1]
    H = hs.shape[-1] // 2
    return hs[0, ..., :H], hs[0, ..., H:]


@jax.jit
def complex_bilstm_forward(x, params):
    """x: (b, c, h, T, 2) float32 -> (b, c, h, T, 2)."""
    b, c, h, T, d = x.shape
    nIn = c * h
    b_pad = _round_up(max(b, 4), 4)            # Bf = 2*b_pad multiple of 8
    if b_pad != b:
        x = jnp.pad(x, ((0, b_pad - b), (0, 0), (0, 0), (0, 0), (0, 0)))

    xr = x.reshape(b_pad, nIn, T, d)
    xr = jnp.transpose(xr, (2, 0, 1, 3))       # (T, b_pad, nIn, 2)
    x_re, x_im = xr[..., 0], xr[..., 1]

    # ---- layer 1: fuse real/imag inputs along batch (shared weights) -------
    x_cat = jnp.concatenate([x_re, x_im], axis=1)          # (T, 2*b_pad, nIn)
    hs1 = gru_layer(x_cat, params["L1"])
    A, B_ = _split_sets(hs1)                               # each (T, 2b_pad, H)
    real_l1 = A[:, :b_pad] - B_[:, b_pad:]
    imag_l1 = A[:, b_pad:] + B_[:, :b_pad]

    # ---- layer 2: GRU, then hoisted Linear over the whole sequence ---------
    y_cat = jnp.concatenate([real_l1, imag_l1], axis=1)    # (T, 2b_pad, H)
    hs2 = gru_layer(y_cat, params["L2"])
    A2, B2 = _split_sets(hs2)                              # (T, 2b_pad, H)
    T_, Bf, H = A2.shape
    if hs2.shape[0] == 2:
        h_sets = hs2.reshape(2, T_ * Bf, H)                # free reshape
    else:
        h_sets = jnp.stack([A2, B2], axis=0).reshape(2, T_ * Bf, H)

    emb = batched_matmul_bias(h_sets, params["L2"]["wemb"],
                              params["L2"]["bemb"])        # (2, T*Bf, nOut)
    nOut = emb.shape[-1]
    emb = emb.reshape(2, T_, Bf, nOut)
    C_, D_ = emb[0], emb[1]
    real = C_[:, :b_pad] - D_[:, b_pad:]
    imag = C_[:, b_pad:] + D_[:, :b_pad]

    out = jnp.stack((real, imag), axis=-1)                 # (T, b_pad, nOut, 2)
    out = jnp.transpose(out, (1, 2, 0, 3))                 # (b_pad, nOut, T, 2)
    out = out[:b]
    return out.reshape(b, c, h, T, d)


# ----------------------------------------------------------------------------
# Pure-JAX reference (mirrors the PyTorch module exactly) for self-check
# ----------------------------------------------------------------------------
def _gru_ref(x, p):
    H = p["whh"].shape[1]
    wih, whh, bih, bhh = p["wih"], p["whh"], p["bih"], p["bhh"]

    def step(h, xt):
        gi = xt @ wih.T + bih
        gh = h @ whh.T + bhh
        i_r, i_z, i_n = jnp.split(gi, 3, axis=-1)
        h_r, h_z, h_n = jnp.split(gh, 3, axis=-1)
        r = jax.nn.sigmoid(i_r + h_r)
        z = jax.nn.sigmoid(i_z + h_z)
        n = jnp.tanh(i_n + r * h_n)
        h_new = (1.0 - z) * n + z * h
        return h_new, h_new

    h0 = jnp.zeros((x.shape[1], H), jnp.float32)
    _, ys = lax.scan(step, h0, x)
    return ys


def reference_forward(x, raw):
    b, c, h, T, d = x.shape
    xr = x.reshape(b, c * h, T, d)
    xr = jnp.transpose(xr, (2, 0, 1, 3))

    def L1(inp, p):
        return _gru_ref(inp, p)

    def L2(inp, p):
        rec = _gru_ref(inp, p["gru"])
        return rec @ p["lin"]["w"].T + p["lin"]["b"]

    real_l1 = L1(xr[..., 0], raw["re_L1"]) - L1(xr[..., 1], raw["im_L1"])
    imag_l1 = L1(xr[..., 1], raw["re_L1"]) + L1(xr[..., 0], raw["im_L1"])
    real = L2(real_l1, raw["re_L2"]) - L2(imag_l1, raw["im_L2"])
    imag = L2(imag_l1, raw["re_L2"]) + L2(real_l1, raw["im_L2"])
    out = jnp.stack((real, imag), axis=-1)
    out = jnp.transpose(out, (1, 2, 0, 3))
    return out.reshape(b, c, h, T, d)


# ----------------------------------------------------------------------------
if __name__ == "__main__":
    # Small shapes consistent with the module: nIn = nOut = c * h.
    B, C, Hfreq, T = 2, 4, 16, 8
    nIn = C * Hfreq          # 64
    nHidden = 128            # module default; multiple of 128 -> lane-dense gates
    nOut = C * Hfreq         # must equal c * h for the final reshape

    key = jax.random.PRNGKey(0)
    kx, kp = jax.random.split(key)
    x = jax.random.normal(kx, (B, C, Hfreq, T, 2), dtype=jnp.float32)

    raw = init_raw_params(kp, nIn, nHidden, nOut)
    fuse_sets = _default_fuse_sets()
    params = prepare_params(raw, nHidden, fuse_sets)

    out = jax.block_until_ready(complex_bilstm_forward(x, params))
    assert out.shape == (B, C, Hfreq, T, 2), out.shape
    assert bool(jnp.all(jnp.isfinite(out)))

    # Correctness check vs. a pure-JAX mirror of the PyTorch module.
    # (In-kernel f32 dots use Mosaic's default MXU precision, hence the
    #  slightly loose absolute tolerance.)
    with jax.default_matmul_precision("highest"):
        ref = jax.block_until_ready(reference_forward(x, raw))
    max_err = float(jnp.max(jnp.abs(out - ref)))
    assert max_err < 5e-2, f"max abs err too large: {max_err}"

    print("KERNEL_OK")
</pallas_src>

<mosaic_0001>
module attributes {stable_mosaic.version = 11 : i64} {
  func.func @matmul_bias_kernel(%arg0: i32, %arg1: i32, %arg2: memref<64x64xf32, #tpu.memory_space<vmem>>, %arg3: memref<1x64x384xf32, #tpu.memory_space<vmem>>, %arg4: memref<1x1x384xf32, #tpu.memory_space<vmem>>, %arg5: memref<1x64x384xf32, #tpu.memory_space<vmem>>) attributes {dimension_semantics = [#tpu.dimension_semantics<parallel>, #tpu.dimension_semantics<parallel>], iteration_bounds = array<i64: 2, 1>, scalar_prefetch = 0 : i64, scratch_operands = 0 : i64, tpu.core_type = #tpu.core_type<tc>, window_params = [{transform_indices = @transform_0, window_bounds = array<i64: 64, 64>}, {transform_indices = @transform_1, window_bounds = array<i64: 1, 64, 384>}, {transform_indices = @transform_2, window_bounds = array<i64: 1, 1, 384>}, {transform_indices = @transform_3, window_bounds = array<i64: 1, 64, 384>}]} {
    %c0 = arith.constant 0 : index
    %c0_0 = arith.constant 0 : index
    %0 = vector.load %arg2[%c0, %c0_0] : memref<64x64xf32, #tpu.memory_space<vmem>>, vector<64x64xf32>
    %c0_1 = arith.constant 0 : index
    %c0_2 = arith.constant 0 : index
    %c0_3 = arith.constant 0 : index
    %1 = vector.load %arg3[%c0_1, %c0_2, %c0_3] : memref<1x64x384xf32, #tpu.memory_space<vmem>>, vector<1x64x384xf32>
    %2 = vector.shape_cast %1 : vector<1x64x384xf32> to vector<64x384xf32>
    %cst = arith.constant dense<0.000000e+00> : vector<64x384xf32>
    %3 = tpu.matmul %0, %2, %cst {dimension_numbers = #tpu.dot_dimension_numbers<[1], [0], [0], [1], [0, 0, 1, 1], [], []>} : vector<64x64xf32>, vector<64x384xf32>, vector<64x384xf32> -> vector<64x384xf32>
    %c0_4 = arith.constant 0 : index
    %c0_5 = arith.constant 0 : index
    %c0_6 = arith.constant 0 : index
    %4 = vector.load %arg4[%c0_4, %c0_5, %c0_6] : memref<1x1x384xf32, #tpu.memory_space<vmem>>, vector<1x1x384xf32>
    %5 = vector.shape_cast %4 : vector<1x1x384xf32> to vector<1x384xf32>
    %6 = vector.broadcast %5 : vector<1x384xf32> to vector<64x384xf32>
    %7 = arith.addf %3, %6 : vector<64x384xf32>
    %c0_7 = arith.constant 0 : index
    %c0_8 = arith.constant 0 : index
    %c0_9 = arith.constant 0 : index
    %8 = vector.load %arg5[%c0_7, %c0_8, %c0_9] : memref<1x64x384xf32, #tpu.memory_space<vmem>>, vector<1x64x384xf32>
    %9 = vector.shape_cast %8 : vector<1x64x384xf32> to vector<64x384xf32>
    %10 = vector.shape_cast %7 : vector<64x384xf32> to vector<1x64x384xf32>
    tpu.vector_store %arg5[%c0_7, %c0_8, %c0_9], %10 {strides = array<i32>} : memref<1x64x384xf32, #tpu.memory_space<vmem>>, vector<1x64x384xf32>,
    return
  }
  func.func @transform_0(%arg0: i32, %arg1: i32) -> (i32, i32) {
    %c0_i32 = arith.constant 0 : i32
    %c0_i32_0 = arith.constant 0 : i32
    return %arg1, %c0_i32 : i32, i32
  }
  func.func @transform_1(%arg0: i32, %arg1: i32) -> (i32, i32, i32) {
    %c0_i32 = arith.constant 0 : i32
    %c0_i32_0 = arith.constant 0 : i32
    %c0_i32_1 = arith.constant 0 : i32
    return %arg0, %c0_i32, %c0_i32_0 : i32, i32, i32
  }
  func.func @transform_2(%arg0: i32, %arg1: i32) -> (i32, i32, i32) {
    %c0_i32 = arith.constant 0 : i32
    %c0_i32_0 = arith.constant 0 : i32
    %c0_i32_1 = arith.constant 0 : i32
    return %arg0, %c0_i32, %c0_i32_0 : i32, i32, i32
  }
  func.func @transform_3(%arg0: i32, %arg1: i32) -> (i32, i32, i32) {
    %c0_i32 = arith.constant 0 : i32
    %c0_i32_0 = arith.constant 0 : i32
    return %arg0, %arg1, %c0_i32 : i32, i32, i32
  }
}

module attributes {stable_mosaic.version = 11 : i64} {
  func.func @gru_recurrence_kernel(%arg0: i32, %arg1: i32, %arg2: memref<1x8x8x384xf32, #tpu.memory_space<vmem>>, %arg3: memref<1x128x384xf32, #tpu.memory_space<vmem>>, %arg4: memref<1x1x128xf32, #tpu.memory_space<vmem>>, %arg5: memref<1x8x8x128xf32, #tpu.memory_space<vmem>>, %arg6: memref<8x128xf32, #tpu.memory_space<vmem>>) attributes {dimension_semantics = [#tpu.dimension_semantics<parallel>, #tpu.dimension_semantics<arbitrary>], iteration_bounds = array<i64: 2, 1>, scalar_prefetch = 0 : i64, scratch_operands = 1 : i64, tpu.core_type = #tpu.core_type<tc>, window_params = [{transform_indices = @transform_0, window_bounds = array<i64: 1, 8, 8, 384>}, {transform_indices = @transform_1, window_bounds = array<i64: 1, 128, 384>}, {transform_indices = @transform_2, window_bounds = array<i64: 1, 1, 128>}, {transform_indices = @transform_3, window_bounds = array<i64: 1, 8, 8, 128>}]} {
    %c0_i32 = arith.constant 0 : i32
    %0 = arith.cmpi eq, %arg1, %c0_i32 : i32
    %1 = arith.extui %0 : i1 to i32
    %c0_i32_0 = arith.constant 0 : i32
    %2 = arith.cmpi ne, %1, %c0_i32_0 : i32
    scf.if %2 {
      %cst_90 = arith.constant 0.000000e+00 : f32
      %291 = vector.broadcast %cst_90 : f32 to vector<8x128xf32>
      %c0_91 = arith.constant 0 : index
      %c0_92 = arith.constant 0 : index
      %292 = vector.load %arg6[%c0_91, %c0_92] : memref<8x128xf32, #tpu.memory_space<vmem>>, vector<8x128xf32>
      tpu.vector_store %arg6[%c0_91, %c0_92], %291 {strides = array<i32>} : memref<8x128xf32, #tpu.memory_space<vmem>>, vector<8x128xf32>,
    } else {
    }
    %c0 = arith.constant 0 : index
    %c0_1 = arith.constant 0 : index
    %c0_2 = arith.constant 0 : index
    %3 = vector.load %arg3[%c0, %c0_1, %c0_2] : memref<1x128x384xf32, #tpu.memory_space<vmem>>, vector<1x128x384xf32>
    %4 = vector.shape_cast %3 : vector<1x128x384xf32> to vector<128x384xf32>
    %c0_3 = arith.constant 0 : index
    %c0_4 = arith.constant 0 : index
    %c0_5 = arith.constant 0 : index
    %5 = vector.load %arg4[%c0_3, %c0_4, %c0_5] : memref<1x1x128xf32, #tpu.memory_space<vmem>>, vector<1x1x128xf32>
    %6 = vector.shape_cast %5 : vector<1x1x128xf32> to vector<1x128xf32>
    %7 = vector.shape_cast %6 : vector<1x128xf32> to vector<1x128xf32>
    %8 = vector.broadcast %7 : vector<1x128xf32> to vector<8x128xf32>
    %c0_6 = arith.constant 0 : index
    %c0_7 = arith.constant 0 : index
    %9 = vector.load %arg6[%c0_6, %c0_7] : memref<8x128xf32, #tpu.memory_space<vmem>>, vector<8x128xf32>
    %c0_i32_8 = arith.constant 0 : i32
    %c0_9 = arith.constant 0 : index
    %10 = arith.index_cast %c0_i32_8 : i32 to index
    %c0_10 = arith.constant 0 : index
    %c0_11 = arith.constant 0 : index
    %11 = vector.load %arg2[%c0_9, %10, %c0_10, %c0_11] : memref<1x8x8x384xf32, #tpu.memory_space<vmem>>, vector<1x1x8x384xf32>
    %12 = vector.shape_cast %11 : vector<1x1x8x384xf32> to vector<8x384xf32>
    %cst = arith.constant dense<0.000000e+00> : vector<8x384xf32>
    %13 = tpu.matmul %9, %4, %cst {dimension_numbers = #tpu.dot_dimension_numbers<[1], [0], [0], [1], [0, 0, 1, 1], [], []>} : vector<8x128xf32>, vector<128x384xf32>, vector<8x384xf32> -> vector<8x384xf32>
    %14 = vector.extract_strided_slice %12 {offsets = [0, 0], sizes = [8, 128], strides = [1, 1]} : vector<8x384xf32> to vector<8x128xf32>
    %15 = vector.extract_strided_slice %13 {offsets = [0, 0], sizes = [8, 128], strides = [1, 1]} : vector<8x384xf32> to vector<8x128xf32>
    %16 = arith.addf %14, %15 : vector<8x128xf32>
    %17 = arith.negf %16 : vector<8x128xf32>
    %18 = math.exp %17 : vector<8x128xf32>
    %cst_12 = arith.constant 1.000000e+00 : f32
    %19 = vector.broadcast %cst_12 : f32 to vector<8x128xf32>
    %20 = arith.addf %19, %18 : vector<8x128xf32>
    %21 = arith.divf %19, %20 : vector<8x128xf32>
    %22 = vector.extract_strided_slice %12 {offsets = [0, 128], sizes = [8, 128], strides = [1, 1]} : vector<8x384xf32> to vector<8x128xf32>
    %23 = vector.extract_strided_slice %13 {offsets = [0, 128], sizes = [8, 128], strides = [1, 1]} : vector<8x384xf32> to vector<8x128xf32>
    %24 = arith.addf %22, %23 : vector<8x128xf32>
    %25 = arith.negf %24 : vector<8x128xf32>
    %26 = math.exp %25 : vector<8x128xf32>
    %cst_13 = arith.constant 1.000000e+00 : f32
    %27 = vector.broadcast %cst_13 : f32 to vector<8x128xf32>
    %28 = arith.addf %27, %26 : vector<8x128xf32>
    %29 = arith.divf %27, %28 : vector<8x128xf32>
    %30 = vector.extract_strided_slice %12 {offsets = [0, 256], sizes = [8, 128], strides = [1, 1]} : vector<8x384xf32> to vector<8x128xf32>
    %31 = vector.extract_strided_slice %13 {offsets = [0, 256], sizes = [8, 128], strides = [1, 1]} : vector<8x384xf32> to vector<8x128xf32>
    %32 = arith.addf %31, %8 : vector<8x128xf32>
    %33 = arith.mulf %21, %32 : vector<8x128xf32>
    %34 = arith.addf %30, %33 : vector<8x128xf32>
    %35 = math.tanh %34 : vector<8x128xf32>
    %cst_14 = arith.constant 1.000000e+00 : f32
    %36 = vector.broadcast %cst_14 : f32 to vector<8x128xf32>
    %37 = arith.subf %36, %29 : vector<8x128xf32>
    %38 = arith.mulf %37, %35 : vector<8x128xf32>
    %39 = arith.mulf %29, %9 : vector<8x128xf32>
    %40 = arith.addf %38, %39 : vector<8x128xf32>
    %c0_15 = arith.constant 0 : index
    %41 = arith.index_cast %c0_i32_8 : i32 to index
    %c0_16 = arith.constant 0 : index
    %c0_17 = arith.constant 0 : index
    %42 = vector.load %arg5[%c0_15, %41, %c0_16, %c0_17] : memref<1x8x8x128xf32, #tpu.memory_space<vmem>>, vector<1x1x8x128xf32>
    %43 = vector.shape_cast %42 : vector<1x1x8x128xf32> to vector<8x128xf32>
    %44 = vector.shape_cast %40 : vector<8x128xf32> to vector<1x1x8x128xf32>
    tpu.vector_store %arg5[%c0_15, %41, %c0_16, %c0_17], %44 {strides = array<i32>} : memref<1x8x8x128xf32, #tpu.memory_space<vmem>>, vector<1x1x8x128xf32>,
    %c1_i32 = arith.constant 1 : i32
    %c0_18 = arith.constant 0 : index
    %45 = arith.index_cast %c1_i32 : i32 to index
    %c0_19 = arith.constant 0 : index
    %c0_20 = arith.constant 0 : index
    %46 = vector.load %arg2[%c0_18, %45, %c0_19, %c0_20] : memref<1x8x8x384xf32, #tpu.memory_space<vmem>>, vector<1x1x8x384xf32>
    %47 = vector.shape_cast %46 : vector<1x1x8x384xf32> to vector<8x384xf32>
    %cst_21 = arith.constant dense<0.000000e+00> : vector<8x384xf32>
    %48 = tpu.matmul %40, %4, %cst_21 {dimension_numbers = #tpu.dot_dimension_numbers<[1], [0], [0], [1], [0, 0, 1, 1], [], []>} : vector<8x128xf32>, vector<128x384xf32>, vector<8x384xf32> -> vector<8x384xf32>
    %49 = vector.extract_strided_slice %47 {offsets = [0, 0], sizes = [8, 128], strides = [1, 1]} : vector<8x384xf32> to vector<8x128xf32>
    %50 = vector.extract_strided_slice %48 {offsets = [0, 0], sizes = [8, 128], strides = [1, 1]} : vector<8x384xf32> to vector<8x128xf32>
    %51 = arith.addf %49, %50 : vector<8x128xf32>
    %52 = arith.negf %51 : vector<8x128xf32>
    %53 = math.exp %52 : vector<8x128xf32>
    %cst_22 = arith.constant 1.000000e+00 : f32
    %54 = vector.broadcast %cst_22 : f32 to vector<8x128xf32>
    %55 = arith.addf %54, %53 : vector<8x128xf32>
    %56 = arith.divf %54, %55 : vector<8x128xf32>
    %57 = vector.extract_strided_slice %47 {offsets = [0, 128], sizes = [8, 128], strides = [1, 1]} : vector<8x384xf32> to vector<8x128xf32>
    %58 = vector.extract_strided_slice %48 {offsets = [0, 128], sizes = [8, 128], strides = [1, 1]} : vector<8x384xf32> to vector<8x128xf32>
    %59 = arith.addf %57, %58 : vector<8x128xf32>
    %60 = arith.negf %59 : vector<8x128xf32>
    %61 = math.exp %60 : vector<8x128xf32>
    %cst_23 = arith.constant 1.000000e+00 : f32
    %62 = vector.broadcast %cst_23 : f32 to vector<8x128xf32>
    %63 = arith.addf %62, %61 : vector<8x128xf32>
    %64 = arith.divf %62, %63 : vector<8x128xf32>
    %65 = vector.extract_strided_slice %47 {offsets = [0, 256], sizes = [8, 128], strides = [1, 1]} : vector<8x384xf32> to vector<8x128xf32>
    %66 = vector.extract_strided_slice %48 {offsets = [0, 256], sizes = [8, 128], strides = [1, 1]} : vector<8x384xf32> to vector<8x128xf32>
    %67 = arith.addf %66, %8 : vector<8x128xf32>
    %68 = arith.mulf %56, %67 : vector<8x128xf32>
    %69 = arith.addf %65, %68 : vector<8x128xf32>
    %70 = math.tanh %69 : vector<8x128xf32>
    %cst_24 = arith.constant 1.000000e+00 : f32
    %71 = vector.broadcast %cst_24 : f32 to vector<8x128xf32>
    %72 = arith.subf %71, %64 : vector<8x128xf32>
    %73 = arith.mulf %72, %70 : vector<8x128xf32>
    %74 = arith.mulf %64, %40 : vector<8x128xf32>
    %75 = arith.addf %73, %74 : vector<8x128xf32>
    %c0_25 = arith.constant 0 : index
    %76 = arith.index_cast %c1_i32 : i32 to index
    %c0_26 = arith.constant 0 : index
    %c0_27 = arith.constant 0 : index
    %77 = vector.load %arg5[%c0_25, %76, %c0_26, %c0_27] : memref<1x8x8x128xf32, #tpu.memory_space<vmem>>, vector<1x1x8x128xf32>
    %78 = vector.shape_cast %77 : vector<1x1x8x128xf32> to vector<8x128xf32>
    %79 = vector.shape_cast %75 : vector<8x128xf32> to vector<1x1x8x128xf32>
    tpu.vector_store %arg5[%c0_25, %76, %c0_26, %c0_27], %79 {strides = array<i32>} : memref<1x8x8x128xf32, #tpu.memory_space<vmem>>, vector<1x1x8x128xf32>,
    %c2_i32 = arith.constant 2 : i32
    %c0_28 = arith.constant 0 : index
    %80 = arith.index_cast %c2_i32 : i32 to index
    %c0_29 = arith.constant 0 : index
    %c0_30 = arith.constant 0 : index
    %81 = vector.load %arg2[%c0_28, %80, %c0_29, %c0_30] : memref<1x8x8x384xf32, #tpu.memory_space<vmem>>, vector<1x1x8x384xf32>
    %82 = vector.shape_cast %81 : vector<1x1x8x384xf32> to vector<8x384xf32>
    %cst_31 = arith.constant dense<0.000000e+00> : vector<8x384xf32>
    %83 = tpu.matmul %75, %4, %cst_31 {dimension_numbers = #tpu.dot_dimension_numbers<[1], [0], [0], [1], [0, 0, 1, 1], [], []>} : vector<8x128xf32>, vector<128x384xf32>, vector<8x384xf32> -> vector<8x384xf32>
    %84 = vector.extract_strided_slice %82 {offsets = [0, 0], sizes = [8, 128], strides = [1, 1]} : vector<8x384xf32> to vector<8x128xf32>
    %85 = vector.extract_strided_slice %83 {offsets = [0, 0], sizes = [8, 128], strides = [1, 1]} : vector<8x384xf32> to vector<8x128xf32>
    %86 = arith.addf %84, %85 : vector<8x128xf32>
    %87 = arith.negf %86 : vector<8x128xf32>
    %88 = math.exp %87 : vector<8x128xf32>
    %cst_32 = arith.constant 1.000000e+00 : f32
    %89 = vector.broadcast %cst_32 : f32 to vector<8x128xf32>
    %90 = arith.addf %89, %88 : vector<8x128xf32>
    %91 = arith.divf %89, %90 : vector<8x128xf32>
    %92 = vector.extract_strided_slice %82 {offsets = [0, 128], sizes = [8, 128], strides = [1, 1]} : vector<8x384xf32> to vector<8x128xf32>
    %93 = vector.extract_strided_slice %83 {offsets = [0, 128], sizes = [8, 128], strides = [1, 1]} : vector<8x384xf32> to vector<8x128xf32>
    %94 = arith.addf %92, %93 : vector<8x128xf32>
    %95 = arith.negf %94 : vector<8x128xf32>
    %96 = math.exp %95 : vector<8x128xf32>
    %cst_33 = arith.constant 1.000000e+00 : f32
    %97 = vector.broadcast %cst_33 : f32 to vector<8x128xf32>
    %98 = arith.addf %97, %96 : vector<8x128xf32>
    %99 = arith.divf %97, %98 : vector<8x128xf32>
    %100 = vector.extract_strided_slice %82 {offsets = [0, 256], sizes = [8, 128], strides = [1, 1]} : vector<8x384xf32> to vector<8x128xf32>
    %101 = vector.extract_strided_slice %83 {offsets = [0, 256], sizes = [8, 128], strides = [1, 1]} : vector<8x384xf32> to vector<8x128xf32>
    %102 = arith.addf %101, %8 : vector<8x128xf32>
    %103 = arith.mulf %91, %102 : vector<8x128xf32>
    %104 = arith.addf %100, %103 : vector<8x128xf32>
    %105 = math.tanh %104 : vector<8x128xf32>
    %cst_34 = arith.constant 1.000000e+00 : f32
    %106 = vector.broadcast %cst_34 : f32 to vector<8x128xf32>
    %107 = arith.subf %106, %99 : vector<8x128xf32>
    %108 = arith.mulf %107, %105 : vector<8x128xf32>
    %109 = arith.mulf %99, %75 : vector<8x128xf32>
    %110 = arith.addf %108, %109 : vector<8x128xf32>
    %c0_35 = arith.constant 0 : index
    %111 = arith.index_cast %c2_i32 : i32 to index
    %c0_36 = arith.constant 0 : index
    %c0_37 = arith.constant 0 : index
    %112 = vector.load %arg5[%c0_35, %111, %c0_36, %c0_37] : memref<1x8x8x128xf32, #tpu.memory_space<vmem>>, vector<1x1x8x128xf32>
    %113 = vector.shape_cast %112 : vector<1x1x8x128xf32> to vector<8x128xf32>
    %114 = vector.shape_cast %110 : vector<8x128xf32> to vector<1x1x8x128xf32>
    tpu.vector_store %arg5[%c0_35, %111, %c0_36, %c0_37], %114 {strides = array<i32>} : memref<1x8x8x128xf32, #tpu.memory_space<vmem>>, vector<1x1x8x128xf32>,
    %c3_i32 = arith.constant 3 : i32
    %c0_38 = arith.constant 0 : index
    %115 = arith.index_cast %c3_i32 : i32 to index
    %c0_39 = arith.constant 0 : index
    %c0_40 = arith.constant 0 : index
    %116 = vector.load %arg2[%c0_38, %115, %c0_39, %c0_40] : memref<1x8x8x384xf32, #tpu.memory_space<vmem>>, vector<1x1x8x384xf32>
    %117 = vector.shape_cast %116 : vector<1x1x8x384xf32> to vector<8x384xf32>
    %cst_41 = arith.constant dense<0.000000e+00> : vector<8x384xf32>
    %118 = tpu.matmul %110, %4, %cst_41 {dimension_numbers = #tpu.dot_dimension_numbers<[1], [0], [0], [1], [0, 0, 1, 1], [], []>} : vector<8x128xf32>, vector<128x384xf32>, vector<8x384xf32> -> vector<8x384xf32>
    %119 = vector.extract_strided_slice %117 {offsets = [0, 0], sizes = [8, 128], strides = [1, 1]} : vector<8x384xf32> to vector<8x128xf32>
    %120 = vector.extract_strided_slice %118 {offsets = [0, 0], sizes = [8, 128], strides = [1, 1]} : vector<8x384xf32> to vector<8x128xf32>
    %121 = arith.addf %119, %120 : vector<8x128xf32>
    %122 = arith.negf %121 : vector<8x128xf32>
    %123 = math.exp %122 : vector<8x128xf32>
    %cst_42 = arith.constant 1.000000e+00 : f32
    %124 = vector.broadcast %cst_42 : f32 to vector<8x128xf32>
    %125 = arith.addf %124, %123 : vector<8x128xf32>
    %126 = arith.divf %124, %125 : vector<8x128xf32>
    %127 = vector.extract_strided_slice %117 {offsets = [0, 128], sizes = [8, 128], strides = [1, 1]} : vector<8x384xf32> to vector<8x128xf32>
    %128 = vector.extract_strided_slice %118 {offsets = [0, 128], sizes = [8, 128], strides = [1, 1]} : vector<8x384xf32> to vector<8x128xf32>
    %129 = arith.addf %127, %128 : vector<8x128xf32>
    %130 = arith.negf %129 : vector<8x128xf32>
    %131 = math.exp %130 : vector<8x128xf32>
    %cst_43 = arith.constant 1.000000e+00 : f32
    %132 = vector.broadcast %cst_43 : f32 to vector<8x128xf32>
    %133 = arith.addf %132, %131 : vector<8x128xf32>
    %134 = arith.divf %132, %133 : vector<8x128xf32>
    %135 = vector.extract_strided_slice %117 {offsets = [0, 256], sizes = [8, 128], strides = [1, 1]} : vector<8x384xf32> to vector<8x128xf32>
    %136 = vector.extract_strided_slice %118 {offsets = [0, 256], sizes = [8, 128], strides = [1, 1]} : vector<8x384xf32> to vector<8x128xf32>
    %137 = arith.addf %136, %8 : vector<8x128xf32>
    %138 = arith.mulf %126, %137 : vector<8x128xf32>
    %139 = arith.addf %135, %138 : vector<8x128xf32>
    %140 = math.tanh %139 : vector<8x128xf32>
    %cst_44 = arith.constant 1.000000e+00 : f32
    %141 = vector.broadcast %cst_44 : f32 to vector<8x128xf32>
    %142 = arith.subf %141, %134 : vector<8x128xf32>
    %143 = arith.mulf %142, %140 : vector<8x128xf32>
    %144 = arith.mulf %134, %110 : vector<8x128xf32>
    %145 = arith.addf %143, %144 : vector<8x128xf32>
    %c0_45 = arith.constant 0 : index
    %146 = arith.index_cast %c3_i32 : i32 to index
    %c0_46 = arith.constant 0 : index
    %c0_47 = arith.constant 0 : index
    %147 = vector.load %arg5[%c0_45, %146, %c0_46, %c0_47] : memref<1x8x8x128xf32, #tpu.memory_space<vmem>>, vector<1x1x8x128xf32>
    %148 = vector.shape_cast %147 : vector<1x1x8x128xf32> to vector<8x128xf32>
    %149 = vector.shape_cast %145 : vector<8x128xf32> to vector<1x1x8x128xf32>
    tpu.vector_store %arg5[%c0_45, %146, %c0_46, %c0_47], %149 {strides = array<i32>} : memref<1x8x8x128xf32, #tpu.memory_space<vmem>>, vector<1x1x8x128xf32>,
    %c4_i32 = arith.constant 4 : i32
    %c0_48 = arith.constant 0 : index
    %150 = arith.index_cast %c4_i32 : i32 to index
    %c0_49 = arith.constant 0 : index
    %c0_50 = arith.constant 0 : index
    %151 = vector.load %arg2[%c0_48, %150, %c0_49, %c0_50] : memref<1x8x8x384xf32, #tpu.memory_space<vmem>>, vector<1x1x8x384xf32>
    %152 = vector.shape_cast %151 : vector<1x1x8x384xf32> to vector<8x384xf32>
    %cst_51 = arith.constant dense<0.000000e+00> : vector<8x384xf32>
    %153 = tpu.matmul %145, %4, %cst_51 {dimension_numbers = #tpu.dot_dimension_numbers<[1], [0], [0], [1], [0, 0, 1, 1], [], []>} : vector<8x128xf32>, vector<128x384xf32>, vector<8x384xf32> -> vector<8x384xf32>
    %154 = vector.extract_strided_slice %152 {offsets = [0, 0], sizes = [8, 128], strides = [1, 1]} : vector<8x384xf32> to vector<8x128xf32>
    %155 = vector.extract_strided_slice %153 {offsets = [0, 0], sizes = [8, 128], strides = [1, 1]} : vector<8x384xf32> to vector<8x128xf32>
    %156 = arith.addf %154, %155 : vector<8x128xf32>
    %157 = arith.negf %156 : vector<8x128xf32>
    %158 = math.exp %157 : vector<8x128xf32>
    %cst_52 = arith.constant 1.000000e+00 : f32
    %159 = vector.broadcast %cst_52 : f32 to vector<8x128xf32>
    %160 = arith.addf %159, %158 : vector<8x128xf32>
    %161 = arith.divf %159, %160 : vector<8x128xf32>
    %162 = vector.extract_strided_slice %152 {offsets = [0, 128], sizes = [8, 128], strides = [1, 1]} : vector<8x384xf32> to vector<8x128xf32>
    %163 = vector.extract_strided_slice %153 {offsets = [0, 128], sizes = [8, 128], strides = [1, 1]} : vector<8x384xf32> to vector<8x128xf32>
    %164 = arith.addf %162, %163 : vector<8x128xf32>
    %165 = arith.negf %164 : vector<8x128xf32>
    %166 = math.exp %165 : vector<8x128xf32>
    %cst_53 = arith.constant 1.000000e+00 : f32
    %167 = vector.broadcast %cst_53 : f32 to vector<8x128xf32>
    %168 = arith.addf %167, %166 : vector<8x128xf32>
    %169 = arith.divf %167, %168 : vector<8x128xf32>
    %170 = vector.extract_strided_slice %152 {offsets = [0, 256], sizes = [8, 128], strides = [1, 1]} : vector<8x384xf32> to vector<8x128xf32>
    %171 = vector.extract_strided_slice %153 {offsets = [0, 256], sizes = [8, 128], strides = [1, 1]} : vector<8x384xf32> to vector<8x128xf32>
    %172 = arith.addf %171, %8 : vector<8x128xf32>
    %173 = arith.mulf %161, %172 : vector<8x128xf32>
    %174 = arith.addf %170, %173 : vector<8x128xf32>
    %175 = math.tanh %174 : vector<8x128xf32>
    %cst_54 = arith.constant 1.000000e+00 : f32
    %176 = vector.broadcast %cst_54 : f32 to vector<8x128xf32>
    %177 = arith.subf %176, %169 : vector<8x128xf32>
    %178 = arith.mulf %177, %175 : vector<8x128xf32>
    %179 = arith.mulf %169, %145 : vector<8x128xf32>
    %180 = arith.addf %178, %179 : vector<8x128xf32>
    %c0_55 = arith.constant 0 : index
    %181 = arith.index_cast %c4_i32 : i32 to index
    %c0_56 = arith.constant 0 : index
    %c0_57 = arith.constant 0 : index
    %182 = vector.load %arg5[%c0_55, %181, %c0_56, %c0_57] : memref<1x8x8x128xf32, #tpu.memory_space<vmem>>, vector<1x1x8x128xf32>
    %183 = vector.shape_cast %182 : vector<1x1x8x128xf32> to vector<8x128xf32>
    %184 = vector.shape_cast %180 : vector<8x128xf32> to vector<1x1x8x128xf32>
    tpu.vector_store %arg5[%c0_55, %181, %c0_56, %c0_57], %184 {strides = array<i32>} : memref<1x8x8x128xf32, #tpu.memory_space<vmem>>, vector<1x1x8x128xf32>,
    %c5_i32 = arith.constant 5 : i32
    %c0_58 = arith.constant 0 : index
    %185 = arith.index_cast %c5_i32 : i32 to index
    %c0_59 = arith.constant 0 : index
    %c0_60 = arith.constant 0 : index
    %186 = vector.load %arg2[%c0_58, %185, %c0_59, %c0_60] : memref<1x8x8x384xf32, #tpu.memory_space<vmem>>, vector<1x1x8x384xf32>
    %187 = vector.shape_cast %186 : vector<1x1x8x384xf32> to vector<8x384xf32>
    %cst_61 = arith.constant dense<0.000000e+00> : vector<8x384xf32>
    %188 = tpu.matmul %180, %4, %cst_61 {dimension_numbers = #tpu.dot_dimension_numbers<[1], [0], [0], [1], [0, 0, 1, 1], [], []>} : vector<8x128xf32>, vector<128x384xf32>, vector<8x384xf32> -> vector<8x384xf32>
    %189 = vector.extract_strided_slice %187 {offsets = [0, 0], sizes = [8, 128], strides = [1, 1]} : vector<8x384xf32> to vector<8x128xf32>
    %190 = vector.extract_strided_slice %188 {offsets = [0, 0], sizes = [8, 128], strides = [1, 1]} : vector<8x384xf32> to vector<8x128xf32>
    %191 = arith.addf %189, %190 : vector<8x128xf32>
    %192 = arith.negf %191 : vector<8x128xf32>
    %193 = math.exp %192 : vector<8x128xf32>
    %cst_62 = arith.constant 1.000000e+00 : f32
    %194 = vector.broadcast %cst_62 : f32 to vector<8x128xf32>
    %195 = arith.addf %194, %193 : vector<8x128xf32>
    %196 = arith.divf %194, %195 : vector<8x128xf32>
    %197 = vector.extract_strided_slice %187 {offsets = [0, 128], sizes = [8, 128], strides = [1, 1]} : vector<8x384xf32> to vector<8x128xf32>
    %198 = vector.extract_strided_slice %188 {offsets = [0, 128], sizes = [8, 128], strides = [1, 1]} : vector<8x384xf32> to vector<8x128xf32>
    %199 = arith.addf %197, %198 : vector<8x128xf32>
    %200 = arith.negf %199 : vector<8x128xf32>
    %201 = math.exp %200 : vector<8x128xf32>
    %cst_63 = arith.constant 1.000000e+00 : f32
    %202 = vector.broadcast %cst_63 : f32 to vector<8x128xf32>
    %203 = arith.addf %202, %201 : vector<8x128xf32>
    %204 = arith.divf %202, %203 : vector<8x128xf32>
    %205 = vector.extract_strided_slice %187 {offsets = [0, 256], sizes = [8, 128], strides = [1, 1]} : vector<8x384xf32> to vector<8x128xf32>
    %206 = vector.extract_strided_slice %188 {offsets = [0, 256], sizes = [8, 128], strides = [1, 1]} : vector<8x384xf32> to vector<8x128xf32>
    %207 = arith.addf %206, %8 : vector<8x128xf32>
    %208 = arith.mulf %196, %207 : vector<8x128xf32>
    %209 = arith.addf %205, %208 : vector<8x128xf32>
    %210 = math.tanh %209 : vector<8x128xf32>
    %cst_64 = arith.constant 1.000000e+00 : f32
    %211 = vector.broadcast %cst_64 : f32 to vector<8x128xf32>
    %212 = arith.subf %211, %204 : vector<8x128xf32>
    %213 = arith.mulf %212, %210 : vector<8x128xf32>
    %214 = arith.mulf %204, %180 : vector<8x128xf32>
    %215 = arith.addf %213, %214 : vector<8x128xf32>
    %c0_65 = arith.constant 0 : index
    %216 = arith.index_cast %c5_i32 : i32 to index
    %c0_66 = arith.constant 0 : index
    %c0_67 = arith.constant 0 : index
    %217 = vector.load %arg5[%c0_65, %216, %c0_66, %c0_67] : memref<1x8x8x128xf32, #tpu.memory_space<vmem>>, vector<1x1x8x128xf32>
    %218 = vector.shape_cast %217 : vector<1x1x8x128xf32> to vector<8x128xf32>
    %219 = vector.shape_cast %215 : vector<8x128xf32> to vector<1x1x8x128xf32>
    tpu.vector_store %arg5[%c0_65, %216, %c0_66, %c0_67], %219 {strides = array<i32>} : memref<1x8x8x128xf32, #tpu.memory_space<vmem>>, vector<1x1x8x128xf32>,
    %c6_i32 = arith.constant 6 : i32
    %c0_68 = arith.constant 0 : index
    %220 = arith.index_cast %c6_i32 : i32 to index
    %c0_69 = arith.constant 0 : index
    %c0_70 = arith.constant 0 : index
    %221 = vector.load %arg2[%c0_68, %220, %c0_69, %c0_70] : memref<1x8x8x384xf32, #tpu.memory_space<vmem>>, vector<1x1x8x384xf32>
    %222 = vector.shape_cast %221 : vector<1x1x8x384xf32> to vector<8x384xf32>
    %cst_71 = arith.constant dense<0.000000e+00> : vector<8x384xf32>
    %223 = tpu.matmul %215, %4, %cst_71 {dimension_numbers = #tpu.dot_dimension_numbers<[1], [0], [0], [1], [0, 0, 1, 1], [], []>} : vector<8x128xf32>, vector<128x384xf32>, vector<8x384xf32> -> vector<8x384xf32>
    %224 = vector.extract_strided_slice %222 {offsets = [0, 0], sizes = [8, 128], strides = [1, 1]} : vector<8x384xf32> to vector<8x128xf32>
    %225 = vector.extract_strided_slice %223 {offsets = [0, 0], sizes = [8, 128], strides = [1, 1]} : vector<8x384xf32> to vector<8x128xf32>
    %226 = arith.addf %224, %225 : vector<8x128xf32>
    %227 = arith.negf %226 : vector<8x128xf32>
    %228 = math.exp %227 : vector<8x128xf32>
    %cst_72 = arith.constant 1.000000e+00 : f32
    %229 = vector.broadcast %cst_72 : f32 to vector<8x128xf32>
    %230 = arith.addf %229, %228 : vector<8x128xf32>
    %231 = arith.divf %229, %230 : vector<8x128xf32>
    %232 = vector.extract_strided_slice %222 {offsets = [0, 128], sizes = [8, 128], strides = [1, 1]} : vector<8x384xf32> to vector<8x128xf32>
    %233 = vector.extract_strided_slice %223 {offsets = [0, 128], sizes = [8, 128], strides = [1, 1]} : vector<8x384xf32> to vector<8x128xf32>
    %234 = arith.addf %232, %233 : vector<8x128xf32>
    %235 = arith.negf %234 : vector<8x128xf32>
    %236 = math.exp %235 : vector<8x128xf32>
    %cst_73 = arith.constant 1.000000e+00 : f32
    %237 = vector.broadcast %cst_73 : f32 to vector<8x128xf32>
    %238 = arith.addf %237, %236 : vector<8x128xf32>
    %239 = arith.divf %237, %238 : vector<8x128xf32>
    %240 = vector.extract_strided_slice %222 {offsets = [0, 256], sizes = [8, 128], strides = [1, 1]} : vector<8x384xf32> to vector<8x128xf32>
    %241 = vector.extract_strided_slice %223 {offsets = [0, 256], sizes = [8, 128], strides = [1, 1]} : vector<8x384xf32> to vector<8x128xf32>
    %242 = arith.addf %241, %8 : vector<8x128xf32>
    %243 = arith.mulf %231, %242 : vector<8x128xf32>
    %244 = arith.addf %240, %243 : vector<8x128xf32>
    %245 = math.tanh %244 : vector<8x128xf32>
    %cst_74 = arith.constant 1.000000e+00 : f32
    %246 = vector.broadcast %cst_74 : f32 to vector<8x128xf32>
    %247 = arith.subf %246, %239 : vector<8x128xf32>
    %248 = arith.mulf %247, %245 : vector<8x128xf32>
    %249 = arith.mulf %239, %215 : vector<8x128xf32>
    %250 = arith.addf %248, %249 : vector<8x128xf32>
    %c0_75 = arith.constant 0 : index
    %251 = arith.index_cast %c6_i32 : i32 to index
    %c0_76 = arith.constant 0 : index
    %c0_77 = arith.constant 0 : index
    %252 = vector.load %arg5[%c0_75, %251, %c0_76, %c0_77] : memref<1x8x8x128xf32, #tpu.memory_space<vmem>>, vector<1x1x8x128xf32>
    %253 = vector.shape_cast %252 : vector<1x1x8x128xf32> to vector<8x128xf32>
    %254 = vector.shape_cast %250 : vector<8x128xf32> to vector<1x1x8x128xf32>
    tpu.vector_store %arg5[%c0_75, %251, %c0_76, %c0_77], %254 {strides = array<i32>} : memref<1x8x8x128xf32, #tpu.memory_space<vmem>>, vector<1x1x8x128xf32>,
    %c7_i32 = arith.constant 7 : i32
    %c0_78 = arith.constant 0 : index
    %255 = arith.index_cast %c7_i32 : i32 to index
    %c0_79 = arith.constant 0 : index
    %c0_80 = arith.constant 0 : index
    %256 = vector.load %arg2[%c0_78, %255, %c0_79, %c0_80] : memref<1x8x8x384xf32, #tpu.memory_space<vmem>>, vector<1x1x8x384xf32>
    %257 = vector.shape_cast %256 : vector<1x1x8x384xf32> to vector<8x384xf32>
    %cst_81 = arith.constant dense<0.000000e+00> : vector<8x384xf32>
    %258 = tpu.matmul %250, %4, %cst_81 {dimension_numbers = #tpu.dot_dimension_numbers<[1], [0], [0], [1], [0, 0, 1, 1], [], []>} : vector<8x128xf32>, vector<128x384xf32>, vector<8x384xf32> -> vector<8x384xf32>
    %259 = vector.extract_strided_slice %257 {offsets = [0, 0], sizes = [8, 128], strides = [1, 1]} : vector<8x384xf32> to vector<8x128xf32>
    %260 = vector.extract_strided_slice %258 {offsets = [0, 0], sizes = [8, 128], strides = [1, 1]} : vector<8x384xf32> to vector<8x128xf32>
    %261 = arith.addf %259, %260 : vector<8x128xf32>
    %262 = arith.negf %261 : vector<8x128xf32>
    %263 = math.exp %262 : vector<8x128xf32>
    %cst_82 = arith.constant 1.000000e+00 : f32
    %264 = vector.broadcast %cst_82 : f32 to vector<8x128xf32>
    %265 = arith.addf %264, %263 : vector<8x128xf32>
    %266 = arith.divf %264, %265 : vector<8x128xf32>
    %267 = vector.extract_strided_slice %257 {offsets = [0, 128], sizes = [8, 128], strides = [1, 1]} : vector<8x384xf32> to vector<8x128xf32>
    %268 = vector.extract_strided_slice %258 {offsets = [0, 128], sizes = [8, 128], strides = [1, 1]} : vector<8x384xf32> to vector<8x128xf32>
    %269 = arith.addf %267, %268 : vector<8x128xf32>
    %270 = arith.negf %269 : vector<8x128xf32>
    %271 = math.exp %270 : vector<8x128xf32>
    %cst_83 = arith.constant 1.000000e+00 : f32
    %272 = vector.broadcast %cst_83 : f32 to vector<8x128xf32>
    %273 = arith.addf %272, %271 : vector<8x128xf32>
    %274 = arith.divf %272, %273 : vector<8x128xf32>
    %275 = vector.extract_strided_slice %257 {offsets = [0, 256], sizes = [8, 128], strides = [1, 1]} : vector<8x384xf32> to vector<8x128xf32>
    %276 = vector.extract_strided_slice %258 {offsets = [0, 256], sizes = [8, 128], strides = [1, 1]} : vector<8x384xf32> to vector<8x128xf32>
    %277 = arith.addf %276, %8 : vector<8x128xf32>
    %278 = arith.mulf %266, %277 : vector<8x128xf32>
    %279 = arith.addf %275, %278 : vector<8x128xf32>
    %280 = math.tanh %279 : vector<8x128xf32>
    %cst_84 = arith.constant 1.000000e+00 : f32
    %281 = vector.broadcast %cst_84 : f32 to vector<8x128xf32>
    %282 = arith.subf %281, %274 : vector<8x128xf32>
    %283 = arith.mulf %282, %280 : vector<8x128xf32>
    %284 = arith.mulf %274, %250 : vector<8x128xf32>
    %285 = arith.addf %283, %284 : vector<8x128xf32>
    %c0_85 = arith.constant 0 : index
    %286 = arith.index_cast %c7_i32 : i32 to index
    %c0_86 = arith.constant 0 : index
    %c0_87 = arith.constant 0 : index
    %287 = vector.load %arg5[%c0_85, %286, %c0_86, %c0_87] : memref<1x8x8x128xf32, #tpu.memory_space<vmem>>, vector<1x1x8x128xf32>
    %288 = vector.shape_cast %287 : vector<1x1x8x128xf32> to vector<8x128xf32>
    %289 = vector.shape_cast %285 : vector<8x128xf32> to vector<1x1x8x128xf32>
    tpu.vector_store %arg5[%c0_85, %286, %c0_86, %c0_87], %289 {strides = array<i32>} : memref<1x8x8x128xf32, #tpu.memory_space<vmem>>, vector<1x1x8x128xf32>,
    %c8_i32 = arith.constant 8 : i32
    %c0_88 = arith.constant 0 : index
    %c0_89 = arith.constant 0 : index
    %290 = vector.load %arg6[%c0_88, %c0_89] : memref<8x128xf32, #tpu.memory_space<vmem>>, vector<8x128xf32>
    tpu.vector_store %arg6[%c0_88, %c0_89], %285 {strides = array<i32>} : memref<8x128xf32, #tpu.memory_space<vmem>>, vector<8x128xf32>,
    return
  }
  func.func @transform_0(%arg0: i32, %arg1: i32) -> (i32, i32, i32, i32) {
    %c0_i32 = arith.constant 0 : i32
    %c0_i32_0 = arith.constant 0 : i32
    %c0_i32_1 = arith.constant 0 : i32
    return %arg0, %arg1, %c0_i32, %c0_i32_0 : i32, i32, i32, i32
  }
  func.func @transform_1(%arg0: i32, %arg1: i32) -> (i32, i32, i32) {
    %c0_i32 = arith.constant 0 : i32
    %c0_i32_0 = arith.constant 0 : i32
    %c0_i32_1 = arith.constant 0 : i32
    return %arg0, %c0_i32, %c0_i32_0 : i32, i32, i32
  }
  func.func @transform_2(%arg0: i32, %arg1: i32) -> (i32, i32, i32) {
    %c0_i32 = arith.constant 0 : i32
    %c0_i32_0 = arith.constant 0 : i32
    %c0_i32_1 = arith.constant 0 : i32
    return %arg0, %c0_i32, %c0_i32_0 : i32, i32, i32
  }
  func.func @transform_3(%arg0: i32, %arg1: i32) -> (i32, i32, i32, i32) {
    %c0_i32 = arith.constant 0 : i32
    %c0_i32_0 = arith.constant 0 : i32
    %c0_i32_1 = arith.constant 0 : i32
    return %arg0, %arg1, %c0_i32, %c0_i32_0 : i32, i32, i32, i32
  }
}

module attributes {stable_mosaic.version = 11 : i64} {
  func.func @matmul_bias_kernel(%arg0: i32, %arg1: i32, %arg2: memref<64x128xf32, #tpu.memory_space<vmem>>, %arg3: memref<1x128x384xf32, #tpu.memory_space<vmem>>, %arg4: memref<1x1x384xf32, #tpu.memory_space<vmem>>, %arg5: memref<1x64x384xf32, #tpu.memory_space<vmem>>) attributes {dimension_semantics = [#tpu.dimension_semantics<parallel>, #tpu.dimension_semantics<parallel>], iteration_bounds = array<i64: 2, 1>, scalar_prefetch = 0 : i64, scratch_operands = 0 : i64, tpu.core_type = #tpu.core_type<tc>, window_params = [{transform_indices = @transform_0, window_bounds = array<i64: 64, 128>}, {transform_indices = @transform_1, window_bounds = array<i64: 1, 128, 384>}, {transform_indices = @transform_2, window_bounds = array<i64: 1, 1, 384>}, {transform_indices = @transform_3, window_bounds = array<i64: 1, 64, 384>}]} {
    %c0 = arith.constant 0 : index
    %c0_0 = arith.constant 0 : index
    %0 = vector.load %arg2[%c0, %c0_0] : memref<64x128xf32, #tpu.memory_space<vmem>>, vector<64x128xf32>
    %c0_1 = arith.constant 0 : index
    %c0_2 = arith.constant 0 : index
    %c0_3 = arith.constant 0 : index
    %1 = vector.load %arg3[%c0_1, %c0_2, %c0_3] : memref<1x128x384xf32, #tpu.memory_space<vmem>>, vector<1x128x384xf32>
    %2 = vector.shape_cast %1 : vector<1x128x384xf32> to vector<128x384xf32>
    %cst = arith.constant dense<0.000000e+00> : vector<64x384xf32>
    %3 = tpu.matmul %0, %2, %cst {dimension_numbers = #tpu.dot_dimension_numbers<[1], [0], [0], [1], [0, 0, 1, 1], [], []>} : vector<64x128xf32>, vector<128x384xf32>, vector<64x384xf32> -> vector<64x384xf32>
    %c0_4 = arith.constant 0 : index
    %c0_5 = arith.constant 0 : index
    %c0_6 = arith.constant 0 : index
    %4 = vector.load %arg4[%c0_4, %c0_5, %c0_6] : memref<1x1x384xf32, #tpu.memory_space<vmem>>, vector<1x1x384xf32>
    %5 = vector.shape_cast %4 : vector<1x1x384xf32> to vector<1x384xf32>
    %6 = vector.broadcast %5 : vector<1x384xf32> to vector<64x384xf32>
    %7 = arith.addf %3, %6 : vector<64x384xf32>
    %c0_7 = arith.constant 0 : index
    %c0_8 = arith.constant 0 : index
    %c0_9 = arith.constant 0 : index
    %8 = vector.load %arg5[%c0_7, %c0_8, %c0_9] : memref<1x64x384xf32, #tpu.memory_space<vmem>>, vector<1x64x384xf32>
    %9 = vector.shape_cast %8 : vector<1x64x384xf32> to vector<64x384xf32>
    %10 = vector.shape_cast %7 : vector<64x384xf32> to vector<1x64x384xf32>
    tpu.vector_store %arg5[%c0_7, %c0_8, %c0_9], %10 {strides = array<i32>} : memref<1x64x384xf32, #tpu.memory_space<vmem>>, vector<1x64x384xf32>,
    return
  }
  func.func @transform_0(%arg0: i32, %arg1: i32) -> (i32, i32) {
    %c0_i32 = arith.constant 0 : i32
    %c0_i32_0 = arith.constant 0 : i32
    return %arg1, %c0_i32 : i32, i32
  }
  func.func @transform_1(%arg0: i32, %arg1: i32) -> (i32, i32, i32) {
    %c0_i32 = arith.constant 0 : i32
    %c0_i32_0 = arith.constant 0 : i32
    %c0_i32_1 = arith.constant 0 : i32
    return %arg0, %c0_i32, %c0_i32_0 : i32, i32, i32
  }
  func.func @transform_2(%arg0: i32, %arg1: i32) -> (i32, i32, i32) {
    %c0_i32 = arith.constant 0 : i32
    %c0_i32_0 = arith.constant 0 : i32
    %c0_i32_1 = arith.constant 0 : i32
    return %arg0, %c0_i32, %c0_i32_0 : i32, i32, i32
  }
  func.func @transform_3(%arg0: i32, %arg1: i32) -> (i32, i32, i32) {
    %c0_i32 = arith.constant 0 : i32
    %c0_i32_0 = arith.constant 0 : i32
    return %arg0, %arg1, %c0_i32 : i32, i32, i32
  }
}

module attributes {stable_mosaic.version = 11 : i64} {
  func.func @matmul_bias_kernel(%arg0: i32, %arg1: i32, %arg2: memref<1x64x128xf32, #tpu.memory_space<vmem>>, %arg3: memref<1x128x64xf32, #tpu.memory_space<vmem>>, %arg4: memref<1x1x64xf32, #tpu.memory_space<vmem>>, %arg5: memref<1x64x64xf32, #tpu.memory_space<vmem>>) attributes {dimension_semantics = [#tpu.dimension_semantics<parallel>, #tpu.dimension_semantics<parallel>], iteration_bounds = array<i64: 2, 1>, scalar_prefetch = 0 : i64, scratch_operands = 0 : i64, tpu.core_type = #tpu.core_type<tc>, window_params = [{transform_indices = @transform_0, window_bounds = array<i64: 1, 64, 128>}, {transform_indices = @transform_1, window_bounds = array<i64: 1, 128, 64>}, {transform_indices = @transform_2, window_bounds = array<i64: 1, 1, 64>}, {transform_indices = @transform_3, window_bounds = array<i64: 1, 64, 64>}]} {
    %c0 = arith.constant 0 : index
    %c0_0 = arith.constant 0 : index
    %c0_1 = arith.constant 0 : index
    %0 = vector.load %arg2[%c0, %c0_0, %c0_1] : memref<1x64x128xf32, #tpu.memory_space<vmem>>, vector<1x64x128xf32>
    %1 = vector.shape_cast %0 : vector<1x64x128xf32> to vector<64x128xf32>
    %c0_2 = arith.constant 0 : index
    %c0_3 = arith.constant 0 : index
    %c0_4 = arith.constant 0 : index
    %2 = vector.load %arg3[%c0_2, %c0_3, %c0_4] : memref<1x128x64xf32, #tpu.memory_space<vmem>>, vector<1x128x64xf32>
    %3 = vector.shape_cast %2 : vector<1x128x64xf32> to vector<128x64xf32>
    %cst = arith.constant dense<0.000000e+00> : vector<64x64xf32>
    %4 = tpu.matmul %1, %3, %cst {dimension_numbers = #tpu.dot_dimension_numbers<[1], [0], [0], [1], [0, 0, 1, 1], [], []>} : vector<64x128xf32>, vector<128x64xf32>, vector<64x64xf32> -> vector<64x64xf32>
    %c0_5 = arith.constant 0 : index
    %c0_6 = arith.constant 0 : index
    %c0_7 = arith.constant 0 : index
    %5 = vector.load %arg4[%c0_5, %c0_6, %c0_7] : memref<1x1x64xf32, #tpu.memory_space<vmem>>, vector<1x1x64xf32>
    %6 = vector.shape_cast %5 : vector<1x1x64xf32> to vector<1x64xf32>
    %7 = vector.broadcast %6 : vector<1x64xf32> to vector<64x64xf32>
    %8 = arith.addf %4, %7 : vector<64x64xf32>
    %c0_8 = arith.constant 0 : index
    %c0_9 = arith.constant 0 : index
    %c0_10 = arith.constant 0 : index
    %9 = vector.load %arg5[%c0_8, %c0_9, %c0_10] : memref<1x64x64xf32, #tpu.memory_space<vmem>>, vector<1x64x64xf32>
    %10 = vector.shape_cast %9 : vector<1x64x64xf32> to vector<64x64xf32>
    %11 = vector.shape_cast %8 : vector<64x64xf32> to vector<1x64x64xf32>
    tpu.vector_store %arg5[%c0_8, %c0_9, %c0_10], %11 {strides = array<i32>} : memref<1x64x64xf32, #tpu.memory_space<vmem>>, vector<1x64x64xf32>,
    return
  }
  func.func @transform_0(%arg0: i32, %arg1: i32) -> (i32, i32, i32) {
    %c0_i32 = arith.constant 0 : i32
    %c0_i32_0 = arith.constant 0 : i32
    return %arg0, %arg1, %c0_i32 : i32, i32, i32
  }
  func.func @transform_1(%arg0: i32, %arg1: i32) -> (i32, i32, i32) {
    %c0_i32 = arith.constant 0 : i32
    %c0_i32_0 = arith.constant 0 : i32
    %c0_i32_1 = arith.constant 0 : i32
    return %arg0, %c0_i32, %c0_i32_0 : i32, i32, i32
  }
  func.func @transform_2(%arg0: i32, %arg1: i32) -> (i32, i32, i32) {
    %c0_i32 = arith.constant 0 : i32
    %c0_i32_0 = arith.constant 0 : i32
    %c0_i32_1 = arith.constant 0 : i32
    return %arg0, %c0_i32, %c0_i32_0 : i32, i32, i32
  }
  func.func @transform_3(%arg0: i32, %arg1: i32) -> (i32, i32, i32) {
    %c0_i32 = arith.constant 0 : i32
    %c0_i32_0 = arith.constant 0 : i32
    return %arg0, %arg1, %c0_i32 : i32, i32, i32
  }
}

</mosaic_0001>

<bundles_post_ra>
// kernel: complex_bilstm_forward.9
= control target key start
LH: loop header
LB: loop body
LE: loop exit
PB: predicated region body
PF: predicated region fallthrough
CT: control target
= control target key end

     0   :  { %s682_s12 = smov 0   ;;  %s684_s13 = smov 0   ;;  %s756_s0 = inlined_call_operand.vmem [shape: f32[2,64,128], index: 0, kind: input, shape index: {}]   ;;  %s757_s1 = inlined_call_operand.vmem [shape: f32[2,128,64], index: 1, kind: input, shape index: {}]   ;;  %s758_s2 = inlined_call_operand.vmem [shape: f32[2,1,64], index: 2, kind: input, shape index: {}]   ;;  %s759_s3 = inlined_call_operand.vmem [shape: f32[2,64,64], index: 3, kind: output, shape index: {}]  }
   0x1   :  { %s686_s14 = smov 0  }
   0x2 LB: > { %s25_s15 = sadd.s32 1, %s656_s13  ;;  %p501_p0 = scmp.ge.s32.totalorder %s660_s14, 1  ;;  %s660_s14 = sphi %s686_s14, %s13_s14   ;;  %s656_s13 = sphi %s684_s13, %s761_s13   ;;  %s652_s12 = sphi %s682_s12, %s760_s12  }
   0x3   : > { %p27_p1 = scmp.ge.s32.totalorder %s25_s15, 2  ;;  %p176_p2 = scmp.lt.s32.totalorder %s660_s14, 3 }
   0x5   : > { %s763_s15 = smov (%p27_p1, %s25_s15), 0  ;;  %p177_p3 = pnand %p501_p0, %p176_p2 }
   0x6   : > { %p217_p4 = scmp.lt.s32.totalorder (!%p177_p3), %s652_s12, 1 }
   0x7   : > { %180 = sbr.rel (%p177_p3) target bundleno = 251 (0xfb), region = 32 }
   0xc   : > { %s765_s12 = smov (!%p217_p4, %s652_s12), 1  ;;  %vm380_vm0 = vcmask 523264  }
   0xd   : > { %s512_s16 = sshll.u32 %s765_s12, 7  ;;  %s511_s20 = sshll.u32 %s765_s12, 6 }
   0xe   : > { %s706_s19 = scalar_lea.vmem %s757_s1, %s512_s16  ;;  %s224_s23 = scalar_lea.vmem %s756_s0, %s511_s20 }
   0xf   : > { %v267_v0 = vld [vmem:[%s706_s19 + $0x78] sm:$0xff]  ;;  %v266_v1 = vld [vmem:[%s706_s19 + $0x70] sm:$0xff]  ;;  %v265_v2 = vld [vmem:[%s706_s19 + $0x68] sm:$0xff]  ;;  %s233_s26 = scalar_lea.vmem %s758_s2, %s765_s12  ;;  %s242_s29 = scalar_lea.vmem %s759_s3, %s511_s20 }
  0x10   : > { %538 = vmatprep.subr.mxu0 %v267_v0  ;;  %582 = vmatprep.subr.mxu1 %v267_v0  ;;  %v264_v3 = vld [vmem:[%s706_s19 + $0x60] sm:$0xff]  ;;  %v263_v4 = vld [vmem:[%s706_s19 + $0x58] sm:$0xff]  ;;  %v262_v5 = vld [vmem:[%s706_s19 + $0x50] sm:$0xff] }
  0x11   : > { %539 = vmatpush3.msra.mxu0 %v267_v0  ;;  %598 = vmatpush3.msra.mxu1 %v267_v0  ;;  %v261_v6 = vld [vmem:[%s706_s19 + $0x48] sm:$0xff]  ;;  %v260_v7 = vld [vmem:[%s706_s19 + $0x40] sm:$0xff]  ;;  %v259_v8 = vld [vmem:[%s706_s19 + $0x38] sm:$0xff] }
  0x12   : > { %540 = vmatprep.subr.mxu0 %v266_v1  ;;  %583 = vmatprep.subr.mxu1 %v266_v1  ;;  %v258_v9 = vld [vmem:[%s706_s19 + $0x30] sm:$0xff]  ;;  %v257_v10 = vld [vmem:[%s706_s19 + $0x28] sm:$0xff]  ;;  %v256_v11 = vld [vmem:[%s706_s19 + $0x20] sm:$0xff] }
  0x13   : > { %541 = vmatpush3.msra.mxu0 %v266_v1  ;;  %599 = vmatpush3.msra.mxu1 %v266_v1  ;;  %v255_v12 = vld [vmem:[%s706_s19 + $0x18] sm:$0xff]  ;;  %v254_v13 = vld [vmem:[%s706_s19 + $0x10] sm:$0xff]  ;;  %v253_v14 = vld [vmem:[%s706_s19 + $0x8] sm:$0xff] }
  0x14   : > { %542 = vmatprep.subr.mxu0 %v265_v2  ;;  %584 = vmatprep.subr.mxu1 %v265_v2  ;;  %v252_v15 = vld [vmem:[%s706_s19] sm:$0xff]  ;;  %v245_v18 = vld [vmem:[%s224_s23 + $0x8] sm:$0xff]  ;;  %v246_v20 = vld [vmem:[%s224_s23 + $0x10] sm:$0xff] }
  0x15   : > { %543 = vmatpush3.msra.mxu0 %v265_v2  ;;  %600 = vmatpush3.msra.mxu1 %v265_v2  ;;  %v244_v16 = vld [vmem:[%s224_s23] sm:$0xff]  ;;  %v249_v19 = vld [vmem:[%s224_s23 + $0x28] sm:$0xff]  ;;  %v250_v21 = vld [vmem:[%s224_s23 + $0x30] sm:$0xff] }
  0x16   : > { %544 = vmatprep.subr.mxu0 %v264_v3  ;;  %585 = vmatprep.subr.mxu1 %v264_v3  ;;  %v248_v17 = vld [vmem:[%s224_s23 + $0x20] sm:$0xff]  ;;  %v247_v22 = vld [vmem:[%s224_s23 + $0x18] sm:$0xff] }
  0x17   : > { %545 = vmatpush3.msra.mxu0 %v264_v3  ;;  %601 = vmatpush3.msra.mxu1 %v264_v3  ;;  %v251_v23 = vld [vmem:[%s224_s23 + $0x38] sm:$0xff]  ;;  %v508_v24 = vld [vmem:[%s233_s26] ss:$0 sm:$0xff] }
  0x18   : > { %546 = vmatprep.subr.mxu0 %v263_v4  ;;  %586 = vmatprep.subr.mxu1 %v263_v4 }
  0x19   : > { %547 = vmatpush3.msra.mxu0 %v263_v4  ;;  %602 = vmatpush3.msra.mxu1 %v263_v4 }
  0x1a   : > { %548 = vmatprep.subr.mxu0 %v262_v5  ;;  %587 = vmatprep.subr.mxu1 %v262_v5 }
  0x1b   : > { %549 = vmatpush3.msra.mxu0 %v262_v5  ;;  %603 = vmatpush3.msra.mxu1 %v262_v5 }
  0x1c   : > { %550 = vmatprep.subr.mxu0 %v261_v6  ;;  %588 = vmatprep.subr.mxu1 %v261_v6 }
  0x1d   : > { %551 = vmatpush3.msra.mxu0 %v261_v6  ;;  %604 = vmatpush3.msra.mxu1 %v261_v6 }
  0x1e   : > { %552 = vmatprep.subr.mxu0 %v260_v7  ;;  %589 = vmatprep.subr.mxu1 %v260_v7 }
  0x1f   : > { %553 = vmatpush3.msra.mxu0 %v260_v7  ;;  %605 = vmatpush3.msra.mxu1 %v260_v7 }
  0x20   : > { %554 = vmatprep.subr.mxu0 %v259_v8  ;;  %590 = vmatprep.subr.mxu1 %v259_v8 }
  0x21   : > { %555 = vmatpush3.msra.mxu0 %v259_v8  ;;  %606 = vmatpush3.msra.mxu1 %v259_v8 }
  0x22   : > { %556 = vmatprep.subr.mxu0 %v258_v9  ;;  %591 = vmatprep.subr.mxu1 %v258_v9 }
  0x23   : > { %557 = vmatpush3.msra.mxu0 %v258_v9  ;;  %607 = vmatpush3.msra.mxu1 %v258_v9 }
  0x24   : > { %558 = vmatprep.subr.mxu0 %v257_v10  ;;  %592 = vmatprep.subr.mxu1 %v257_v10 }
  0x25   : > { %559 = vmatpush3.msra.mxu0 %v257_v10  ;;  %608 = vmatpush3.msra.mxu1 %v257_v10 }
  0x26   : > { %560 = vmatprep.subr.mxu0 %v256_v11  ;;  %593 = vmatprep.subr.mxu1 %v256_v11 }
  0x27   : > { %561 = vmatpush3.msra.mxu0 %v256_v11  ;;  %609 = vmatpush3.msra.mxu1 %v256_v11 }
  0x28   : > { %562 = vmatprep.subr.mxu0 %v255_v12  ;;  %594 = vmatprep.subr.mxu1 %v255_v12 }
  0x29   : > { %563 = vmatpush3.msra.mxu0 %v255_v12  ;;  %610 = vmatpush3.msra.mxu1 %v255_v12 }
  0x2a   : > { %564 = vmatprep.subr.mxu0 %v254_v13  ;;  %595 = vmatprep.subr.mxu1 %v254_v13 }
  0x2b   : > { %565 = vmatpush3.msra.mxu0 %v254_v13  ;;  %611 = vmatpush3.msra.mxu1 %v254_v13 }
  0x2c   : > { %566 = vmatprep.subr.mxu0 %v253_v14  ;;  %596 = vmatprep.subr.mxu1 %v253_v14 }
  0x2d   : > { %567 = vmatpush3.msra.mxu0 %v253_v14  ;;  %612 = vmatpush3.msra.mxu1 %v253_v14 }
  0x2e   : > { %568 = vmatprep.subr.mxu0 %v252_v15  ;;  %597 = vmatprep.subr.mxu1 %v252_v15 }
  0x2f   : > { %569 = vmatpush3.msra.mxu0 %v252_v15  ;;  %613 = vmatpush3.msra.mxu1 %v252_v15 }
  0x30   : > { %570 = vmatprep.mubr.f32.mxu0 %v244_v16  ;;  %576 = vmatprep.mubr.f32.mxu1 %v248_v17 }
  0x31   : > { %571 = vmatmul.mubr.f32.vlgmr.msra.gmra.mxu0 %v245_v18  ;;  %577 = vmatmul.mubr.f32.vlgmr.msra.gmra.mxu1 %v249_v19 }
  0x32   : > { %573 = vmatprep.mubr.f32.mxu0 %v246_v20  ;;  %579 = vmatprep.mubr.f32.mxu1 %v250_v21 }
  0x35   : > { %574 = vmatmul.mubr.f32.gmra.mxu0 %v247_v22  ;;  %580 = vmatmul.mubr.f32.gmra.mxu1 %v251_v23 }
  0xf1   : > { %v572_v25 = vpop.f32.mrf.mxu0  ;;  %v578_v26 = vpop.f32.mrf.mxu1 }
  0xf2   : > { %v347_v27 = vadd.f32 %v572_v25, %v508_v24  ;;  %v367_v28 = vadd.f32 %v578_v26, %v508_v24 }
  0xf3   : > { %v341_v29 = vpop.f32.mrf.mxu0  ;;  %v361_v30 = vpop.f32.mrf.mxu1 }
  0xf4   : > { %382 = vst.msk [vmem:[%s242_s29 + $0x8] sm:$0xff] %vm380_vm0, %v347_v27  ;;  %386 = vst.msk [vmem:[%s242_s29 + $0x28] sm:$0xff] %vm380_vm0, %v367_v28  ;;  %v342_v31 = vadd.f32 %v508_v24, %v341_v29  ;;  %v362_v32 = vadd.f32 %v508_v24, %v361_v30 }
  0xf5   : > { %v575_v33 = vpop.f32.mrf.mxu0  ;;  %v581_v34 = vpop.f32.mrf.mxu1 }
  0xf6   : > { %381 = vst.msk [vmem:[%s242_s29] sm:$0xff] %vm380_vm0, %v342_v31  ;;  %385 = vst.msk [vmem:[%s242_s29 + $0x20] sm:$0xff] %vm380_vm0, %v362_v32  ;;  %v357_v35 = vadd.f32 %v575_v33, %v508_v24  ;;  %v377_v36 = vadd.f32 %v581_v34, %v508_v24 }
  0xf7   : > { %v351_v37 = vpop.f32.mrf.mxu0  ;;  %v371_v38 = vpop.f32.mrf.mxu1 }
  0xf8   : > { %384 = vst.msk [vmem:[%s242_s29 + $0x18] sm:$0xff] %vm380_vm0, %v357_v35  ;;  %388 = vst.msk [vmem:[%s242_s29 + $0x38] sm:$0xff] %vm380_vm0, %v377_v36  ;;  %v352_v39 = vadd.f32 %v508_v24, %v351_v37  ;;  %v372_v40 = vadd.f32 %v508_v24, %v371_v38 }
  0xfa   : > { %383 = vst.msk [vmem:[%s242_s29 + $0x10] sm:$0xff] %vm380_vm0, %v352_v39  ;;  %387 = vst.msk [vmem:[%s242_s29 + $0x30] sm:$0xff] %vm380_vm0, %v372_v40 }
  0xfb PF: > { %s13_s14 = sadd.s32 1, %s660_s14   ;;  %s760_s12 = smov %s656_s13 }
  0xfc   : > { %p10_p5 = scmp.ge.s32.totalorder %s13_s14, 4   ;;  %s761_s13 = smov %s763_s15 }
  0xfe   :  { %12 = sbr.rel (!%p10_p5) target bundleno = 2 (0x2), region = 68 }

// kernel: complex_bilstm_forward.5
= control target key start
LH: loop header
LB: loop body
LE: loop exit
PB: predicated region body
PF: predicated region fallthrough
CT: control target
= control target key end

     0   :  { %s807_s12 = smov 0   ;;  %s809_s13 = smov 0   ;;  %s971_s0 = inlined_call_operand.vmem [shape: f32[64,64], index: 0, kind: input, shape index: {}]   ;;  %s972_s1 = inlined_call_operand.vmem [shape: f32[2,64,384], index: 1, kind: input, shape index: {}]   ;;  %s973_s2 = inlined_call_operand.vmem [shape: f32[2,1,384], index: 2, kind: input, shape index: {}]   ;;  %s974_s3 = inlined_call_operand.vmem [shape: f32[2,64,384], index: 3, kind: output, shape index: {}]  }
   0x1   :  { %s811_s14 = smov 0  }
   0x2 LB: > { %s25_s15 = sadd.s32 1, %s780_s13  ;;  %p670_p0 = scmp.ge.s32.totalorder %s784_s14, 1  ;;  %s784_s14 = sphi %s811_s14, %s13_s14   ;;  %s780_s13 = sphi %s809_s13, %s976_s13   ;;  %s776_s12 = sphi %s807_s12, %s975_s12  }
   0x3   : > { %p27_p1 = scmp.ge.s32.totalorder %s25_s15, 2  ;;  %p171_p2 = scmp.lt.s32.totalorder %s784_s14, 3 }
   0x5   : > { %s978_s15 = smov (%p27_p1, %s25_s15), 0  ;;  %p172_p3 = pnand %p670_p0, %p171_p2 }
   0x6   : > { %p215_p4 = scmp.lt.s32.totalorder (!%p172_p3), %s776_s12, 1 }
   0x7   : > { %175 = sbr.rel (%p172_p3) target bundleno = 259 (0x103), region = 32 }
   0xc   : > { %v235_v0 = vld [vmem:[%s971_s0] sm:$0xff]  ;;  %vm284_vm0 = vcmask 523264   ;;  %v786_v1 = vmov 0.0   ;;  %s980_s12 = smov (!%p215_p4, %s776_s12), 1  ;;  %v236_v26 = vld [vmem:[%s971_s0 + $0x8] sm:$0xff]  ;;  %v237_v27 = vld [vmem:[%s971_s0 + $0x10] sm:$0xff]  ;;  %v269_v33 = vlaneseq }
   0xd   : > { %373 = vmatprep.mubr.f32.mxu0 %v786_v1  ;;  %723 = vmatprep.mubr.msk.f32.mxu1 %vm284_vm0, %v235_v0  ;;  %s735_s18 = smul.u32 192, %s980_s12  ;;  %v238_v28 = vld [vmem:[%s971_s0 + $0x18] sm:$0xff]  ;;  %v239_v29 = vld [vmem:[%s971_s0 + $0x20] sm:$0xff]  ;;  %v241_v30 = vld [vmem:[%s971_s0 + $0x30] sm:$0xff] }
   0xe   : > { %v240_v31 = vld [vmem:[%s971_s0 + $0x28] sm:$0xff]  ;;  %v242_v32 = vld [vmem:[%s971_s0 + $0x38] sm:$0xff]  ;;  %s736_s9 = smul.u32 3, %s980_s12  ;;  %v270_v34 = vshrl.u32 %v269_v33, 7 }
   0xf   : > { %s838_s21 = scalar_lea.vmem %s972_s1, %s735_s18  ;;  %s920_s20 = scalar_lea.vmem %s974_s3, %s735_s18 }
  0x10   : > { %v265_v2 = vld [vmem:[%s838_s21 + $0xb0] sm:$0xff]  ;;  %v264_v3 = vld [vmem:[%s838_s21 + $0xa8] sm:$0xff]  ;;  %v262_v4 = vld [vmem:[%s838_s21 + $0x98] sm:$0xff]  ;;  %s223_s16 = scalar_lea.vmem %s973_s2, %s736_s9  ;;  %v271_v35 = vsub.s32 0, %v270_v34  ;;  %v275_v37 = vsub.s32 1, %v270_v34  ;;  %v279_v39 = vsub.s32 2, %v270_v34 }
  0x11   : > { %325 = vmatprep.subr.mxu0 %v265_v2  ;;  %v261_v5 = vld [vmem:[%s838_s21 + $0x90] sm:$0xff]  ;;  %v259_v6 = vld [vmem:[%s838_s21 + $0x80] sm:$0xff]  ;;  %v258_v7 = vld [vmem:[%s838_s21 + $0x78] sm:$0xff] }
  0x12   : > { %326 = vmatpush1.msra.mxu0 %v264_v3  ;;  %v256_v8 = vld [vmem:[%s838_s21 + $0x68] sm:$0xff]  ;;  %v255_v9 = vld [vmem:[%s838_s21 + $0x60] sm:$0xff]  ;;  %v266_v10 = vld [vmem:[%s838_s21 + $0xb8] sm:$0xff] }
  0x13   : > { %327 = vmatprep.subr.mxu0 %v262_v4  ;;  %v263_v11 = vld [vmem:[%s838_s21 + $0xa0] sm:$0xff]  ;;  %v253_v12 = vld [vmem:[%s838_s21 + $0x50] sm:$0xff]  ;;  %707 = vmatprep.subr.mxu1 %v266_v10  ;;  %v252_v13 = vld [vmem:[%s838_s21 + $0x48] sm:$0xff] }
  0x14   : > { %328 = vmatpush1.msra.mxu0 %v261_v5  ;;  %708 = vmatpush3.msra.mxu1 %v266_v10  ;;  %v260_v14 = vld [vmem:[%s838_s21 + $0x88] sm:$0xff]  ;;  %v250_v15 = vld [vmem:[%s838_s21 + $0x38] sm:$0xff]  ;;  %v249_v16 = vld [vmem:[%s838_s21 + $0x30] sm:$0xff] }
  0x15   : > { %329 = vmatprep.subr.mxu0 %v259_v6  ;;  %709 = vmatprep.subr.mxu1 %v263_v11  ;;  %v257_v17 = vld [vmem:[%s838_s21 + $0x70] sm:$0xff]  ;;  %v247_v18 = vld [vmem:[%s838_s21 + $0x20] sm:$0xff]  ;;  %v246_v19 = vld [vmem:[%s838_s21 + $0x18] sm:$0xff] }
  0x16   : > { %330 = vmatpush1.msra.mxu0 %v258_v7  ;;  %710 = vmatpush3.msra.mxu1 %v263_v11  ;;  %v254_v20 = vld [vmem:[%s838_s21 + $0x58] sm:$0xff]  ;;  %v244_v21 = vld [vmem:[%s838_s21 + $0x8] sm:$0xff]  ;;  %v243_v22 = vld [vmem:[%s838_s21] sm:$0xff] }
  0x17   : > { %331 = vmatprep.subr.mxu0 %v256_v8  ;;  %711 = vmatprep.subr.mxu1 %v260_v14  ;;  %v251_v23 = vld [vmem:[%s838_s21 + $0x40] sm:$0xff]  ;;  %v248_v24 = vld [vmem:[%s838_s21 + $0x28] sm:$0xff]  ;;  %v245_v25 = vld [vmem:[%s838_s21 + $0x10] sm:$0xff] }
  0x18   : > { %332 = vmatpush1.msra.mxu0 %v255_v9  ;;  %712 = vmatpush3.msra.mxu1 %v260_v14  ;;  %v267_v36 = vld [vmem:[%s223_s16] sm:$0x7] }
  0x19   : > { %333 = vmatprep.subr.mxu0 %v253_v12  ;;  %713 = vmatprep.subr.mxu1 %v257_v17  ;;  %v911_v38 = vrot.slane %v267_v36, %v271_v35  ;;  %v913_v40 = vrot.slane %v267_v36, %v275_v37  ;;  %v280_v44 = vrot.slane %v267_v36, %v279_v39 }
  0x1a   : > { %334 = vmatpush1.msra.mxu0 %v252_v13  ;;  %714 = vmatpush3.msra.mxu1 %v257_v17 }
  0x1b   : > { %335 = vmatprep.subr.mxu0 %v250_v15  ;;  %715 = vmatprep.subr.mxu1 %v254_v20 }
  0x1c   : > { %336 = vmatpush1.msra.mxu0 %v249_v16  ;;  %716 = vmatpush3.msra.mxu1 %v254_v20 }
  0x1d   : > { %337 = vmatprep.subr.mxu0 %v247_v18  ;;  %717 = vmatprep.subr.mxu1 %v251_v23 }
  0x1e   : > { %338 = vmatpush1.msra.mxu0 %v246_v19  ;;  %718 = vmatpush3.msra.mxu1 %v251_v23 }
  0x1f   : > { %339 = vmatprep.subr.mxu0 %v244_v21  ;;  %719 = vmatprep.subr.mxu1 %v248_v24 }
  0x20   : > { %340 = vmatpush1.msra.mxu0 %v243_v22  ;;  %720 = vmatpush3.msra.mxu1 %v248_v24 }
  0x21   : > { %673 = vmatmul.mubr.msk.f32.vlgmr.msra.gmra.mxu0 %vm284_vm0, %v235_v0  ;;  %721 = vmatprep.subr.mxu1 %v245_v25 }
  0x22   : > { %379 = vmatprep.mubr.f32.mxu0 %v786_v1  ;;  %722 = vmatpush3.msra.mxu1 %v245_v25 }
  0x23   : > { %724 = vmatmul.mubr.msk.f32.vlgmr.msra.gmra.mxu1 %vm284_vm0, %v236_v26 }
  0x24   : > { %726 = vmatprep.mubr.msk.f32.mxu1 %vm284_vm0, %v237_v27 }
  0x25   : > { %674 = vmatmul.mubr.msk.f32.gmra.mxu0 %vm284_vm0, %v236_v26 }
  0x26   : > { %385 = vmatprep.mubr.f32.mxu0 %v786_v1 }
  0x27   : > { %727 = vmatmul.mubr.msk.f32.gmra.mxu1 %vm284_vm0, %v238_v28 }
  0x28   : > { %729 = vmatprep.mubr.msk.f32.mxu1 %vm284_vm0, %v239_v29 }
  0x29   : > { %675 = vmatmul.mubr.msk.f32.gmra.mxu0 %vm284_vm0, %v237_v27 }
  0x2a   : > { %391 = vmatprep.mubr.f32.mxu0 %v786_v1 }
  0x2b   : > { %730 = vmatmul.mubr.msk.f32.gmra.mxu1 %vm284_vm0, %v240_v31 }
  0x2c   : > { %732 = vmatprep.mubr.msk.f32.mxu1 %vm284_vm0, %v241_v30 }
  0x2d   : > { %676 = vmatmul.mubr.msk.f32.gmra.mxu0 %vm284_vm0, %v238_v28 }
  0x2e   : > { %397 = vmatprep.mubr.f32.mxu0 %v786_v1 }
  0x2f   : > { %733 = vmatmul.mubr.msk.f32.gmra.mxu1 %vm284_vm0, %v242_v32 }
  0x31   : > { %677 = vmatmul.mubr.msk.f32.gmra.mxu0 %vm284_vm0, %v239_v29 }
  0x32   : > { %403 = vmatprep.mubr.f32.mxu0 %v786_v1 }
  0x35   : > { %678 = vmatmul.mubr.msk.f32.gmra.mxu0 %vm284_vm0, %v240_v31 }
  0x36   : > { %409 = vmatprep.mubr.f32.mxu0 %v786_v1 }
  0x39   : > { %679 = vmatmul.mubr.msk.f32.gmra.mxu0 %vm284_vm0, %v241_v30 }
  0x3a   : > { %415 = vmatprep.mubr.f32.mxu0 %v786_v1 }
  0x3d   : > { %680 = vmatmul.mubr.msk.f32.gmra.mxu0 %vm284_vm0, %v242_v32 }
  0xe1   : > { %v375_v41 = vpop.f32.mrf.mxu0 }
  0xe2   : > { %v376_v42 = vadd.f32 %v375_v41, %v911_v38 }
  0xe3   : > { %v377_v43 = vpop.f32.mrf.mxu0  ;;  %v725_v48 = vpop.f32.mrf.mxu1 }
  0xe4   : > { %527 = vst [vmem:[%s920_s20] sm:$0xff] %v376_v42  ;;  %v378_v45 = vadd.f32 %v377_v43, %v913_v40  ;;  %v494_v50 = vadd.f32 %v725_v48, %v280_v44 }
  0xe5   : > { %v381_v46 = vpop.f32.mrf.mxu0  ;;  %v488_v52 = vpop.f32.mrf.mxu1 }
  0xe6   : > { %528 = vst [vmem:[%s920_s20 + $0x8] sm:$0xff] %v378_v45  ;;  %v382_v47 = vadd.f32 %v381_v46, %v911_v38  ;;  %532 = vst [vmem:[%s920_s20 + $0x28] sm:$0xff] %v494_v50  ;;  %v489_v54 = vadd.f32 %v488_v52, %v280_v44 }
  0xe7   : > { %v383_v49 = vpop.f32.mrf.mxu0  ;;  %v728_v56 = vpop.f32.mrf.mxu1 }
  0xe8   : > { %530 = vst [vmem:[%s920_s20 + $0x18] sm:$0xff] %v382_v47  ;;  %v384_v51 = vadd.f32 %v383_v49, %v913_v40  ;;  %529 = vst [vmem:[%s920_s20 + $0x10] sm:$0xff] %v489_v54  ;;  %v504_v58 = vadd.f32 %v728_v56, %v280_v44 }
  0xe9   : > { %v387_v53 = vpop.f32.mrf.mxu0  ;;  %v498_v60 = vpop.f32.mrf.mxu1 }
  0xea   : > { %531 = vst [vmem:[%s920_s20 + $0x20] sm:$0xff] %v384_v51  ;;  %v388_v55 = vadd.f32 %v387_v53, %v911_v38  ;;  %538 = vst [vmem:[%s920_s20 + $0x58] sm:$0xff] %v504_v58  ;;  %v499_v62 = vadd.f32 %v498_v60, %v280_v44 }
  0xeb   : > { %v389_v57 = vpop.f32.mrf.mxu0  ;;  %v731_v0 = vpop.f32.mrf.mxu1 }
  0xec   : > { %533 = vst [vmem:[%s920_s20 + $0x30] sm:$0xff] %v388_v55  ;;  %v390_v59 = vadd.f32 %v389_v57, %v913_v40  ;;  %535 = vst [vmem:[%s920_s20 + $0x40] sm:$0xff] %v499_v62  ;;  %v514_v2 = vadd.f32 %v731_v0, %v280_v44 }
  0xed   : > { %v393_v61 = vpop.f32.mrf.mxu0  ;;  %v508_v4 = vpop.f32.mrf.mxu1 }
  0xee   : > { %534 = vst [vmem:[%s920_s20 + $0x38] sm:$0xff] %v390_v59  ;;  %v394_v63 = vadd.f32 %v393_v61, %v911_v38  ;;  %544 = vst [vmem:[%s920_s20 + $0x88] sm:$0xff] %v514_v2  ;;  %v509_v6 = vadd.f32 %v508_v4, %v280_v44 }
  0xef   : > { %v395_v1 = vpop.f32.mrf.mxu0  ;;  %v734_v8 = vpop.f32.mrf.mxu1 }
  0xf0   : > { %536 = vst [vmem:[%s920_s20 + $0x48] sm:$0xff] %v394_v63  ;;  %v396_v3 = vadd.f32 %v395_v1, %v913_v40  ;;  %541 = vst [vmem:[%s920_s20 + $0x70] sm:$0xff] %v509_v6  ;;  %v524_v10 = vadd.f32 %v734_v8, %v280_v44 }
  0xf1   : > { %v399_v5 = vpop.f32.mrf.mxu0  ;;  %v518_v12 = vpop.f32.mrf.mxu1 }
  0xf2   : > { %537 = vst [vmem:[%s920_s20 + $0x50] sm:$0xff] %v396_v3  ;;  %v400_v7 = vadd.f32 %v399_v5, %v911_v38  ;;  %550 = vst [vmem:[%s920_s20 + $0xb8] sm:$0xff] %v524_v10  ;;  %v519_v14 = vadd.f32 %v518_v12, %v280_v44 }
  0xf3   : > { %v401_v9 = vpop.f32.mrf.mxu0 }
  0xf4   : > { %539 = vst [vmem:[%s920_s20 + $0x60] sm:$0xff] %v400_v7  ;;  %v402_v11 = vadd.f32 %v401_v9, %v913_v40  ;;  %547 = vst [vmem:[%s920_s20 + $0xa0] sm:$0xff] %v519_v14 }
  0xf5   : > { %v405_v13 = vpop.f32.mrf.mxu0 }
  0xf6   : > { %540 = vst [vmem:[%s920_s20 + $0x68] sm:$0xff] %v402_v11  ;;  %v406_v15 = vadd.f32 %v405_v13, %v911_v38 }
  0xf7   : > { %v407_v16 = vpop.f32.mrf.mxu0 }
  0xf8   : > { %542 = vst [vmem:[%s920_s20 + $0x78] sm:$0xff] %v406_v15  ;;  %v408_v17 = vadd.f32 %v407_v16, %v913_v40 }
  0xf9   : > { %v411_v18 = vpop.f32.mrf.mxu0 }
  0xfa   : > { %543 = vst [vmem:[%s920_s20 + $0x80] sm:$0xff] %v408_v17  ;;  %v412_v19 = vadd.f32 %v411_v18, %v911_v38 }
  0xfb   : > { %v413_v20 = vpop.f32.mrf.mxu0 }
  0xfc   : > { %545 = vst [vmem:[%s920_s20 + $0x90] sm:$0xff] %v412_v19  ;;  %v414_v21 = vadd.f32 %v413_v20, %v913_v40 }
  0xfd   : > { %v417_v22 = vpop.f32.mrf.mxu0 }
  0xfe   : > { %546 = vst [vmem:[%s920_s20 + $0x98] sm:$0xff] %v414_v21  ;;  %v418_v23 = vadd.f32 %v417_v22, %v911_v38 }
  0xff   : > { %v419_v24 = vpop.f32.mrf.mxu0 }
 0x100   : > { %548 = vst [vmem:[%s920_s20 + $0xa8] sm:$0xff] %v418_v23  ;;  %v420_v25 = vadd.f32 %v419_v24, %v913_v40 }
 0x102   : > { %549 = vst [vmem:[%s920_s20 + $0xb0] sm:$0xff] %v420_v25 }
 0x103 PF: > { %s13_s14 = sadd.s32 1, %s784_s14   ;;  %s975_s12 = smov %s780_s13 }
 0x104   : > { %p10_p5 = scmp.ge.s32.totalorder %s13_s14, 4   ;;  %s976_s13 = smov %s978_s15 }
 0x106   :  { %12 = sbr.rel (!%p10_p5) target bundleno = 2 (0x2), region = 68 }

// kernel: complex_bilstm_forward.7
= control target key start
LH: loop header
LB: loop body
LE: loop exit
PB: predicated region body
PF: predicated region fallthrough
CT: control target
= control target key end

     0   :  { %s815_s12 = smov 0   ;;  %s817_s13 = smov 0   ;;  %s988_s0 = inlined_call_operand.vmem [shape: f32[64,128], index: 0, kind: input, shape index: {}]   ;;  %s989_s1 = inlined_call_operand.vmem [shape: f32[2,128,384], index: 1, kind: input, shape index: {}]   ;;  %s990_s2 = inlined_call_operand.vmem [shape: f32[2,1,384], index: 2, kind: input, shape index: {}]   ;;  %s991_s3 = inlined_call_operand.vmem [shape: f32[2,64,384], index: 3, kind: output, shape index: {}]  }
   0x1   :  { %s819_s14 = smov 0  }
   0x2 LB: > { %s25_s15 = sadd.s32 1, %s788_s13  ;;  %p669_p0 = scmp.ge.s32.totalorder %s792_s14, 1  ;;  %s792_s14 = sphi %s819_s14, %s13_s14   ;;  %s788_s13 = sphi %s817_s13, %s993_s13   ;;  %s784_s12 = sphi %s815_s12, %s992_s12  }
   0x3   : > { %p27_p1 = scmp.ge.s32.totalorder %s25_s15, 2  ;;  %p171_p2 = scmp.lt.s32.totalorder %s792_s14, 3 }
   0x5   : > { %s995_s15 = smov (%p27_p1, %s25_s15), 0  ;;  %p172_p3 = pnand %p669_p0, %p171_p2 }
   0x6   : > { %p215_p4 = scmp.lt.s32.totalorder (!%p172_p3), %s784_s12, 1 }
   0x7   : > { %175 = sbr.rel (%p172_p3) target bundleno = 275 (0x113), region = 32 }
   0xc   : > { %v836_v0 = vld [vmem:[%s988_s0] sm:$0xff]  ;;  %v794_v1 = vmov 0.0   ;;  %s997_s12 = smov (!%p215_p4, %s784_s12), 1  ;;  %v236_v50 = vld [vmem:[%s988_s0 + $0x8] sm:$0xff]  ;;  %v237_v51 = vld [vmem:[%s988_s0 + $0x10] sm:$0xff]  ;;  %v293_v57 = vlaneseq }
   0xd   : > { %372 = vmatprep.mubr.f32.mxu0 %v794_v1  ;;  %730 = vmatprep.mubr.f32.mxu1 %v836_v0  ;;  %s742_s18 = smul.u32 384, %s997_s12  ;;  %v238_v52 = vld [vmem:[%s988_s0 + $0x18] sm:$0xff]  ;;  %v239_v53 = vld [vmem:[%s988_s0 + $0x20] sm:$0xff]  ;;  %v241_v54 = vld [vmem:[%s988_s0 + $0x30] sm:$0xff] }
   0xe   : > { %v240_v55 = vld [vmem:[%s988_s0 + $0x28] sm:$0xff]  ;;  %v242_v56 = vld [vmem:[%s988_s0 + $0x38] sm:$0xff]  ;;  %s743_s9 = smul.u32 3, %s997_s12  ;;  %v294_v58 = vshrl.u32 %v293_v57, 7 }
   0xf   : > { %s846_s21 = scalar_lea.vmem %s989_s1, %s742_s18  ;;  %s744_s17 = smul.u32 192, %s997_s12 }
  0x10   : > { %v289_v2 = vld [vmem:[%s846_s21 + $0x170] sm:$0xff]  ;;  %v288_v3 = vld [vmem:[%s846_s21 + $0x168] sm:$0xff]  ;;  %v286_v4 = vld [vmem:[%s846_s21 + $0x158] sm:$0xff]  ;;  %s223_s16 = scalar_lea.vmem %s990_s2, %s743_s9  ;;  %v295_v59 = vsub.s32 0, %v294_v58  ;;  %v299_v61 = vsub.s32 1, %v294_v58  ;;  %v303_v63 = vsub.s32 2, %v294_v58 }
  0x11   : > { %308 = vmatprep.subr.mxu0 %v289_v2  ;;  %v285_v5 = vld [vmem:[%s846_s21 + $0x150] sm:$0xff]  ;;  %v283_v6 = vld [vmem:[%s846_s21 + $0x140] sm:$0xff]  ;;  %v282_v7 = vld [vmem:[%s846_s21 + $0x138] sm:$0xff]  ;;  %s937_s20 = scalar_lea.vmem %s991_s3, %s744_s17 }
  0x12   : > { %309 = vmatpush1.msra.mxu0 %v288_v3  ;;  %v280_v8 = vld [vmem:[%s846_s21 + $0x128] sm:$0xff]  ;;  %v279_v9 = vld [vmem:[%s846_s21 + $0x120] sm:$0xff]  ;;  %v290_v10 = vld [vmem:[%s846_s21 + $0x178] sm:$0xff] }
  0x13   : > { %310 = vmatprep.subr.mxu0 %v286_v4  ;;  %v277_v11 = vld [vmem:[%s846_s21 + $0x110] sm:$0xff]  ;;  %698 = vmatprep.subr.mxu1 %v290_v10  ;;  %v287_v12 = vld [vmem:[%s846_s21 + $0x160] sm:$0xff]  ;;  %v276_v13 = vld [vmem:[%s846_s21 + $0x108] sm:$0xff] }
  0x14   : > { %311 = vmatpush1.msra.mxu0 %v285_v5  ;;  %699 = vmatpush3.msra.mxu1 %v290_v10  ;;  %v284_v14 = vld [vmem:[%s846_s21 + $0x148] sm:$0xff]  ;;  %v274_v15 = vld [vmem:[%s846_s21 + $0xf8] sm:$0xff]  ;;  %v273_v16 = vld [vmem:[%s846_s21 + $0xf0] sm:$0xff] }
  0x15   : > { %312 = vmatprep.subr.mxu0 %v283_v6  ;;  %700 = vmatprep.subr.mxu1 %v287_v12  ;;  %v281_v17 = vld [vmem:[%s846_s21 + $0x130] sm:$0xff]  ;;  %v271_v18 = vld [vmem:[%s846_s21 + $0xe0] sm:$0xff]  ;;  %v270_v19 = vld [vmem:[%s846_s21 + $0xd8] sm:$0xff] }
  0x16   : > { %313 = vmatpush1.msra.mxu0 %v282_v7  ;;  %701 = vmatpush3.msra.mxu1 %v287_v12  ;;  %v278_v20 = vld [vmem:[%s846_s21 + $0x118] sm:$0xff]  ;;  %v268_v21 = vld [vmem:[%s846_s21 + $0xc8] sm:$0xff]  ;;  %v267_v22 = vld [vmem:[%s846_s21 + $0xc0] sm:$0xff] }
  0x17   : > { %314 = vmatprep.subr.mxu0 %v280_v8  ;;  %702 = vmatprep.subr.mxu1 %v284_v14  ;;  %v275_v23 = vld [vmem:[%s846_s21 + $0x100] sm:$0xff]  ;;  %v265_v24 = vld [vmem:[%s846_s21 + $0xb0] sm:$0xff]  ;;  %v264_v25 = vld [vmem:[%s846_s21 + $0xa8] sm:$0xff] }
  0x18   : > { %315 = vmatpush1.msra.mxu0 %v279_v9  ;;  %703 = vmatpush3.msra.mxu1 %v284_v14  ;;  %v272_v26 = vld [vmem:[%s846_s21 + $0xe8] sm:$0xff]  ;;  %v262_v27 = vld [vmem:[%s846_s21 + $0x98] sm:$0xff]  ;;  %v261_v28 = vld [vmem:[%s846_s21 + $0x90] sm:$0xff] }
  0x19   : > { %316 = vmatprep.subr.mxu0 %v277_v11  ;;  %704 = vmatprep.subr.mxu1 %v281_v17  ;;  %v269_v29 = vld [vmem:[%s846_s21 + $0xd0] sm:$0xff]  ;;  %v259_v30 = vld [vmem:[%s846_s21 + $0x80] sm:$0xff]  ;;  %v258_v31 = vld [vmem:[%s846_s21 + $0x78] sm:$0xff] }
  0x1a   : > { %317 = vmatpush1.msra.mxu0 %v276_v13  ;;  %705 = vmatpush3.msra.mxu1 %v281_v17  ;;  %v266_v32 = vld [vmem:[%s846_s21 + $0xb8] sm:$0xff]  ;;  %v256_v33 = vld [vmem:[%s846_s21 + $0x68] sm:$0xff]  ;;  %v255_v34 = vld [vmem:[%s846_s21 + $0x60] sm:$0xff] }
  0x1b   : > { %318 = vmatprep.subr.mxu0 %v274_v15  ;;  %706 = vmatprep.subr.mxu1 %v278_v20  ;;  %v263_v35 = vld [vmem:[%s846_s21 + $0xa0] sm:$0xff]  ;;  %v253_v36 = vld [vmem:[%s846_s21 + $0x50] sm:$0xff]  ;;  %v252_v37 = vld [vmem:[%s846_s21 + $0x48] sm:$0xff] }
  0x1c   : > { %319 = vmatpush1.msra.mxu0 %v273_v16  ;;  %707 = vmatpush3.msra.mxu1 %v278_v20  ;;  %v260_v38 = vld [vmem:[%s846_s21 + $0x88] sm:$0xff]  ;;  %v250_v39 = vld [vmem:[%s846_s21 + $0x38] sm:$0xff]  ;;  %v249_v40 = vld [vmem:[%s846_s21 + $0x30] sm:$0xff] }
  0x1d   : > { %320 = vmatprep.subr.mxu0 %v271_v18  ;;  %708 = vmatprep.subr.mxu1 %v275_v23  ;;  %v257_v41 = vld [vmem:[%s846_s21 + $0x70] sm:$0xff]  ;;  %v247_v42 = vld [vmem:[%s846_s21 + $0x20] sm:$0xff]  ;;  %v246_v43 = vld [vmem:[%s846_s21 + $0x18] sm:$0xff] }
  0x1e   : > { %321 = vmatpush1.msra.mxu0 %v270_v19  ;;  %709 = vmatpush3.msra.mxu1 %v275_v23  ;;  %v254_v44 = vld [vmem:[%s846_s21 + $0x58] sm:$0xff]  ;;  %v244_v45 = vld [vmem:[%s846_s21 + $0x8] sm:$0xff]  ;;  %v243_v46 = vld [vmem:[%s846_s21] sm:$0xff] }
  0x1f   : > { %322 = vmatprep.subr.mxu0 %v268_v21  ;;  %710 = vmatprep.subr.mxu1 %v272_v26  ;;  %v251_v47 = vld [vmem:[%s846_s21 + $0x40] sm:$0xff]  ;;  %v248_v48 = vld [vmem:[%s846_s21 + $0x28] sm:$0xff]  ;;  %v245_v49 = vld [vmem:[%s846_s21 + $0x10] sm:$0xff] }
  0x20   : > { %323 = vmatpush1.msra.mxu0 %v267_v22  ;;  %711 = vmatpush3.msra.mxu1 %v272_v26  ;;  %v291_v60 = vld [vmem:[%s223_s16] sm:$0x7] }
  0x21   : > { %324 = vmatprep.subr.mxu0 %v265_v24  ;;  %712 = vmatprep.subr.mxu1 %v269_v29  ;;  %v930_v62 = vrot.slane %v291_v60, %v295_v59  ;;  %v304_v4 = vrot.slane %v291_v60, %v303_v63 }
  0x22   : > { %325 = vmatpush1.msra.mxu0 %v264_v25  ;;  %713 = vmatpush3.msra.mxu1 %v269_v29 }
  0x23   : > { %326 = vmatprep.subr.mxu0 %v262_v27  ;;  %714 = vmatprep.subr.mxu1 %v266_v32 }
  0x24   : > { %327 = vmatpush1.msra.mxu0 %v261_v28  ;;  %715 = vmatpush3.msra.mxu1 %v266_v32 }
  0x25   : > { %328 = vmatprep.subr.mxu0 %v259_v30  ;;  %716 = vmatprep.subr.mxu1 %v263_v35 }
  0x26   : > { %329 = vmatpush1.msra.mxu0 %v258_v31  ;;  %717 = vmatpush3.msra.mxu1 %v263_v35 }
  0x27   : > { %330 = vmatprep.subr.mxu0 %v256_v33  ;;  %718 = vmatprep.subr.mxu1 %v260_v38 }
  0x28   : > { %331 = vmatpush1.msra.mxu0 %v255_v34  ;;  %719 = vmatpush3.msra.mxu1 %v260_v38 }
  0x29   : > { %332 = vmatprep.subr.mxu0 %v253_v36  ;;  %720 = vmatprep.subr.mxu1 %v257_v41 }
  0x2a   : > { %333 = vmatpush1.msra.mxu0 %v252_v37  ;;  %721 = vmatpush3.msra.mxu1 %v257_v41 }
  0x2b   : > { %334 = vmatprep.subr.mxu0 %v250_v39  ;;  %722 = vmatprep.subr.mxu1 %v254_v44 }
  0x2c   : > { %335 = vmatpush1.msra.mxu0 %v249_v40  ;;  %723 = vmatpush3.msra.mxu1 %v254_v44 }
  0x2d   : > { %336 = vmatprep.subr.mxu0 %v247_v42  ;;  %724 = vmatprep.subr.mxu1 %v251_v47 }
  0x2e   : > { %337 = vmatpush1.msra.mxu0 %v246_v43  ;;  %725 = vmatpush3.msra.mxu1 %v251_v47 }
  0x2f   : > { %338 = vmatprep.subr.mxu0 %v244_v45  ;;  %726 = vmatprep.subr.mxu1 %v248_v48 }
  0x30   : > { %339 = vmatpush1.msra.mxu0 %v243_v46  ;;  %727 = vmatpush3.msra.mxu1 %v248_v48 }
  0x31   : > { %373 = vmatmul.mubr.f32.vlgmr.msra.gmra.mxu0 %v836_v0  ;;  %728 = vmatprep.subr.mxu1 %v245_v49  ;;  %v932_v0 = vrot.slane %v291_v60, %v299_v61 }
  0x32   : > { %378 = vmatprep.mubr.f32.mxu0 %v794_v1  ;;  %729 = vmatpush3.msra.mxu1 %v245_v49 }
  0x33   : > { %731 = vmatmul.mubr.f32.vlgmr.msra.gmra.mxu1 %v236_v50 }
  0x34   : > { %733 = vmatprep.mubr.f32.mxu1 %v237_v51 }
  0x35   : > { %379 = vmatmul.mubr.f32.gmra.mxu0 %v236_v50 }
  0x36   : > { %384 = vmatprep.mubr.f32.mxu0 %v794_v1 }
  0x37   : > { %734 = vmatmul.mubr.f32.gmra.mxu1 %v238_v52 }
  0x38   : > { %736 = vmatprep.mubr.f32.mxu1 %v239_v53 }
  0x39   : > { %385 = vmatmul.mubr.f32.gmra.mxu0 %v237_v51 }
  0x3a   : > { %390 = vmatprep.mubr.f32.mxu0 %v794_v1 }
  0x3b   : > { %737 = vmatmul.mubr.f32.gmra.mxu1 %v240_v55 }
  0x3c   : > { %739 = vmatprep.mubr.f32.mxu1 %v241_v54 }
  0x3d   : > { %391 = vmatmul.mubr.f32.gmra.mxu0 %v238_v52 }
  0x3e   : > { %396 = vmatprep.mubr.f32.mxu0 %v794_v1 }
  0x3f   : > { %740 = vmatmul.mubr.f32.gmra.mxu1 %v242_v56 }
  0x41   : > { %397 = vmatmul.mubr.f32.gmra.mxu0 %v239_v53 }
  0x42   : > { %402 = vmatprep.mubr.f32.mxu0 %v794_v1 }
  0x45   : > { %403 = vmatmul.mubr.f32.gmra.mxu0 %v240_v55 }
  0x46   : > { %408 = vmatprep.mubr.f32.mxu0 %v794_v1 }
  0x49   : > { %409 = vmatmul.mubr.f32.gmra.mxu0 %v241_v54 }
  0x4a   : > { %414 = vmatprep.mubr.f32.mxu0 %v794_v1 }
  0x4d   : > { %415 = vmatmul.mubr.f32.gmra.mxu0 %v242_v56 }
  0xf1   : > { %v374_v1 = vpop.f32.mrf.mxu0 }
  0xf2   : > { %v375_v2 = vadd.f32 %v374_v1, %v930_v62 }
  0xf3   : > { %v376_v3 = vpop.f32.mrf.mxu0  ;;  %v732_v8 = vpop.f32.mrf.mxu1 }
  0xf4   : > { %526 = vst [vmem:[%s937_s20] sm:$0xff] %v375_v2  ;;  %v377_v5 = vadd.f32 %v376_v3, %v932_v0  ;;  %v493_v10 = vadd.f32 %v732_v8, %v304_v4 }
  0xf5   : > { %v380_v6 = vpop.f32.mrf.mxu0  ;;  %v487_v12 = vpop.f32.mrf.mxu1 }
  0xf6   : > { %527 = vst [vmem:[%s937_s20 + $0x8] sm:$0xff] %v377_v5  ;;  %v381_v7 = vadd.f32 %v380_v6, %v930_v62  ;;  %531 = vst [vmem:[%s937_s20 + $0x28] sm:$0xff] %v493_v10  ;;  %v488_v14 = vadd.f32 %v487_v12, %v304_v4 }
  0xf7   : > { %v382_v9 = vpop.f32.mrf.mxu0  ;;  %v735_v16 = vpop.f32.mrf.mxu1 }
  0xf8   : > { %529 = vst [vmem:[%s937_s20 + $0x18] sm:$0xff] %v381_v7  ;;  %v383_v11 = vadd.f32 %v382_v9, %v932_v0  ;;  %528 = vst [vmem:[%s937_s20 + $0x10] sm:$0xff] %v488_v14  ;;  %v503_v18 = vadd.f32 %v735_v16, %v304_v4 }
  0xf9   : > { %v386_v13 = vpop.f32.mrf.mxu0  ;;  %v497_v20 = vpop.f32.mrf.mxu1 }
  0xfa   : > { %530 = vst [vmem:[%s937_s20 + $0x20] sm:$0xff] %v383_v11  ;;  %v387_v15 = vadd.f32 %v386_v13, %v930_v62  ;;  %537 = vst [vmem:[%s937_s20 + $0x58] sm:$0xff] %v503_v18  ;;  %v498_v22 = vadd.f32 %v497_v20, %v304_v4 }
  0xfb   : > { %v388_v17 = vpop.f32.mrf.mxu0  ;;  %v738_v24 = vpop.f32.mrf.mxu1 }
  0xfc   : > { %532 = vst [vmem:[%s937_s20 + $0x30] sm:$0xff] %v387_v15  ;;  %v389_v19 = vadd.f32 %v388_v17, %v932_v0  ;;  %534 = vst [vmem:[%s937_s20 + $0x40] sm:$0xff] %v498_v22  ;;  %v513_v26 = vadd.f32 %v738_v24, %v304_v4 }
  0xfd   : > { %v392_v21 = vpop.f32.mrf.mxu0  ;;  %v507_v28 = vpop.f32.mrf.mxu1 }
  0xfe   : > { %533 = vst [vmem:[%s937_s20 + $0x38] sm:$0xff] %v389_v19  ;;  %v393_v23 = vadd.f32 %v392_v21, %v930_v62  ;;  %543 = vst [vmem:[%s937_s20 + $0x88] sm:$0xff] %v513_v26  ;;  %v508_v30 = vadd.f32 %v507_v28, %v304_v4 }
  0xff   : > { %v394_v25 = vpop.f32.mrf.mxu0  ;;  %v741_v32 = vpop.f32.mrf.mxu1 }
 0x100   : > { %535 = vst [vmem:[%s937_s20 + $0x48] sm:$0xff] %v393_v23  ;;  %v395_v27 = vadd.f32 %v394_v25, %v932_v0  ;;  %540 = vst [vmem:[%s937_s20 + $0x70] sm:$0xff] %v508_v30  ;;  %v523_v34 = vadd.f32 %v741_v32, %v304_v4 }
 0x101   : > { %v398_v29 = vpop.f32.mrf.mxu0  ;;  %v517_v36 = vpop.f32.mrf.mxu1 }
 0x102   : > { %536 = vst [vmem:[%s937_s20 + $0x50] sm:$0xff] %v395_v27  ;;  %v399_v31 = vadd.f32 %v398_v29, %v930_v62  ;;  %549 = vst [vmem:[%s937_s20 + $0xb8] sm:$0xff] %v523_v34  ;;  %v518_v38 = vadd.f32 %v517_v36, %v304_v4 }
 0x103   : > { %v400_v33 = vpop.f32.mrf.mxu0 }
 0x104   : > { %538 = vst [vmem:[%s937_s20 + $0x60] sm:$0xff] %v399_v31  ;;  %v401_v35 = vadd.f32 %v400_v33, %v932_v0  ;;  %546 = vst [vmem:[%s937_s20 + $0xa0] sm:$0xff] %v518_v38 }
 0x105   : > { %v404_v37 = vpop.f32.mrf.mxu0 }
 0x106   : > { %539 = vst [vmem:[%s937_s20 + $0x68] sm:$0xff] %v401_v35  ;;  %v405_v39 = vadd.f32 %v404_v37, %v930_v62 }
 0x107   : > { %v406_v40 = vpop.f32.mrf.mxu0 }
 0x108   : > { %541 = vst [vmem:[%s937_s20 + $0x78] sm:$0xff] %v405_v39  ;;  %v407_v41 = vadd.f32 %v406_v40, %v932_v0 }
 0x109   : > { %v410_v42 = vpop.f32.mrf.mxu0 }
 0x10a   : > { %542 = vst [vmem:[%s937_s20 + $0x80] sm:$0xff] %v407_v41  ;;  %v411_v43 = vadd.f32 %v410_v42, %v930_v62 }
 0x10b   : > { %v412_v44 = vpop.f32.mrf.mxu0 }
 0x10c   : > { %544 = vst [vmem:[%s937_s20 + $0x90] sm:$0xff] %v411_v43  ;;  %v413_v45 = vadd.f32 %v412_v44, %v932_v0 }
 0x10d   : > { %v416_v46 = vpop.f32.mrf.mxu0 }
 0x10e   : > { %545 = vst [vmem:[%s937_s20 + $0x98] sm:$0xff] %v413_v45  ;;  %v417_v47 = vadd.f32 %v416_v46, %v930_v62 }
 0x10f   : > { %v418_v48 = vpop.f32.mrf.mxu0 }
 0x110   : > { %547 = vst [vmem:[%s937_s20 + $0xa8] sm:$0xff] %v417_v47  ;;  %v419_v49 = vadd.f32 %v418_v48, %v932_v0 }
 0x112   : > { %548 = vst [vmem:[%s937_s20 + $0xb0] sm:$0xff] %v419_v49 }
 0x113 PF: > { %s13_s14 = sadd.s32 1, %s792_s14   ;;  %s992_s12 = smov %s788_s13 }
 0x114   : > { %p10_p5 = scmp.ge.s32.totalorder %s13_s14, 4   ;;  %s993_s13 = smov %s995_s15 }
 0x116   :  { %12 = sbr.rel (!%p10_p5) target bundleno = 2 (0x2), region = 68 }

// kernel: complex_bilstm_forward.6
= control target key start
LH: loop header
LB: loop body
LE: loop exit
PB: predicated region body
PF: predicated region fallthrough
CT: control target
= control target key end

     0   :  { %s2446_s12 = smov 0   ;;  %s2448_s13 = smov 0   ;;  %s3403_s0 = inlined_call_operand.vmem [shape: f32[2,8,8,384], index: 0, kind: input, shape index: {}]   ;;  %s3404_s1 = inlined_call_operand.vmem [shape: f32[2,128,384], index: 1, kind: input, shape index: {}]   ;;  %s3405_s2 = inlined_call_operand.vmem [shape: f32[2,1,128], index: 2, kind: input, shape index: {}]   ;;  %s3406_s3 = inlined_call_operand.vmem [shape: f32[2,8,8,128], index: 3, kind: output, shape index: {}]  }
   0x1   :  { %s2450_s14 = smov 0  }
   0x2 LB: > { %s25_s15 = sadd.s32 1, %s2418_s13  ;;  %p1774_p0 = scmp.ge.s32.totalorder %s2422_s14, 1  ;;  %s2422_s14 = sphi %s2450_s14, %s13_s14   ;;  %s2418_s13 = sphi %s2448_s13, %s3439_s13   ;;  %s2414_s12 = sphi %s2446_s12, %s3438_s12  }
   0x3   : > { %p27_p1 = scmp.ge.s32.totalorder %s25_s15, 2  ;;  %p177_p2 = scmp.lt.s32.totalorder %s2422_s14, 3 }
   0x5   : > { %s3441_s15 = smov (%p27_p1, %s25_s15), 0  ;;  %p178_p3 = pnand %p1774_p0, %p177_p2 }
   0x7   : > { %181 = sbr.rel (%p178_p3) target bundleno = 2044 (0x7fc), region = 32 }
   0xc   : > { %p219_p4 = scmp.lt.s32.totalorder %s2414_s12, 1  ;;  %v3409_v0 = vmov 0.0   ;;  %vm2425_vm0 = vmmov 0  }
   0xd   : > { %1963 = vmatprep.subr.mxu1 %v3409_v0  ;;  %375 = vmatprep.mubr.f32.mxu0 %v3409_v0 }
   0xe   : > { %s3443_s12 = smov (!%p219_p4, %s2414_s12), 1  ;;  %1995 = vmatprep.mubr.msk.f32.mxu1 %vm2425_vm0, %v3409_v0 }
   0xf   : > { %s2244_s16 = smul.u32 384, %s3443_s12  ;;  %s2766_s26 = scalar_lea.vmem %s3405_s2, %s3443_s12 }
  0x10   : > { %s2243_s20 = smul.u32 192, %s3443_s12  ;;  %v2769_v62 = vld [vmem:[%s2766_s26] ss:$0 sm:$0xff]  ;;  %s1826_s27 = sshll.u32 %s3443_s12, 6 }
  0x11   : > { %s2474_s19 = scalar_lea.vmem %s3404_s1, %s2244_s16  ;;  %s2777_s30 = scalar_lea.vmem %s3406_s3, %s1826_s27 }
  0x12   : > { %v2477_v1 = vld [vmem:[%s2474_s19 + $0x170] sm:$0xff]  ;;  %v2480_v2 = vld [vmem:[%s2474_s19 + $0x168] sm:$0xff]  ;;  %v2483_v3 = vld [vmem:[%s2474_s19 + $0x158] sm:$0xff]  ;;  %s2758_s23 = scalar_lea.vmem %s3403_s0, %s2243_s20 }
  0x13   : > { %3420 = vst [vmem:[#allocation3_spill] sm:$0xff] %v2477_v1  ;;  %311 = vmatprep.subr.mxu0 %v2477_v1  ;;  %v2487_v4 = vld [vmem:[%s2474_s19 + $0x150] sm:$0xff]  ;;  %v2491_v5 = vld [vmem:[%s2474_s19 + $0x140] sm:$0xff]  ;;  %v2495_v6 = vld [vmem:[%s2474_s19 + $0x138] sm:$0xff] }
  0x14   : > { %312 = vmatpush1.msra.mxu0 %v2480_v2  ;;  %v2499_v7 = vld [vmem:[%s2474_s19 + $0x128] sm:$0xff]  ;;  %v2503_v8 = vld [vmem:[%s2474_s19 + $0x120] sm:$0xff]  ;;  %v2507_v9 = vld [vmem:[%s2474_s19 + $0x110] sm:$0xff] }
  0x15   : > { %313 = vmatprep.subr.mxu0 %v2483_v3  ;;  %v2511_v10 = vld [vmem:[%s2474_s19 + $0x108] sm:$0xff]  ;;  %v2515_v11 = vld [vmem:[%s2474_s19 + $0xf8] sm:$0xff]  ;;  %v2519_v12 = vld [vmem:[%s2474_s19 + $0xf0] sm:$0xff] }
  0x16   : > { %314 = vmatpush1.msra.mxu0 %v2487_v4  ;;  %v2523_v13 = vld [vmem:[%s2474_s19 + $0xe0] sm:$0xff]  ;;  %v2526_v14 = vld [vmem:[%s2474_s19 + $0x178] sm:$0xff]  ;;  %v2538_v17 = vld [vmem:[%s2474_s19 + $0xc8] sm:$0xff] }
  0x17   : > { %315 = vmatprep.subr.mxu0 %v2491_v5  ;;  %v2530_v15 = vld [vmem:[%s2474_s19 + $0xd8] sm:$0xff]  ;;  %1964 = vmatpush3.msra.mxu1 %v2526_v14  ;;  %v2534_v16 = vld [vmem:[%s2474_s19 + $0x160] sm:$0xff]  ;;  %v2542_v18 = vld [vmem:[%s2474_s19 + $0x148] sm:$0xff] }
  0x18   : > { %316 = vmatpush1.msra.mxu0 %v2495_v6  ;;  %1965 = vmatprep.subr.mxu1 %v3409_v0  ;;  %v2546_v19 = vld [vmem:[%s2474_s19 + $0xc0] sm:$0xff]  ;;  %v2551_v20 = vld [vmem:[%s2474_s19 + $0xb0] sm:$0xff]  ;;  %v2559_v22 = vld [vmem:[%s2474_s19 + $0xa8] sm:$0xff] }
  0x19   : > { %317 = vmatprep.subr.mxu0 %v2499_v7  ;;  %1966 = vmatpush3.msra.mxu1 %v2534_v16  ;;  %v2555_v21 = vld [vmem:[%s2474_s19 + $0x130] sm:$0xff]  ;;  %v2564_v23 = vld [vmem:[%s2474_s19 + $0x98] sm:$0xff]  ;;  %v2577_v26 = vld [vmem:[%s2474_s19 + $0x80] sm:$0xff] }
  0x1a   : > { %318 = vmatpush1.msra.mxu0 %v2503_v8  ;;  %1967 = vmatprep.subr.mxu1 %v3409_v0  ;;  %v2568_v24 = vld [vmem:[%s2474_s19 + $0x118] sm:$0xff]  ;;  %v2572_v25 = vld [vmem:[%s2474_s19 + $0x90] sm:$0xff]  ;;  %v2581_v27 = vld [vmem:[%s2474_s19 + $0x100] sm:$0xff] }
  0x1b   : > { %319 = vmatprep.subr.mxu0 %v2507_v9  ;;  %1968 = vmatpush3.msra.mxu1 %v2542_v18  ;;  %v2585_v28 = vld [vmem:[%s2474_s19 + $0x78] sm:$0xff]  ;;  %v2590_v29 = vld [vmem:[%s2474_s19 + $0x68] sm:$0xff]  ;;  %v2598_v31 = vld [vmem:[%s2474_s19 + $0x60] sm:$0xff] }
  0x1c   : > { %320 = vmatpush1.msra.mxu0 %v2511_v10  ;;  %1969 = vmatprep.subr.mxu1 %v3409_v0  ;;  %v2594_v30 = vld [vmem:[%s2474_s19 + $0xe8] sm:$0xff]  ;;  %v2603_v32 = vld [vmem:[%s2474_s19 + $0x50] sm:$0xff]  ;;  %v2616_v35 = vld [vmem:[%s2474_s19 + $0x38] sm:$0xff] }
  0x1d   : > { %321 = vmatprep.subr.mxu0 %v2515_v11  ;;  %1970 = vmatpush3.msra.mxu1 %v2555_v21  ;;  %v2607_v33 = vld [vmem:[%s2474_s19 + $0xd0] sm:$0xff]  ;;  %v2611_v34 = vld [vmem:[%s2474_s19 + $0x48] sm:$0xff]  ;;  %v2620_v36 = vld [vmem:[%s2474_s19 + $0xb8] sm:$0xff] }
  0x1e   : > { %322 = vmatpush1.msra.mxu0 %v2519_v12  ;;  %1971 = vmatprep.subr.mxu1 %v3409_v0  ;;  %v2624_v37 = vld [vmem:[%s2474_s19 + $0x30] sm:$0xff]  ;;  %v2629_v38 = vld [vmem:[%s2474_s19 + $0x20] sm:$0xff]  ;;  %v2637_v40 = vld [vmem:[%s2474_s19 + $0x18] sm:$0xff] }
  0x1f   : > { %323 = vmatprep.subr.mxu0 %v2523_v13  ;;  %1972 = vmatpush3.msra.mxu1 %v2568_v24  ;;  %v2633_v39 = vld [vmem:[%s2474_s19 + $0xa0] sm:$0xff]  ;;  %v2642_v41 = vld [vmem:[%s2474_s19 + $0x8] sm:$0xff]  ;;  %v2656_v44 = vld [vmem:[%s2474_s19 + $0x70] sm:$0xff] }
  0x20   : > { %324 = vmatpush1.msra.mxu0 %v2530_v15  ;;  %1973 = vmatprep.subr.mxu1 %v3409_v0  ;;  %3421 = vst [vmem:[#allocation4_spill] sm:$0xff] %v2642_v41  ;;  %v2646_v42 = vld [vmem:[%s2474_s19 + $0x88] sm:$0xff]  ;;  %v2650_v43 = vld [vmem:[%s2474_s19] sm:$0xff]  ;;  %v2663_v45 = vld [vmem:[%s2474_s19 + $0x58] sm:$0xff] }
  0x21   : > { %325 = vmatprep.subr.mxu0 %v2538_v17  ;;  %1974 = vmatpush3.msra.mxu1 %v2581_v27  ;;  %3422 = vst [vmem:[#allocation5_spill] sm:$0xff] %v2650_v43  ;;  %v2669_v46 = vld [vmem:[%s2474_s19 + $0x40] sm:$0xff]  ;;  %v2676_v47 = vld [vmem:[%s2474_s19 + $0x28] sm:$0xff]  ;;  %v2683_v48 = vld [vmem:[%s2474_s19 + $0x10] sm:$0xff] }
  0x22   : > { %326 = vmatpush1.msra.mxu0 %v2546_v19  ;;  %1975 = vmatprep.subr.mxu1 %v3409_v0  ;;  %3423 = vst [vmem:[#allocation6_spill] sm:$0xff] %v2683_v48  ;;  %v308_v49 = vld [vmem:[%s2758_s23] sm:$0xff]  ;;  %v309_v53 = vld [vmem:[%s2758_s23 + $0x8] sm:$0xff] }
  0x23   : > { %327 = vmatprep.subr.mxu0 %v2551_v20  ;;  %1976 = vmatpush3.msra.mxu1 %v2594_v30 }
  0x24   : > { %328 = vmatpush1.msra.mxu0 %v2559_v22  ;;  %1977 = vmatprep.subr.mxu1 %v3409_v0 }
  0x25   : > { %329 = vmatprep.subr.mxu0 %v2564_v23  ;;  %1978 = vmatpush3.msra.mxu1 %v2607_v33 }
  0x26   : > { %330 = vmatpush1.msra.mxu0 %v2572_v25  ;;  %1979 = vmatprep.subr.mxu1 %v3409_v0 }
  0x27   : > { %331 = vmatprep.subr.mxu0 %v2577_v26  ;;  %1980 = vmatpush3.msra.mxu1 %v2620_v36 }
  0x28   : > { %332 = vmatpush1.msra.mxu0 %v2585_v28  ;;  %1981 = vmatprep.subr.mxu1 %v3409_v0 }
  0x29   : > { %333 = vmatprep.subr.mxu0 %v2590_v29  ;;  %1982 = vmatpush3.msra.mxu1 %v2633_v39 }
  0x2a   : > { %334 = vmatpush1.msra.mxu0 %v2598_v31  ;;  %1983 = vmatprep.subr.mxu1 %v3409_v0 }
  0x2b   : > { %335 = vmatprep.subr.mxu0 %v2603_v32  ;;  %1984 = vmatpush3.msra.mxu1 %v2646_v42 }
  0x2c   : > { %336 = vmatpush1.msra.mxu0 %v2611_v34  ;;  %1985 = vmatprep.subr.mxu1 %v3409_v0 }
  0x2d   : > { %337 = vmatprep.subr.mxu0 %v2616_v35  ;;  %1986 = vmatpush3.msra.mxu1 %v2656_v44 }
  0x2e   : > { %338 = vmatpush1.msra.mxu0 %v2624_v37  ;;  %1987 = vmatprep.subr.mxu1 %v3409_v0 }
  0x2f   : > { %339 = vmatprep.subr.mxu0 %v2629_v38  ;;  %1988 = vmatpush3.msra.mxu1 %v2663_v45 }
  0x30   : > { %340 = vmatpush1.msra.mxu0 %v2637_v40  ;;  %1989 = vmatprep.subr.mxu1 %v3409_v0 }
  0x31   : > { %341 = vmatprep.subr.mxu0 %v2642_v41  ;;  %1990 = vmatpush3.msra.mxu1 %v2669_v46 }
  0x32   : > { %342 = vmatpush1.msra.mxu0 %v2650_v43  ;;  %1991 = vmatprep.subr.mxu1 %v3409_v0 }
  0x33   : > { %376 = vmatmul.mubr.f32.vlgmr.msra.gmra.mxu0 %v3409_v0  ;;  %479 = vmatprep.subr.mxu0 %v2477_v1 }
  0x34   : > { %480 = vmatpush1.msra.mxu0 %v2480_v2  ;;  %1992 = vmatpush3.msra.mxu1 %v2676_v47 }
  0x35   : > { %481 = vmatprep.subr.mxu0 %v2483_v3  ;;  %1993 = vmatprep.subr.mxu1 %v3409_v0 }
  0x36   : > { %482 = vmatpush1.msra.mxu0 %v2487_v4  ;;  %1994 = vmatpush3.msra.mxu1 %v2683_v48 }
  0x37   : > { %483 = vmatprep.subr.mxu0 %v2491_v5  ;;  %1996 = vmatmul.mubr.f32.vlgmr.msra.gmra.mxu1 %v3409_v0 }
  0x38   : > { %484 = vmatpush1.msra.mxu0 %v2495_v6  ;;  %1998 = vmatprep.subr.mxu1 %v3409_v0 }
  0x39   : > { %485 = vmatprep.subr.mxu0 %v2499_v7  ;;  %1999 = vmatpush3.msra.mxu1 %v2526_v14 }
  0x3a   : > { %486 = vmatpush1.msra.mxu0 %v2503_v8  ;;  %2000 = vmatprep.subr.mxu1 %v3409_v0 }
  0x3b   : > { %487 = vmatprep.subr.mxu0 %v2507_v9  ;;  %2001 = vmatpush3.msra.mxu1 %v2534_v16 }
  0x3c   : > { %488 = vmatpush1.msra.mxu0 %v2511_v10  ;;  %2002 = vmatprep.subr.mxu1 %v3409_v0 }
  0x3d   : > { %489 = vmatprep.subr.mxu0 %v2515_v11  ;;  %2003 = vmatpush3.msra.mxu1 %v2542_v18 }
  0x3e   : > { %490 = vmatpush1.msra.mxu0 %v2519_v12  ;;  %2004 = vmatprep.subr.mxu1 %v3409_v0 }
  0x3f   : > { %491 = vmatprep.subr.mxu0 %v2523_v13  ;;  %2005 = vmatpush3.msra.mxu1 %v2555_v21 }
  0x40   : > { %492 = vmatpush1.msra.mxu0 %v2530_v15  ;;  %2006 = vmatprep.subr.mxu1 %v3409_v0 }
  0x41   : > { %493 = vmatprep.subr.mxu0 %v2538_v17  ;;  %2007 = vmatpush3.msra.mxu1 %v2568_v24 }
  0x42   : > { %494 = vmatpush1.msra.mxu0 %v2546_v19  ;;  %2008 = vmatprep.subr.mxu1 %v3409_v0 }
  0x43   : > { %495 = vmatprep.subr.mxu0 %v2551_v20  ;;  %2009 = vmatpush3.msra.mxu1 %v2581_v27 }
  0x44   : > { %496 = vmatpush1.msra.mxu0 %v2559_v22  ;;  %2010 = vmatprep.subr.mxu1 %v3409_v0 }
  0x45   : > { %497 = vmatprep.subr.mxu0 %v2564_v23  ;;  %2011 = vmatpush3.msra.mxu1 %v2594_v30 }
  0x46   : > { %498 = vmatpush1.msra.mxu0 %v2572_v25  ;;  %2012 = vmatprep.subr.mxu1 %v3409_v0 }
  0x47   : > { %499 = vmatprep.subr.mxu0 %v2577_v26  ;;  %2013 = vmatpush3.msra.mxu1 %v2607_v33 }
  0x48   : > { %500 = vmatpush1.msra.mxu0 %v2585_v28  ;;  %2014 = vmatprep.subr.mxu1 %v3409_v0 }
  0x49   : > { %501 = vmatprep.subr.mxu0 %v2590_v29  ;;  %2015 = vmatpush3.msra.mxu1 %v2620_v36 }
  0x4a   : > { %502 = vmatpush1.msra.mxu0 %v2598_v31  ;;  %2016 = vmatprep.subr.mxu1 %v3409_v0 }
  0x4b   : > { %503 = vmatprep.subr.mxu0 %v2603_v32  ;;  %2017 = vmatpush3.msra.mxu1 %v2633_v39 }
  0x4c   : > { %504 = vmatpush1.msra.mxu0 %v2611_v34  ;;  %2018 = vmatprep.subr.mxu1 %v3409_v0 }
  0x4d   : > { %505 = vmatprep.subr.mxu0 %v2616_v35  ;;  %2019 = vmatpush3.msra.mxu1 %v2646_v42 }
  0x4e   : > { %506 = vmatpush1.msra.mxu0 %v2624_v37  ;;  %2020 = vmatprep.subr.mxu1 %v3409_v0 }
  0x4f   : > { %507 = vmatprep.subr.mxu0 %v2629_v38  ;;  %2021 = vmatpush3.msra.mxu1 %v2656_v44 }
  0x50   : > { %508 = vmatpush1.msra.mxu0 %v2637_v40  ;;  %2022 = vmatprep.subr.mxu1 %v3409_v0 }
  0x51   : > { %509 = vmatprep.subr.mxu0 %v2642_v41  ;;  %2023 = vmatpush3.msra.mxu1 %v2663_v45 }
  0x52   : > { %510 = vmatpush1.msra.mxu0 %v2650_v43  ;;  %543 = vmatprep.mubr.f32.mxu0 %v3409_v0 }
  0x53   : > { %2024 = vmatprep.subr.mxu1 %v3409_v0  ;;  %2030 = vmatprep.mubr.msk.f32.mxu1 %vm2425_vm0, %v3409_v0 }
  0x54   : > { %2025 = vmatpush3.msra.mxu1 %v2669_v46  ;;  %648 = vmatprep.subr.mxu0 %v2477_v1 }
  0x55   : > { %2026 = vmatprep.subr.mxu1 %v3409_v0 }
  0x56   : > { %2027 = vmatpush3.msra.mxu1 %v2676_v47 }
  0x57   : > { %2028 = vmatprep.subr.mxu1 %v3409_v0 }
  0x58   : > { %2029 = vmatpush3.msra.mxu1 %v2683_v48 }
  0x59   : > { %2033 = vmatprep.subr.mxu1 %v3409_v0 }
  0xf3   : > { %v377_v50 = vpop.f32.mrf.mxu0 }
  0xf4   : > { %v452_v51 = vadd.f32 %v377_v50, %v308_v49 }
  0xf5   : > { %v379_v54 = vpop.f32.mrf.mxu0 }
  0xf6   : > { %v1780_v52 = vmul.f32 -1.442695, %v452_v51  ;;  %v459_v55 = vadd.f32 %v379_v54, %v309_v53  ;;  %v310_v51 = vld [vmem:[%s2758_s23 + $0x10] sm:$0xff] }
  0xf7   : > { %v448_v56 = vpop.f32.mrf.mxu1 }
  0xf8   : > { %2271 = vpow2.f32 %v1780_v52  ;;  %v1781_v57 = vmul.f32 -1.442695, %v459_v55  ;;  %v466_v49 = vadd.f32 %v2769_v62, %v448_v56  ;;  %v1782_v56 = vld [vmem:[%s2758_s23 + $0x18] sm:$0xff] }
  0xf9   : > { %v1997_v58 = vpop.f32.mrf.mxu1 }
  0xfa   : > { %2273 = vpow2.f32 %v1781_v57 }
 0x105   : > { %v2272_v59 = vpop.eup %2271 }
 0x106   : > { %v456_v60 = vadd.f32 1.0, %v2272_v59 }
 0x107   : > { %v2274_v61 = vpop.eup %2273 }
 0x108   : > { %2275 = vrcp.f32 %v456_v60  ;;  %v463_v63 = vadd.f32 1.0, %v2274_v61 }
 0x10a   : > { %2277 = vrcp.f32 %v463_v63 }
 0x115   : > { %v2276_v50 = vpop.eup %2275 }
 0x116   : > { %v467_v52 = vmul.f32 %v2276_v50, %v466_v49 }
 0x117   : > { %v2278_v54 = vpop.eup %2277 }
 0x118   : > { %v468_v53 = vadd.f32 %v467_v52, %v310_v51  ;;  %v470_v55 = vsub.f32 1.0, %v2278_v54  ;;  %v472_v59 = vmul.f32 0.0, %v2278_v54  ;;  %v1783_v52 = vld [vmem:[%s2758_s23 + $0x20] sm:$0xff] }
 0x11a   : > { %2279 = vtanh.f32 %v468_v53 }
 0x127   : > { %v2280_v57 = vpop.eup %2279 }
 0x128   : > { %v471_v58 = vmul.f32 %v2280_v57, %v470_v55 }
 0x12a   : > { %v2779_v60 = vadd.f32 %v472_v59, %v471_v58 }
 0x12c   : > { %474 = vst [vmem:[%s2777_s30] sm:$0xff] %v2779_v60  ;;  %544 = vmatmul.mubr.f32.vlgmr.msra.gmra.mxu0 %v2779_v60  ;;  %2031 = vmatmul.mubr.f32.vlgmr.msra.gmra.mxu1 %v2779_v60 }
 0x12d   : > { %649 = vmatpush1.msra.mxu0 %v2480_v2  ;;  %2034 = vmatpush3.msra.mxu1 %v2526_v14 }
 0x12e   : > { %650 = vmatprep.subr.mxu0 %v2483_v3  ;;  %2035 = vmatprep.subr.mxu1 %v3409_v0 }
 0x12f   : > { %651 = vmatpush1.msra.mxu0 %v2487_v4  ;;  %2036 = vmatpush3.msra.mxu1 %v2534_v16 }
 0x130   : > { %652 = vmatprep.subr.mxu0 %v2491_v5  ;;  %2037 = vmatprep.subr.mxu1 %v3409_v0 }
 0x131   : > { %653 = vmatpush1.msra.mxu0 %v2495_v6  ;;  %2038 = vmatpush3.msra.mxu1 %v2542_v18 }
 0x132   : > { %654 = vmatprep.subr.mxu0 %v2499_v7  ;;  %2039 = vmatprep.subr.mxu1 %v3409_v0 }
 0x133   : > { %655 = vmatpush1.msra.mxu0 %v2503_v8  ;;  %2040 = vmatpush3.msra.mxu1 %v2555_v21 }
 0x134   : > { %656 = vmatprep.subr.mxu0 %v2507_v9  ;;  %2041 = vmatprep.subr.mxu1 %v3409_v0 }
 0x135   : > { %657 = vmatpush1.msra.mxu0 %v2511_v10  ;;  %2042 = vmatpush3.msra.mxu1 %v2568_v24 }
 0x136   : > { %658 = vmatprep.subr.mxu0 %v2515_v11  ;;  %2043 = vmatprep.subr.mxu1 %v3409_v0 }
 0x137   : > { %659 = vmatpush1.msra.mxu0 %v2519_v12  ;;  %2044 = vmatpush3.msra.mxu1 %v2581_v27 }
 0x138   : > { %660 = vmatprep.subr.mxu0 %v2523_v13  ;;  %2045 = vmatprep.subr.mxu1 %v3409_v0 }
 0x139   : > { %661 = vmatpush1.msra.mxu0 %v2530_v15  ;;  %2046 = vmatpush3.msra.mxu1 %v2594_v30 }
 0x13a   : > { %662 = vmatprep.subr.mxu0 %v2538_v17  ;;  %2047 = vmatprep.subr.mxu1 %v3409_v0 }
 0x13b   : > { %663 = vmatpush1.msra.mxu0 %v2546_v19  ;;  %2048 = vmatpush3.msra.mxu1 %v2607_v33 }
 0x13c   : > { %664 = vmatprep.subr.mxu0 %v2551_v20  ;;  %2049 = vmatprep.subr.mxu1 %v3409_v0 }
 0x13d   : > { %665 = vmatpush1.msra.mxu0 %v2559_v22  ;;  %2050 = vmatpush3.msra.mxu1 %v2620_v36 }
 0x13e   : > { %666 = vmatprep.subr.mxu0 %v2564_v23  ;;  %2051 = vmatprep.subr.mxu1 %v3409_v0 }
 0x13f   : > { %667 = vmatpush1.msra.mxu0 %v2572_v25  ;;  %2052 = vmatpush3.msra.mxu1 %v2633_v39 }
 0x140   : > { %668 = vmatprep.subr.mxu0 %v2577_v26  ;;  %2053 = vmatprep.subr.mxu1 %v3409_v0 }
 0x141   : > { %669 = vmatpush1.msra.mxu0 %v2585_v28  ;;  %2054 = vmatpush3.msra.mxu1 %v2646_v42 }
 0x142   : > { %670 = vmatprep.subr.mxu0 %v2590_v29  ;;  %2055 = vmatprep.subr.mxu1 %v3409_v0 }
 0x143   : > { %671 = vmatpush1.msra.mxu0 %v2598_v31  ;;  %2056 = vmatpush3.msra.mxu1 %v2656_v44 }
 0x144   : > { %672 = vmatprep.subr.mxu0 %v2603_v32  ;;  %2057 = vmatprep.subr.mxu1 %v3409_v0 }
 0x145   : > { %673 = vmatpush1.msra.mxu0 %v2611_v34  ;;  %2058 = vmatpush3.msra.mxu1 %v2663_v45 }
 0x146   : > { %674 = vmatprep.subr.mxu0 %v2616_v35  ;;  %2059 = vmatprep.subr.mxu1 %v3409_v0 }
 0x147   : > { %675 = vmatpush1.msra.mxu0 %v2624_v37  ;;  %2060 = vmatpush3.msra.mxu1 %v2669_v46 }
 0x148   : > { %676 = vmatprep.subr.mxu0 %v2629_v38  ;;  %2061 = vmatprep.subr.mxu1 %v3409_v0 }
 0x149   : > { %677 = vmatpush1.msra.mxu0 %v2637_v40  ;;  %2062 = vmatpush3.msra.mxu1 %v2676_v47 }
 0x14a   : > { %678 = vmatprep.subr.mxu0 %v2642_v41  ;;  %2063 = vmatprep.subr.mxu1 %v3409_v0 }
 0x14b   : > { %679 = vmatpush1.msra.mxu0 %v2650_v43  ;;  %712 = vmatprep.mubr.f32.mxu0 %v3409_v0  ;;  %v1784_v43 = vld [vmem:[%s2758_s23 + $0x28] sm:$0xff] }
 0x14c   : > { %2064 = vmatpush3.msra.mxu1 %v2683_v48  ;;  %2065 = vmatprep.mubr.msk.f32.mxu1 %vm2425_vm0, %v3409_v0 }
 0x14d   : > { %817 = vmatprep.subr.mxu0 %v2477_v1  ;;  %2068 = vmatprep.subr.mxu1 %v3409_v0 }
 0x1ec   : > { %v545_v61 = vpop.f32.mrf.mxu0  ;;  %v616_v63 = vpop.f32.mrf.mxu1 }
 0x1ed   : > { %v620_v49 = vadd.f32 %v1782_v56, %v545_v61  ;;  %v634_v0 = vadd.f32 %v2769_v62, %v616_v63 }
 0x1ee   : > { %v2032_v50 = vpop.f32.mrf.mxu1  ;;  %v547_v53 = vpop.f32.mrf.mxu0 }
 0x1ef   : > { %v1785_v51 = vmul.f32 -1.442695, %v620_v49  ;;  %v627_v54 = vadd.f32 %v1783_v52, %v547_v53 }
 0x1f1   : > { %2281 = vpow2.f32 %v1785_v51  ;;  %v1786_v55 = vmul.f32 -1.442695, %v627_v54 }
 0x1f3   : > { %2283 = vpow2.f32 %v1786_v55 }
 0x1fe   : > { %v2282_v57 = vpop.eup %2281 }
 0x1ff   : > { %v624_v58 = vadd.f32 1.0, %v2282_v57 }
 0x200   : > { %v2284_v59 = vpop.eup %2283 }
 0x201   : > { %2285 = vrcp.f32 %v624_v58  ;;  %v631_v1 = vadd.f32 1.0, %v2284_v59 }
 0x203   : > { %2287 = vrcp.f32 %v631_v1  ;;  %v3425_v1 = vld [vmem:[#allocation5_spill] sm:$0xff] }
 0x20e   : > { %v2286_v48 = vpop.eup %2285 }
 0x20f   : > { %v635_v56 = vmul.f32 %v2286_v48, %v634_v0  ;;  %v3424_v0 = vmov 0.0   ;;  %v3427_v48 = vld [vmem:[#allocation3_spill] sm:$0xff] }
 0x210   : > { %v2288_v49 = vpop.eup %2287 }
 0x211   : > { %v636_v61 = vadd.f32 %v1784_v43, %v635_v56  ;;  %v638_v50 = vsub.f32 1.0, %v2288_v49  ;;  %v640_v53 = vmul.f32 %v2288_v49, %v2779_v60  ;;  %v3426_v43 = vld [vmem:[#allocation6_spill] sm:$0xff]  ;;  %v1788_v60 = vld [vmem:[%s2758_s23 + $0x30] sm:$0xff] }
 0x212   : > { %v1789_v56 = vld [vmem:[%s2758_s23 + $0x38] sm:$0xff] }
 0x213   : > { %2289 = vtanh.f32 %v636_v61 }
 0x220   : > { %v2290_v51 = vpop.eup %2289 }
 0x221   : > { %v639_v52 = vmul.f32 %v2290_v51, %v638_v50 }
 0x223   : > { %v2857_v54 = vadd.f32 %v640_v53, %v639_v52 }
 0x225   : > { %1787 = vst [vmem:[%s2777_s30 + $0x8] sm:$0xff] %v2857_v54  ;;  %713 = vmatmul.mubr.f32.vlgmr.msra.gmra.mxu0 %v2857_v54  ;;  %2066 = vmatmul.mubr.f32.vlgmr.msra.gmra.mxu1 %v2857_v54 }
 0x226   : > { %818 = vmatpush1.msra.mxu0 %v2480_v2  ;;  %2069 = vmatpush3.msra.mxu1 %v2526_v14 }
 0x227   : > { %819 = vmatprep.subr.mxu0 %v2483_v3  ;;  %2070 = vmatprep.subr.mxu1 %v3424_v0 }
 0x228   : > { %820 = vmatpush1.msra.mxu0 %v2487_v4  ;;  %2071 = vmatpush3.msra.mxu1 %v2534_v16 }
 0x229   : > { %821 = vmatprep.subr.mxu0 %v2491_v5  ;;  %2072 = vmatprep.subr.mxu1 %v3424_v0 }
 0x22a   : > { %822 = vmatpush1.msra.mxu0 %v2495_v6  ;;  %2073 = vmatpush3.msra.mxu1 %v2542_v18 }
 0x22b   : > { %823 = vmatprep.subr.mxu0 %v2499_v7  ;;  %2074 = vmatprep.subr.mxu1 %v3424_v0 }
 0x22c   : > { %824 = vmatpush1.msra.mxu0 %v2503_v8  ;;  %2075 = vmatpush3.msra.mxu1 %v2555_v21 }
 0x22d   : > { %825 = vmatprep.subr.mxu0 %v2507_v9  ;;  %2076 = vmatprep.subr.mxu1 %v3424_v0 }
 0x22e   : > { %826 = vmatpush1.msra.mxu0 %v2511_v10  ;;  %2077 = vmatpush3.msra.mxu1 %v2568_v24 }
 0x22f   : > { %827 = vmatprep.subr.mxu0 %v2515_v11  ;;  %2078 = vmatprep.subr.mxu1 %v3424_v0 }
 0x230   : > { %828 = vmatpush1.msra.mxu0 %v2519_v12  ;;  %2079 = vmatpush3.msra.mxu1 %v2581_v27 }
 0x231   : > { %829 = vmatprep.subr.mxu0 %v2523_v13  ;;  %2080 = vmatprep.subr.mxu1 %v3424_v0 }
 0x232   : > { %830 = vmatpush1.msra.mxu0 %v2530_v15  ;;  %2081 = vmatpush3.msra.mxu1 %v2594_v30 }
 0x233   : > { %831 = vmatprep.subr.mxu0 %v2538_v17  ;;  %2082 = vmatprep.subr.mxu1 %v3424_v0 }
 0x234   : > { %832 = vmatpush1.msra.mxu0 %v2546_v19  ;;  %2083 = vmatpush3.msra.mxu1 %v2607_v33 }
 0x235   : > { %833 = vmatprep.subr.mxu0 %v2551_v20  ;;  %2084 = vmatprep.subr.mxu1 %v3424_v0 }
 0x236   : > { %834 = vmatpush1.msra.mxu0 %v2559_v22  ;;  %2085 = vmatpush3.msra.mxu1 %v2620_v36 }
 0x237   : > { %835 = vmatprep.subr.mxu0 %v2564_v23  ;;  %2086 = vmatprep.subr.mxu1 %v3424_v0 }
 0x238   : > { %836 = vmatpush1.msra.mxu0 %v2572_v25  ;;  %2087 = vmatpush3.msra.mxu1 %v2633_v39 }
 0x239   : > { %837 = vmatprep.subr.mxu0 %v2577_v26  ;;  %2088 = vmatprep.subr.mxu1 %v3424_v0 }
 0x23a   : > { %838 = vmatpush1.msra.mxu0 %v2585_v28  ;;  %2089 = vmatpush3.msra.mxu1 %v2646_v42 }
 0x23b   : > { %839 = vmatprep.subr.mxu0 %v2590_v29  ;;  %2090 = vmatprep.subr.mxu1 %v3424_v0 }
 0x23c   : > { %840 = vmatpush1.msra.mxu0 %v2598_v31  ;;  %2091 = vmatpush3.msra.mxu1 %v2656_v44 }
 0x23d   : > { %841 = vmatprep.subr.mxu0 %v2603_v32  ;;  %2092 = vmatprep.subr.mxu1 %v3424_v0 }
 0x23e   : > { %842 = vmatpush1.msra.mxu0 %v2611_v34  ;;  %2093 = vmatpush3.msra.mxu1 %v2663_v45 }
 0x23f   : > { %843 = vmatprep.subr.mxu0 %v2616_v35  ;;  %2094 = vmatprep.subr.mxu1 %v3424_v0 }
 0x240   : > { %844 = vmatpush1.msra.mxu0 %v2624_v37  ;;  %2095 = vmatpush3.msra.mxu1 %v2669_v46 }
 0x241   : > { %845 = vmatprep.subr.mxu0 %v2629_v38  ;;  %2096 = vmatprep.subr.mxu1 %v3424_v0 }
 0x242   : > { %846 = vmatpush1.msra.mxu0 %v2637_v40  ;;  %2097 = vmatpush3.msra.mxu1 %v2676_v47 }
 0x243   : > { %847 = vmatprep.subr.mxu0 %v2642_v41  ;;  %2098 = vmatprep.subr.mxu1 %v3424_v0  ;;  %v1790_v41 = vld [vmem:[%s2758_s23 + $0x40] sm:$0xff] }
 0x244   : > { %848 = vmatpush1.msra.mxu0 %v3425_v1  ;;  %881 = vmatprep.mubr.f32.mxu0 %v3424_v0 }
 0x245   : > { %2099 = vmatpush3.msra.mxu1 %v3426_v43  ;;  %2100 = vmatprep.mubr.msk.f32.mxu1 %vm2425_vm0, %v3424_v0 }
 0x246   : > { %986 = vmatprep.subr.mxu0 %v3427_v48  ;;  %2103 = vmatprep.subr.mxu1 %v3424_v0 }
 0x2e5   : > { %v714_v63 = vpop.f32.mrf.mxu0  ;;  %v785_v55 = vpop.f32.mrf.mxu1 }
 0x2e6   : > { %v789_v57 = vadd.f32 %v1788_v60, %v714_v63  ;;  %v803_v43 = vadd.f32 %v2769_v62, %v785_v55  ;;  %v1796_v55 = vld [vmem:[%s2758_s23 + $0x58] sm:$0xff] }
 0x2e7   : > { %v2067_v58 = vpop.f32.mrf.mxu1  ;;  %v716_v61 = vpop.f32.mrf.mxu0 }
 0x2e8   : > { %v1791_v59 = vmul.f32 -1.442695, %v789_v57  ;;  %v796_v49 = vadd.f32 %v1789_v56, %v716_v61 }
 0x2ea   : > { %2291 = vpow2.f32 %v1791_v59  ;;  %v1792_v50 = vmul.f32 -1.442695, %v796_v49 }
 0x2ec   : > { %2293 = vpow2.f32 %v1792_v50 }
 0x2f7   : > { %v2292_v51 = vpop.eup %2291 }
 0x2f8   : > { %v793_v52 = vadd.f32 1.0, %v2292_v51 }
 0x2f9   : > { %v2294_v53 = vpop.eup %2293 }
 0x2fa   : > { %2295 = vrcp.f32 %v793_v52  ;;  %v800_v48 = vadd.f32 1.0, %v2294_v53 }
 0x2fc   : > { %2297 = vrcp.f32 %v800_v48 }
 0x307   : > { %v2296_v1 = vpop.eup %2295 }
 0x308   : > { %v804_v60 = vmul.f32 %v2296_v1, %v803_v43 }
 0x309   : > { %v2298_v57 = vpop.eup %2297 }
 0x30a   : > { %v805_v63 = vadd.f32 %v1790_v41, %v804_v60  ;;  %v807_v58 = vsub.f32 1.0, %v2298_v57  ;;  %v809_v61 = vmul.f32 %v2298_v57, %v2857_v54 }
 0x30c   : > { %2299 = vtanh.f32 %v805_v63 }
 0x319   : > { %v2300_v59 = vpop.eup %2299 }
 0x31a   : > { %v808_v56 = vmul.f32 %v2300_v59, %v807_v58  ;;  %v3020_v59 = vld [vmem:[%s2474_s19 + $0x168] sm:$0xff] }
 0x31c   : > { %v2935_v49 = vadd.f32 %v809_v61, %v808_v56  ;;  %v3025_v56 = vld [vmem:[%s2474_s19 + $0x158] sm:$0xff]  ;;  %v3030_v61 = vld [vmem:[%s2474_s19 + $0x150] sm:$0xff] }
 0x31e   : > { %1793 = vst [vmem:[%s2777_s30 + $0x10] sm:$0xff] %v2935_v49  ;;  %882 = vmatmul.mubr.f32.vlgmr.msra.gmra.mxu0 %v2935_v49  ;;  %2101 = vmatmul.mubr.f32.vlgmr.msra.gmra.mxu1 %v2935_v49 }
 0x31f   : > { %987 = vmatpush1.msra.mxu0 %v2480_v2  ;;  %2104 = vmatpush3.msra.mxu1 %v2526_v14  ;;  %v3428_v2 = vld [vmem:[#allocation4_spill] sm:$0xff] }
 0x320   : > { %988 = vmatprep.subr.mxu0 %v2483_v3  ;;  %2105 = vmatprep.subr.mxu1 %v3424_v0  ;;  %v3429_v3 = vld [vmem:[#allocation5_spill] sm:$0xff] }
 0x321   : > { %989 = vmatpush1.msra.mxu0 %v2487_v4  ;;  %2106 = vmatpush3.msra.mxu1 %v2534_v16  ;;  %v3430_v4 = vld [vmem:[#allocation6_spill] sm:$0xff] }
 0x322   : > { %990 = vmatprep.subr.mxu0 %v2491_v5  ;;  %2107 = vmatprep.subr.mxu1 %v3424_v0  ;;  %v3431_v5 = vld [vmem:[#allocation3_spill] sm:$0xff] }
 0x323   : > { %991 = vmatpush1.msra.mxu0 %v2495_v6  ;;  %2108 = vmatpush3.msra.mxu1 %v2542_v18  ;;  %v1794_v6 = vld [vmem:[%s2758_s23 + $0x48] sm:$0xff] }
 0x324   : > { %992 = vmatprep.subr.mxu0 %v2499_v7  ;;  %2109 = vmatprep.subr.mxu1 %v3424_v0 }
 0x325   : > { %993 = vmatpush1.msra.mxu0 %v2503_v8  ;;  %2110 = vmatpush3.msra.mxu1 %v2555_v21 }
 0x326   : > { %994 = vmatprep.subr.mxu0 %v2507_v9  ;;  %2111 = vmatprep.subr.mxu1 %v3424_v0 }
 0x327   : > { %995 = vmatpush1.msra.mxu0 %v2511_v10  ;;  %2112 = vmatpush3.msra.mxu1 %v2568_v24 }
 0x328   : > { %996 = vmatprep.subr.mxu0 %v2515_v11  ;;  %2113 = vmatprep.subr.mxu1 %v3424_v0 }
 0x329   : > { %997 = vmatpush1.msra.mxu0 %v2519_v12  ;;  %2114 = vmatpush3.msra.mxu1 %v2581_v27  ;;  %v1795_v12 = vld [vmem:[%s2758_s23 + $0x50] sm:$0xff] }
 0x32a   : > { %998 = vmatprep.subr.mxu0 %v2523_v13  ;;  %2115 = vmatprep.subr.mxu1 %v3424_v0 }
 0x32b   : > { %999 = vmatpush1.msra.mxu0 %v2530_v15  ;;  %2116 = vmatpush3.msra.mxu1 %v2594_v30 }
 0x32c   : > { %1000 = vmatprep.subr.mxu0 %v2538_v17  ;;  %2117 = vmatprep.subr.mxu1 %v3424_v0 }
 0x32d   : > { %1001 = vmatpush1.msra.mxu0 %v2546_v19  ;;  %2118 = vmatpush3.msra.mxu1 %v2607_v33 }
 0x32e   : > { %1002 = vmatprep.subr.mxu0 %v2551_v20  ;;  %2119 = vmatprep.subr.mxu1 %v3424_v0 }
 0x32f   : > { %1003 = vmatpush1.msra.mxu0 %v2559_v22  ;;  %2120 = vmatpush3.msra.mxu1 %v2620_v36 }
 0x330   : > { %1004 = vmatprep.subr.mxu0 %v2564_v23  ;;  %2121 = vmatprep.subr.mxu1 %v3424_v0 }
 0x331   : > { %1005 = vmatpush1.msra.mxu0 %v2572_v25  ;;  %2122 = vmatpush3.msra.mxu1 %v2633_v39 }
 0x332   : > { %1006 = vmatprep.subr.mxu0 %v2577_v26  ;;  %2123 = vmatprep.subr.mxu1 %v3424_v0 }
 0x333   : > { %1007 = vmatpush1.msra.mxu0 %v2585_v28  ;;  %2124 = vmatpush3.msra.mxu1 %v2646_v42 }
 0x334   : > { %1008 = vmatprep.subr.mxu0 %v2590_v29  ;;  %2125 = vmatprep.subr.mxu1 %v3424_v0 }
 0x335   : > { %1009 = vmatpush1.msra.mxu0 %v2598_v31  ;;  %2126 = vmatpush3.msra.mxu1 %v2656_v44 }
 0x336   : > { %1010 = vmatprep.subr.mxu0 %v2603_v32  ;;  %2127 = vmatprep.subr.mxu1 %v3424_v0 }
 0x337   : > { %1011 = vmatpush1.msra.mxu0 %v2611_v34  ;;  %2128 = vmatpush3.msra.mxu1 %v2663_v45 }
 0x338   : > { %1012 = vmatprep.subr.mxu0 %v2616_v35  ;;  %2129 = vmatprep.subr.mxu1 %v3424_v0 }
 0x339   : > { %1013 = vmatpush1.msra.mxu0 %v2624_v37  ;;  %2130 = vmatpush3.msra.mxu1 %v2669_v46 }
 0x33a   : > { %1014 = vmatprep.subr.mxu0 %v2629_v38  ;;  %2131 = vmatprep.subr.mxu1 %v3424_v0 }
 0x33b   : > { %1015 = vmatpush1.msra.mxu0 %v2637_v40  ;;  %2132 = vmatpush3.msra.mxu1 %v2676_v47 }
 0x33c   : > { %1016 = vmatprep.subr.mxu0 %v3428_v2  ;;  %2133 = vmatprep.subr.mxu1 %v3424_v0 }
 0x33d   : > { %1017 = vmatpush1.msra.mxu0 %v3429_v3  ;;  %1050 = vmatprep.mubr.f32.mxu0 %v3424_v0 }
 0x33e   : > { %2134 = vmatpush3.msra.mxu1 %v3430_v4  ;;  %2135 = vmatprep.mubr.msk.f32.mxu1 %vm2425_vm0, %v3424_v0 }
 0x33f   : > { %1155 = vmatprep.subr.mxu0 %v3431_v5  ;;  %2138 = vmatprep.subr.mxu1 %v3424_v0  ;;  %v3045_v5 = vld [vmem:[%s2474_s19 + $0x128] sm:$0xff] }
 0x3de   : > { %v883_v7 = vpop.f32.mrf.mxu0  ;;  %v954_v8 = vpop.f32.mrf.mxu1 }
 0x3df   : > { %v958_v9 = vadd.f32 %v1794_v6, %v883_v7  ;;  %v972_v43 = vadd.f32 %v2769_v62, %v954_v8  ;;  %v3055_v6 = vld [vmem:[%s2474_s19 + $0x110] sm:$0xff]  ;;  %v3065_v7 = vld [vmem:[%s2474_s19 + $0xf8] sm:$0xff]  ;;  %v3075_v8 = vld [vmem:[%s2474_s19 + $0xe0] sm:$0xff] }
 0x3e0   : > { %v2102_v10 = vpop.f32.mrf.mxu1  ;;  %v885_v13 = vpop.f32.mrf.mxu0 }
 0x3e1   : > { %v1797_v11 = vmul.f32 -1.442695, %v958_v9  ;;  %v965_v15 = vadd.f32 %v1795_v12, %v885_v13  ;;  %v3085_v9 = vld [vmem:[%s2474_s19 + $0xc8] sm:$0xff]  ;;  %v3090_v10 = vld [vmem:[%s2474_s19 + $0xc0] sm:$0xff]  ;;  %v3168_v13 = vld [vmem:[%s2474_s19 + $0x130] sm:$0xff] }
 0x3e2   : > { %v3161_v12 = vld [vmem:[%s2474_s19 + $0x148] sm:$0xff] }
 0x3e3   : > { %2301 = vpow2.f32 %v1797_v11  ;;  %v1798_v17 = vmul.f32 -1.442695, %v965_v15  ;;  %v3154_v11 = vld [vmem:[%s2474_s19 + $0x160] sm:$0xff]  ;;  %v3175_v15 = vld [vmem:[%s2474_s19 + $0x118] sm:$0xff] }
 0x3e5   : > { %2303 = vpow2.f32 %v1798_v17  ;;  %v3182_v17 = vld [vmem:[%s2474_s19 + $0x100] sm:$0xff] }
 0x3f0   : > { %v2302_v19 = vpop.eup %2301 }
 0x3f1   : > { %v962_v41 = vadd.f32 1.0, %v2302_v19  ;;  %v3189_v19 = vld [vmem:[%s2474_s19 + $0xe8] sm:$0xff] }
 0x3f2   : > { %v2304_v54 = vpop.eup %2303 }
 0x3f3   : > { %2305 = vrcp.f32 %v962_v41  ;;  %v969_v1 = vadd.f32 1.0, %v2304_v54  ;;  %v3196_v41 = vld [vmem:[%s2474_s19 + $0xd0] sm:$0xff] }
 0x3f4   : > { %v3200_v54 = vld [vmem:[%s2474_s19 + $0xb0] sm:$0xff] }
 0x3f5   : > { %2307 = vrcp.f32 %v969_v1  ;;  %v3205_v1 = vld [vmem:[%s2474_s19 + $0xa8] sm:$0xff] }
 0x400   : > { %v2306_v48 = vpop.eup %2305 }
 0x401   : > { %v973_v50 = vmul.f32 %v2306_v48, %v972_v43  ;;  %v3209_v43 = vld [vmem:[%s2474_s19 + $0xb8] sm:$0xff] }
 0x402   : > { %v2308_v52 = vpop.eup %2307  ;;  %v3213_v48 = vld [vmem:[%s2474_s19 + $0x98] sm:$0xff] }
 0x403   : > { %v974_v51 = vadd.f32 %v1796_v55, %v973_v50  ;;  %v976_v53 = vsub.f32 1.0, %v2308_v52  ;;  %v978_v57 = vmul.f32 %v2308_v52, %v2935_v49  ;;  %v3035_v49 = vld [vmem:[%s2474_s19 + $0x140] sm:$0xff]  ;;  %v3218_v55 = vld [vmem:[%s2474_s19 + $0x90] sm:$0xff]  ;;  %v3231_v52 = vld [vmem:[%s2474_s19 + $0x78] sm:$0xff] }
 0x404   : > { %v3222_v50 = vld [vmem:[%s2474_s19 + $0xa0] sm:$0xff] }
 0x405   : > { %2309 = vtanh.f32 %v974_v51  ;;  %v3226_v51 = vld [vmem:[%s2474_s19 + $0x80] sm:$0xff] }
 0x412   : > { %v2310_v60 = vpop.eup %2309 }
 0x413   : > { %v977_v63 = vmul.f32 %v2310_v60, %v976_v53  ;;  %v3235_v53 = vld [vmem:[%s2474_s19 + $0x88] sm:$0xff] }
 0x414   : > { %v3239_v60 = vld [vmem:[%s2474_s19 + $0x68] sm:$0xff] }
 0x415   : > { %v3013_v58 = vadd.f32 %v978_v57, %v977_v63  ;;  %v3244_v63 = vld [vmem:[%s2474_s19 + $0x60] sm:$0xff]  ;;  %v3248_v57 = vld [vmem:[%s2474_s19 + $0x70] sm:$0xff] }
 0x417   : > { %1799 = vst [vmem:[%s2777_s30 + $0x18] sm:$0xff] %v3013_v58  ;;  %1051 = vmatmul.mubr.f32.vlgmr.msra.gmra.mxu0 %v3013_v58  ;;  %2136 = vmatmul.mubr.f32.vlgmr.msra.gmra.mxu1 %v3013_v58 }
 0x418   : > { %1156 = vmatpush1.msra.mxu0 %v3020_v59  ;;  %2139 = vmatpush3.msra.mxu1 %v2526_v14  ;;  %v3040_v14 = vld [vmem:[%s2474_s19 + $0x138] sm:$0xff] }
 0x419   : > { %1157 = vmatprep.subr.mxu0 %v3025_v56  ;;  %2140 = vmatprep.subr.mxu1 %v3424_v0 }
 0x41a   : > { %1158 = vmatpush1.msra.mxu0 %v3030_v61  ;;  %2141 = vmatpush3.msra.mxu1 %v2534_v16  ;;  %v3050_v16 = vld [vmem:[%s2474_s19 + $0x120] sm:$0xff] }
 0x41b   : > { %1159 = vmatprep.subr.mxu0 %v3035_v49  ;;  %2142 = vmatprep.subr.mxu1 %v3424_v0 }
 0x41c   : > { %1160 = vmatpush1.msra.mxu0 %v3040_v14  ;;  %2143 = vmatpush3.msra.mxu1 %v2542_v18  ;;  %v3060_v18 = vld [vmem:[%s2474_s19 + $0x108] sm:$0xff] }
 0x41d   : > { %1161 = vmatprep.subr.mxu0 %v3045_v5  ;;  %2144 = vmatprep.subr.mxu1 %v3424_v0 }
 0x41e   : > { %1162 = vmatpush1.msra.mxu0 %v3050_v16  ;;  %2145 = vmatpush3.msra.mxu1 %v2555_v21  ;;  %v3070_v21 = vld [vmem:[%s2474_s19 + $0xf0] sm:$0xff] }
 0x41f   : > { %1163 = vmatprep.subr.mxu0 %v3055_v6  ;;  %2146 = vmatprep.subr.mxu1 %v3424_v0 }
 0x420   : > { %1164 = vmatpush1.msra.mxu0 %v3060_v18  ;;  %2147 = vmatpush3.msra.mxu1 %v2568_v24  ;;  %v3080_v24 = vld [vmem:[%s2474_s19 + $0xd8] sm:$0xff] }
 0x421   : > { %1165 = vmatprep.subr.mxu0 %v3065_v7  ;;  %2148 = vmatprep.subr.mxu1 %v3424_v0 }
 0x422   : > { %1166 = vmatpush1.msra.mxu0 %v3070_v21  ;;  %2149 = vmatpush3.msra.mxu1 %v2581_v27 }
 0x423   : > { %1167 = vmatprep.subr.mxu0 %v3075_v8  ;;  %2150 = vmatprep.subr.mxu1 %v3424_v0 }
 0x424   : > { %1168 = vmatpush1.msra.mxu0 %v3080_v24  ;;  %2151 = vmatpush3.msra.mxu1 %v2594_v30 }
 0x425   : > { %1169 = vmatprep.subr.mxu0 %v3085_v9  ;;  %2152 = vmatprep.subr.mxu1 %v3424_v0 }
 0x426   : > { %1170 = vmatpush1.msra.mxu0 %v3090_v10  ;;  %2153 = vmatpush3.msra.mxu1 %v2607_v33 }
 0x427   : > { %1171 = vmatprep.subr.mxu0 %v2551_v20  ;;  %2154 = vmatprep.subr.mxu1 %v3424_v0  ;;  %v3130_v20 = vld [vmem:[%s2474_s19 + $0x170] sm:$0xff] }
 0x428   : > { %1172 = vmatpush1.msra.mxu0 %v2559_v22  ;;  %2155 = vmatpush3.msra.mxu1 %v2620_v36  ;;  %v1800_v22 = vld [vmem:[%s2758_s23 + $0x60] sm:$0xff] }
 0x429   : > { %1173 = vmatprep.subr.mxu0 %v2564_v23  ;;  %2156 = vmatprep.subr.mxu1 %v3424_v0 }
 0x42a   : > { %1174 = vmatpush1.msra.mxu0 %v2572_v25  ;;  %2157 = vmatpush3.msra.mxu1 %v2633_v39  ;;  %v1802_v39 = vld [vmem:[%s2758_s23 + $0x70] sm:$0xff] }
 0x42b   : > { %1175 = vmatprep.subr.mxu0 %v2577_v26  ;;  %2158 = vmatprep.subr.mxu1 %v3424_v0 }
 0x42c   : > { %1176 = vmatpush1.msra.mxu0 %v2585_v28  ;;  %2159 = vmatpush3.msra.mxu1 %v2646_v42 }
 0x42d   : > { %1177 = vmatprep.subr.mxu0 %v2590_v29  ;;  %2160 = vmatprep.subr.mxu1 %v3424_v0  ;;  %v1801_v29 = vld [vmem:[%s2758_s23 + $0x68] sm:$0xff] }
 0x42e   : > { %1178 = vmatpush1.msra.mxu0 %v2598_v31  ;;  %2161 = vmatpush3.msra.mxu1 %v2656_v44 }
 0x42f   : > { %1179 = vmatprep.subr.mxu0 %v2603_v32  ;;  %2162 = vmatprep.subr.mxu1 %v3424_v0 }
 0x430   : > { %1180 = vmatpush1.msra.mxu0 %v2611_v34  ;;  %2163 = vmatpush3.msra.mxu1 %v2663_v45 }
 0x431   : > { %1181 = vmatprep.subr.mxu0 %v2616_v35  ;;  %2164 = vmatprep.subr.mxu1 %v3424_v0 }
 0x432   : > { %1182 = vmatpush1.msra.mxu0 %v2624_v37  ;;  %2165 = vmatpush3.msra.mxu1 %v2669_v46 }
 0x433   : > { %1183 = vmatprep.subr.mxu0 %v2629_v38  ;;  %2166 = vmatprep.subr.mxu1 %v3424_v0 }
 0x434   : > { %1184 = vmatpush1.msra.mxu0 %v2637_v40  ;;  %2167 = vmatpush3.msra.mxu1 %v2676_v47 }
 0x435   : > { %1185 = vmatprep.subr.mxu0 %v3428_v2  ;;  %2168 = vmatprep.subr.mxu1 %v3424_v0 }
 0x436   : > { %1186 = vmatpush1.msra.mxu0 %v3429_v3  ;;  %1219 = vmatprep.mubr.f32.mxu0 %v3424_v0 }
 0x437   : > { %2169 = vmatpush3.msra.mxu1 %v3430_v4  ;;  %2170 = vmatprep.mubr.msk.f32.mxu1 %vm2425_vm0, %v3424_v0  ;;  %v3147_v4 = vld [vmem:[%s2474_s19 + $0x178] sm:$0xff] }
 0x438   : > { %1324 = vmatprep.subr.mxu0 %v3130_v20  ;;  %2173 = vmatprep.subr.mxu1 %v3424_v0 }
 0x4d7   : > { %v1052_v23 = vpop.f32.mrf.mxu0  ;;  %v1123_v25 = vpop.f32.mrf.mxu1 }
 0x4d8   : > { %v1127_v26 = vadd.f32 %v1800_v22, %v1052_v23  ;;  %v1141_v37 = vadd.f32 %v2769_v62, %v1123_v25  ;;  %v3257_v22 = vld [vmem:[%s2474_s19 + $0x48] sm:$0xff]  ;;  %v3261_v23 = vld [vmem:[%s2474_s19 + $0x58] sm:$0xff] }
 0x4d9   : > { %v2137_v27 = vpop.f32.mrf.mxu1  ;;  %v1054_v30 = vpop.f32.mrf.mxu0  ;;  %v3265_v25 = vld [vmem:[%s2474_s19 + $0x38] sm:$0xff] }
 0x4da   : > { %v1803_v28 = vmul.f32 -1.442695, %v1127_v26  ;;  %v1134_v31 = vadd.f32 %v1801_v29, %v1054_v30  ;;  %v3270_v26 = vld [vmem:[%s2474_s19 + $0x30] sm:$0xff]  ;;  %v3274_v27 = vld [vmem:[%s2474_s19 + $0x40] sm:$0xff]  ;;  %v3283_v29 = vld [vmem:[%s2474_s19 + $0x18] sm:$0xff] }
 0x4db   : > { %v3287_v30 = vld [vmem:[%s2474_s19 + $0x28] sm:$0xff] }
 0x4dc   : > { %2311 = vpow2.f32 %v1803_v28  ;;  %v1804_v32 = vmul.f32 -1.442695, %v1134_v31  ;;  %v3278_v28 = vld [vmem:[%s2474_s19 + $0x20] sm:$0xff]  ;;  %v3291_v31 = vld [vmem:[%s2474_s19 + $0x8] sm:$0xff] }
 0x4dd   : > { %3432 = vst [vmem:[#allocation4_spill] sm:$0xff] %v3291_v31 }
 0x4de   : > { %2313 = vpow2.f32 %v1804_v32  ;;  %v3296_v32 = vld [vmem:[%s2474_s19] sm:$0xff] }
 0x4df   : > { %3433 = vst [vmem:[#allocation5_spill] sm:$0xff] %v3296_v32 }
 0x4e9   : > { %v2312_v33 = vpop.eup %2311 }
 0x4ea   : > { %v1131_v34 = vadd.f32 1.0, %v2312_v33  ;;  %v3301_v33 = vld [vmem:[%s2474_s19 + $0x10] sm:$0xff] }
 0x4eb   : > { %v2314_v35 = vpop.eup %2313  ;;  %3434 = vst [vmem:[#allocation6_spill] sm:$0xff] %v3301_v33 }
 0x4ec   : > { %2315 = vrcp.f32 %v1131_v34  ;;  %v1138_v36 = vadd.f32 1.0, %v2314_v35  ;;  %v1806_v34 = vld [vmem:[%s2758_s23 + $0x78] sm:$0xff] }
 0x4ee   : > { %2317 = vrcp.f32 %v1138_v36 }
 0x4f9   : > { %v2316_v38 = vpop.eup %2315 }
 0x4fa   : > { %v1142_v40 = vmul.f32 %v2316_v38, %v1141_v37 }
 0x4fb   : > { %v2318_v44 = vpop.eup %2317 }
 0x4fc   : > { %v1143_v42 = vadd.f32 %v1802_v39, %v1142_v40  ;;  %v1145_v45 = vsub.f32 1.0, %v2318_v44  ;;  %v1147_v2 = vmul.f32 %v2318_v44, %v3013_v58  ;;  %v3252_v58 = vld [vmem:[%s2474_s19 + $0x50] sm:$0xff]  ;;  %v1807_v40 = vld [vmem:[%s2758_s23 + $0x80] sm:$0xff] }
 0x4fe   : > { %2319 = vtanh.f32 %v1143_v42 }
 0x50b   : > { %v2320_v46 = vpop.eup %2319 }
 0x50c   : > { %v1146_v47 = vmul.f32 %v2320_v46, %v1145_v45 }
 0x50e   : > { %v3139_v3 = vadd.f32 %v1147_v2, %v1146_v47 }
 0x510   : > { %1805 = vst [vmem:[%s2777_s30 + $0x20] sm:$0xff] %v3139_v3  ;;  %1220 = vmatmul.mubr.f32.vlgmr.msra.gmra.mxu0 %v3139_v3  ;;  %2171 = vmatmul.mubr.f32.vlgmr.msra.gmra.mxu1 %v3139_v3 }
 0x511   : > { %1325 = vmatpush1.msra.mxu0 %v3020_v59  ;;  %2174 = vmatpush3.msra.mxu1 %v3147_v4 }
 0x512   : > { %1326 = vmatprep.subr.mxu0 %v3025_v56  ;;  %2175 = vmatprep.subr.mxu1 %v3424_v0 }
 0x513   : > { %1327 = vmatpush1.msra.mxu0 %v3030_v61  ;;  %2176 = vmatpush3.msra.mxu1 %v3154_v11 }
 0x514   : > { %1328 = vmatprep.subr.mxu0 %v3035_v49  ;;  %2177 = vmatprep.subr.mxu1 %v3424_v0 }
 0x515   : > { %1329 = vmatpush1.msra.mxu0 %v3040_v14  ;;  %2178 = vmatpush3.msra.mxu1 %v3161_v12 }
 0x516   : > { %1330 = vmatprep.subr.mxu0 %v3045_v5  ;;  %2179 = vmatprep.subr.mxu1 %v3424_v0 }
 0x517   : > { %1331 = vmatpush1.msra.mxu0 %v3050_v16  ;;  %2180 = vmatpush3.msra.mxu1 %v3168_v13 }
 0x518   : > { %1332 = vmatprep.subr.mxu0 %v3055_v6  ;;  %2181 = vmatprep.subr.mxu1 %v3424_v0 }
 0x519   : > { %1333 = vmatpush1.msra.mxu0 %v3060_v18  ;;  %2182 = vmatpush3.msra.mxu1 %v3175_v15 }
 0x51a   : > { %1334 = vmatprep.subr.mxu0 %v3065_v7  ;;  %2183 = vmatprep.subr.mxu1 %v3424_v0 }
 0x51b   : > { %1335 = vmatpush1.msra.mxu0 %v3070_v21  ;;  %2184 = vmatpush3.msra.mxu1 %v3182_v17 }
 0x51c   : > { %1336 = vmatprep.subr.mxu0 %v3075_v8  ;;  %2185 = vmatprep.subr.mxu1 %v3424_v0 }
 0x51d   : > { %1337 = vmatpush1.msra.mxu0 %v3080_v24  ;;  %2186 = vmatpush3.msra.mxu1 %v3189_v19 }
 0x51e   : > { %1338 = vmatprep.subr.mxu0 %v3085_v9  ;;  %2187 = vmatprep.subr.mxu1 %v3424_v0 }
 0x51f   : > { %1339 = vmatpush1.msra.mxu0 %v3090_v10  ;;  %2188 = vmatpush3.msra.mxu1 %v3196_v41 }
 0x520   : > { %1340 = vmatprep.subr.mxu0 %v3200_v54  ;;  %2189 = vmatprep.subr.mxu1 %v3424_v0 }
 0x521   : > { %1341 = vmatpush1.msra.mxu0 %v3205_v1  ;;  %2190 = vmatpush3.msra.mxu1 %v3209_v43 }
 0x522   : > { %1342 = vmatprep.subr.mxu0 %v3213_v48  ;;  %2191 = vmatprep.subr.mxu1 %v3424_v0 }
 0x523   : > { %1343 = vmatpush1.msra.mxu0 %v3218_v55  ;;  %2192 = vmatpush3.msra.mxu1 %v3222_v50 }
 0x524   : > { %1344 = vmatprep.subr.mxu0 %v3226_v51  ;;  %2193 = vmatprep.subr.mxu1 %v3424_v0 }
 0x525   : > { %1345 = vmatpush1.msra.mxu0 %v3231_v52  ;;  %2194 = vmatpush3.msra.mxu1 %v3235_v53 }
 0x526   : > { %1346 = vmatprep.subr.mxu0 %v3239_v60  ;;  %2195 = vmatprep.subr.mxu1 %v3424_v0 }
 0x527   : > { %1347 = vmatpush1.msra.mxu0 %v3244_v63  ;;  %2196 = vmatpush3.msra.mxu1 %v3248_v57 }
 0x528   : > { %1348 = vmatprep.subr.mxu0 %v3252_v58  ;;  %2197 = vmatprep.subr.mxu1 %v3424_v0 }
 0x529   : > { %1349 = vmatpush1.msra.mxu0 %v3257_v22  ;;  %2198 = vmatpush3.msra.mxu1 %v3261_v23 }
 0x52a   : > { %1350 = vmatprep.subr.mxu0 %v3265_v25  ;;  %2199 = vmatprep.subr.mxu1 %v3424_v0 }
 0x52b   : > { %1351 = vmatpush1.msra.mxu0 %v3270_v26  ;;  %2200 = vmatpush3.msra.mxu1 %v3274_v27 }
 0x52c   : > { %1352 = vmatprep.subr.mxu0 %v3278_v28  ;;  %2201 = vmatprep.subr.mxu1 %v3424_v0 }
 0x52d   : > { %1353 = vmatpush1.msra.mxu0 %v3283_v29  ;;  %2202 = vmatpush3.msra.mxu1 %v3287_v30 }
 0x52e   : > { %1354 = vmatprep.subr.mxu0 %v3291_v31  ;;  %2203 = vmatprep.subr.mxu1 %v3424_v0  ;;  %v1808_v31 = vld [vmem:[%s2758_s23 + $0x88] sm:$0xff] }
 0x52f   : > { %1355 = vmatpush1.msra.mxu0 %v3296_v32  ;;  %1388 = vmatprep.mubr.f32.mxu0 %v3424_v0 }
 0x530   : > { %2204 = vmatpush3.msra.mxu1 %v3301_v33  ;;  %2205 = vmatprep.mubr.msk.f32.mxu1 %vm2425_vm0, %v3424_v0 }
 0x531   : > { %1493 = vmatprep.subr.mxu0 %v3130_v20  ;;  %2208 = vmatprep.subr.mxu1 %v3424_v0 }
 0x5d0   : > { %v1221_v35 = vpop.f32.mrf.mxu0  ;;  %v1292_v36 = vpop.f32.mrf.mxu1 }
 0x5d1   : > { %v1296_v37 = vadd.f32 %v1806_v34, %v1221_v35  ;;  %v1310_v33 = vadd.f32 %v2769_v62, %v1292_v36  ;;  %v3435_v62 = vld [vmem:[#allocation4_spill] sm:$0xff] }
 0x5d2   : > { %v2172_v38 = vpop.f32.mrf.mxu1  ;;  %v1223_v42 = vpop.f32.mrf.mxu0 }
 0x5d3   : > { %v1809_v39 = vmul.f32 -1.442695, %v1296_v37  ;;  %v1303_v44 = vadd.f32 %v1807_v40, %v1223_v42 }
 0x5d5   : > { %2321 = vpow2.f32 %v1809_v39  ;;  %v1810_v45 = vmul.f32 -1.442695, %v1303_v44 }
 0x5d7   : > { %2323 = vpow2.f32 %v1810_v45 }
 0x5e2   : > { %v2322_v46 = vpop.eup %2321 }
 0x5e3   : > { %v1300_v47 = vadd.f32 1.0, %v2322_v46 }
 0x5e4   : > { %v2324_v20 = vpop.eup %2323 }
 0x5e5   : > { %2325 = vrcp.f32 %v1300_v47  ;;  %v1307_v2 = vadd.f32 1.0, %v2324_v20 }
 0x5e7   : > { %2327 = vrcp.f32 %v1307_v2 }
 0x5f2   : > { %v2326_v32 = vpop.eup %2325 }
 0x5f3   : > { %v1311_v34 = vmul.f32 %v2326_v32, %v1310_v33 }
 0x5f4   : > { %v2328_v37 = vpop.eup %2327 }
 0x5f5   : > { %v1312_v35 = vadd.f32 %v1808_v31, %v1311_v34  ;;  %v1314_v38 = vsub.f32 1.0, %v2328_v37  ;;  %v1316_v42 = vmul.f32 %v2328_v37, %v3139_v3  ;;  %v2399_v3 = vld [vmem:[%s2766_s26] ss:$0 sm:$0xff] }
 0x5f7   : > { %2329 = vtanh.f32 %v1312_v35 }
 0x604   : > { %v2330_v39 = vpop.eup %2329 }
 0x605   : > { %v1315_v40 = vmul.f32 %v2330_v39, %v1314_v38 }
 0x607   : > { %v3313_v44 = vadd.f32 %v1316_v42, %v1315_v40 }
 0x609   : > { %1811 = vst [vmem:[%s2777_s30 + $0x28] sm:$0xff] %v3313_v44  ;;  %1389 = vmatmul.mubr.f32.vlgmr.msra.gmra.mxu0 %v3313_v44  ;;  %2206 = vmatmul.mubr.f32.vlgmr.msra.gmra.mxu1 %v3313_v44 }
 0x60a   : > { %1494 = vmatpush1.msra.mxu0 %v3020_v59  ;;  %2209 = vmatpush3.msra.mxu1 %v3147_v4  ;;  %v3436_v59 = vld [vmem:[#allocation5_spill] sm:$0xff] }
 0x60b   : > { %1495 = vmatprep.subr.mxu0 %v3025_v56  ;;  %2210 = vmatprep.subr.mxu1 %v3424_v0  ;;  %v3437_v56 = vld [vmem:[#allocation6_spill] sm:$0xff] }
 0x60c   : > { %1496 = vmatpush1.msra.mxu0 %v3030_v61  ;;  %2211 = vmatpush3.msra.mxu1 %v3154_v11  ;;  %v1812_v61 = vld [vmem:[%s2758_s23 + $0x90] sm:$0xff] }
 0x60d   : > { %1497 = vmatprep.subr.mxu0 %v3035_v49  ;;  %2212 = vmatprep.subr.mxu1 %v3424_v0 }
 0x60e   : > { %1498 = vmatpush1.msra.mxu0 %v3040_v14  ;;  %2213 = vmatpush3.msra.mxu1 %v3161_v12  ;;  %v1814_v12 = vld [vmem:[%s2758_s23 + $0xa0] sm:$0xff] }
 0x60f   : > { %1499 = vmatprep.subr.mxu0 %v3045_v5  ;;  %2214 = vmatprep.subr.mxu1 %v3424_v0 }
 0x610   : > { %1500 = vmatpush1.msra.mxu0 %v3050_v16  ;;  %2215 = vmatpush3.msra.mxu1 %v3168_v13 }
 0x611   : > { %1501 = vmatprep.subr.mxu0 %v3055_v6  ;;  %2216 = vmatprep.subr.mxu1 %v3424_v0 }
 0x612   : > { %1502 = vmatpush1.msra.mxu0 %v3060_v18  ;;  %2217 = vmatpush3.msra.mxu1 %v3175_v15  ;;  %v1813_v18 = vld [vmem:[%s2758_s23 + $0x98] sm:$0xff] }
 0x613   : > { %1503 = vmatprep.subr.mxu0 %v3065_v7  ;;  %2218 = vmatprep.subr.mxu1 %v3424_v0 }
 0x614   : > { %1504 = vmatpush1.msra.mxu0 %v3070_v21  ;;  %2219 = vmatpush3.msra.mxu1 %v3182_v17 }
 0x615   : > { %1505 = vmatprep.subr.mxu0 %v3075_v8  ;;  %2220 = vmatprep.subr.mxu1 %v3424_v0 }
 0x616   : > { %1506 = vmatpush1.msra.mxu0 %v3080_v24  ;;  %2221 = vmatpush3.msra.mxu1 %v3189_v19 }
 0x617   : > { %1507 = vmatprep.subr.mxu0 %v3085_v9  ;;  %2222 = vmatprep.subr.mxu1 %v3424_v0 }
 0x618   : > { %1508 = vmatpush1.msra.mxu0 %v3090_v10  ;;  %2223 = vmatpush3.msra.mxu1 %v3196_v41 }
 0x619   : > { %1509 = vmatprep.subr.mxu0 %v3200_v54  ;;  %2224 = vmatprep.subr.mxu1 %v3424_v0 }
 0x61a   : > { %1510 = vmatpush1.msra.mxu0 %v3205_v1  ;;  %2225 = vmatpush3.msra.mxu1 %v3209_v43 }
 0x61b   : > { %1511 = vmatprep.subr.mxu0 %v3213_v48  ;;  %2226 = vmatprep.subr.mxu1 %v3424_v0  ;;  %v1818_v48 = vld [vmem:[%s2758_s23 + $0xa8] sm:$0xff] }
 0x61c   : > { %1512 = vmatpush1.msra.mxu0 %v3218_v55  ;;  %2227 = vmatpush3.msra.mxu1 %v3222_v50 }
 0x61d   : > { %1513 = vmatprep.subr.mxu0 %v3226_v51  ;;  %2228 = vmatprep.subr.mxu1 %v3424_v0 }
 0x61e   : > { %1514 = vmatpush1.msra.mxu0 %v3231_v52  ;;  %2229 = vmatpush3.msra.mxu1 %v3235_v53 }
 0x61f   : > { %1515 = vmatprep.subr.mxu0 %v3239_v60  ;;  %2230 = vmatprep.subr.mxu1 %v3424_v0  ;;  %v1819_v60 = vld [vmem:[%s2758_s23 + $0xb0] sm:$0xff] }
 0x620   : > { %1516 = vmatpush1.msra.mxu0 %v3244_v63  ;;  %2231 = vmatpush3.msra.mxu1 %v3248_v57 }
 0x621   : > { %1517 = vmatprep.subr.mxu0 %v3252_v58  ;;  %2232 = vmatprep.subr.mxu1 %v3424_v0 }
 0x622   : > { %1518 = vmatpush1.msra.mxu0 %v3257_v22  ;;  %2233 = vmatpush3.msra.mxu1 %v3261_v23 }
 0x623   : > { %1519 = vmatprep.subr.mxu0 %v3265_v25  ;;  %2234 = vmatprep.subr.mxu1 %v3424_v0 }
 0x624   : > { %1520 = vmatpush1.msra.mxu0 %v3270_v26  ;;  %2235 = vmatpush3.msra.mxu1 %v3274_v27 }
 0x625   : > { %1521 = vmatprep.subr.mxu0 %v3278_v28  ;;  %2236 = vmatprep.subr.mxu1 %v3424_v0 }
 0x626   : > { %1522 = vmatpush1.msra.mxu0 %v3283_v29  ;;  %2237 = vmatpush3.msra.mxu1 %v3287_v30  ;;  %v1820_v29 = vld [vmem:[%s2758_s23 + $0xb8] sm:$0xff] }
 0x627   : > { %1523 = vmatprep.subr.mxu0 %v3435_v62  ;;  %2238 = vmatprep.subr.mxu1 %v3424_v0 }
 0x628   : > { %1524 = vmatpush1.msra.mxu0 %v3436_v59  ;;  %1557 = vmatprep.mubr.f32.mxu0 %v3424_v0 }
 0x629   : > { %2239 = vmatpush3.msra.mxu1 %v3437_v56  ;;  %2240 = vmatprep.mubr.msk.f32.mxu1 %vm2425_vm0, %v3424_v0 }
 0x6c9   : > { %v1390_v49 = vpop.f32.mrf.mxu0  ;;  %v1461_v14 = vpop.f32.mrf.mxu1 }
 0x6ca   : > { %v1465_v5 = vadd.f32 %v1812_v61, %v1390_v49  ;;  %v1479_v4 = vadd.f32 %v2399_v3, %v1461_v14 }
 0x6cb   : > { %v2207_v16 = vpop.f32.mrf.mxu1  ;;  %v1392_v7 = vpop.f32.mrf.mxu0 }
 0x6cc   : > { %v1815_v6 = vmul.f32 -1.442695, %v1465_v5  ;;  %v1472_v21 = vadd.f32 %v1813_v18, %v1392_v7 }
 0x6ce   : > { %2331 = vpow2.f32 %v1815_v6  ;;  %v1816_v8 = vmul.f32 -1.442695, %v1472_v21 }
 0x6d0   : > { %2333 = vpow2.f32 %v1816_v8 }
 0x6db   : > { %v2332_v24 = vpop.eup %2331 }
 0x6dc   : > { %v1469_v9 = vadd.f32 1.0, %v2332_v24 }
 0x6dd   : > { %v2334_v10 = vpop.eup %2333 }
 0x6de   : > { %2335 = vrcp.f32 %v1469_v9  ;;  %v1476_v0 = vadd.f32 1.0, %v2334_v10 }
 0x6e0   : > { %2337 = vrcp.f32 %v1476_v0 }
 0x6eb   : > { %v2336_v11 = vpop.eup %2335 }
 0x6ec   : > { %v1480_v13 = vmul.f32 %v2336_v11, %v1479_v4 }
 0x6ed   : > { %v2338_v17 = vpop.eup %2337 }
 0x6ee   : > { %v1481_v15 = vadd.f32 %v1814_v12, %v1480_v13  ;;  %v1483_v19 = vsub.f32 1.0, %v2338_v17  ;;  %v1485_v1 = vmul.f32 %v2338_v17, %v3313_v44 }
 0x6f0   : > { %2339 = vtanh.f32 %v1481_v15 }
 0x6fd   : > { %v2340_v41 = vpop.eup %2339 }
 0x6fe   : > { %v1484_v54 = vmul.f32 %v2340_v41, %v1483_v19 }
 0x700   : > { %v1486_v43 = vadd.f32 %v1485_v1, %v1484_v54 }
 0x702   : > { %1817 = vst [vmem:[%s2777_s30 + $0x30] sm:$0xff] %v1486_v43  ;;  %1558 = vmatmul.mubr.f32.vlgmr.msra.gmra.mxu0 %v1486_v43  ;;  %2241 = vmatmul.mubr.f32.vlgmr.msra.gmra.mxu1 %v1486_v43 }
 0x7c2   : > { %v1559_v55 = vpop.f32.mrf.mxu0  ;;  %v1630_v50 = vpop.f32.mrf.mxu1 }
 0x7c3   : > { %v1634_v51 = vadd.f32 %v1818_v48, %v1559_v55  ;;  %v1648_v27 = vadd.f32 %v2399_v3, %v1630_v50 }
 0x7c4   : > { %v2242_v52 = vpop.f32.mrf.mxu1  ;;  %v1561_v63 = vpop.f32.mrf.mxu0 }
 0x7c5   : > { %v1821_v53 = vmul.f32 -1.442695, %v1634_v51  ;;  %v1641_v57 = vadd.f32 %v1819_v60, %v1561_v63 }
 0x7c7   : > { %2341 = vpow2.f32 %v1821_v53  ;;  %v1822_v58 = vmul.f32 -1.442695, %v1641_v57 }
 0x7c9   : > { %2343 = vpow2.f32 %v1822_v58 }
 0x7d4   : > { %v2342_v22 = vpop.eup %2341 }
 0x7d5   : > { %v1638_v23 = vadd.f32 1.0, %v2342_v22 }
 0x7d6   : > { %v2344_v25 = vpop.eup %2343 }
 0x7d7   : > { %2345 = vrcp.f32 %v1638_v23  ;;  %v1645_v26 = vadd.f32 1.0, %v2344_v25 }
 0x7d9   : > { %2347 = vrcp.f32 %v1645_v26 }
 0x7e4   : > { %v2346_v28 = vpop.eup %2345 }
 0x7e5   : > { %v1649_v30 = vmul.f32 %v2346_v28, %v1648_v27 }
 0x7e6   : > { %v2348_v32 = vpop.eup %2347 }
 0x7e7   : > { %v1650_v31 = vadd.f32 %v1820_v29, %v1649_v30  ;;  %v1652_v33 = vsub.f32 1.0, %v2348_v32  ;;  %v1654_v46 = vmul.f32 %v2348_v32, %v1486_v43 }
 0x7e9   : > { %2349 = vtanh.f32 %v1650_v31 }
 0x7f6   : > { %v2350_v36 = vpop.eup %2349 }
 0x7f7   : > { %v1653_v45 = vmul.f32 %v2350_v36, %v1652_v33 }
 0x7f9   : > { %v1655_v47 = vadd.f32 %v1654_v46, %v1653_v45 }
 0x7fb   : > { %1823 = vst [vmem:[%s2777_s30 + $0x38] sm:$0xff] %v1655_v47 }
 0x7fc PF: > { %s13_s14 = sadd.s32 1, %s2422_s14   ;;  %s3438_s12 = smov %s2418_s13 }
 0x7fd   : > { %p10_p5 = scmp.ge.s32.totalorder %s13_s14, 4   ;;  %s3439_s13 = smov %s3441_s15 }
 0x7ff   :  { %12 = sbr.rel (!%p10_p5) target bundleno = 2 (0x2), region = 86 }

</bundles_post_ra>
